<compile_context>
chip_gen: v6e
topology: v6e:2x2x1
jax: 0.10.0
libtpu: 0.0.40
codegen_flags: <defaults>
</compile_context>

<pallas_src>
import functools

import jax
import jax.numpy as jnp
import numpy as np
from jax import lax
from jax.experimental import pallas as pl
from jax.experimental.pallas import tpu as pltpu

EPS = 1e-5  # PyTorch BatchNorm default eps


# ------------------------- shared math (reference) -------------------------- #

def _bn_ref(h):
    """Training-mode BatchNorm1d (affine=False / gamma=1, beta=0), f32 math."""
    mean = jnp.mean(h, axis=0, keepdims=True)
    var = jnp.maximum(jnp.mean(h * h, axis=0, keepdims=True) - mean * mean, 0.0)
    return (h - mean) * lax.rsqrt(var + EPS)


def _mm_ref(a, w):
    """MXU-equivalent matmul: bf16 operands, f32 accumulation."""
    return jnp.dot(a.astype(jnp.bfloat16), w.astype(jnp.bfloat16),
                   preferred_element_type=jnp.float32)


# ------------------------------ fused kernel -------------------------------- #

def barlow_twins_kernel(x_ref, wb_ref, w1_ref, w2_ref, w3_ref, loss_ref, *,
                        lambd, batch):
    two_b = 2 * batch

    def mm(a, w_ref):
        # bf16 operands, f32 accumulation on the MXU.
        return jnp.dot(a.astype(jnp.bfloat16), w_ref[...],
                       preferred_element_type=jnp.float32)

    def bn(h):
        """Per-branch training-mode BatchNorm1d: (2B, N) -> (2, B, N) f32."""
        h3 = h.reshape(2, batch, h.shape[-1])
        mean = jnp.mean(h3, axis=1, keepdims=True)
        var = jnp.maximum(
            jnp.mean(h3 * h3, axis=1, keepdims=True) - mean * mean, 0.0)
        return (h3 - mean) * lax.rsqrt(var + EPS)

    x = x_ref[...]                                         # (2B, flat) bf16
    e = mm(x, wb_ref)                                      # backbone Linear
    h = jnp.maximum(bn(mm(e, w1_ref)), 0.0).reshape(two_b, -1)   # Lin->BN->ReLU
    h = jnp.maximum(bn(mm(h, w2_ref)), 0.0).reshape(two_b, -1)   # Lin->BN->ReLU
    zn = bn(mm(h, w3_ref))                                 # Lin -> BN(affine=False)

    # c = bn(z1).T @ bn(z2) / B  -- contract the batch axis directly.
    c = lax.dot_general(
        zn[0].astype(jnp.bfloat16), zn[1].astype(jnp.bfloat16),
        dimension_numbers=(((0,), (0,)), ((), ())),
        preferred_element_type=jnp.float32,
    ) * (1.0 / float(batch))

    d = c.shape[0]
    ii = lax.broadcasted_iota(jnp.int32, (d, d), 0)
    jj = lax.broadcasted_iota(jnp.int32, (d, d), 1)
    is_diag = ii == jj
    c2 = c * c
    # on_diag + lambd*off_diag == lambd*sum(c^2) + sum_diag((c-1)^2 - lambd*c^2)
    loss_ref[0, 0] = (lambd * jnp.sum(c2)
                      + jnp.sum(jnp.where(is_diag,
                                          (c - 1.0) ** 2 - lambd * c2, 0.0)))


# -------------------------------- wrapper ----------------------------------- #

def barlow_twins_forward(y1, y2, params, lambd):
    """Full BarlowTwins forward as one Pallas kernel; returns scalar loss."""
    B = y1.shape[0]
    # Stack both views so every projector Linear is one M=2B MXU matmul.
    x = jnp.concatenate([y1.reshape(B, -1), y2.reshape(B, -1)],
                        axis=0).astype(jnp.bfloat16)        # (2B, C*H*W)

    bf16 = jnp.bfloat16
    wb = params["Wb"].astype(bf16)
    w1 = params["W1"].astype(bf16)
    w2 = params["W2"].astype(bf16)
    w3 = params["W3"].astype(bf16)

    vmem = pl.BlockSpec(memory_space=pltpu.MemorySpace.VMEM)
    loss = pl.pallas_call(
        functools.partial(barlow_twins_kernel, lambd=lambd, batch=B),
        out_shape=jax.ShapeDtypeStruct((1, 1), jnp.float32),
        in_specs=[vmem] * 5,
        out_specs=pl.BlockSpec(memory_space=pltpu.MemorySpace.SMEM),
    )(x, wb, w1, w2, w3)
    return loss[0, 0]


# --------------------------- pure-JAX reference ------------------------------ #

def _reference(y1, y2, params, lambd):
    B = y1.shape[0]

    def branch(y):
        x = y.reshape(B, -1).astype(jnp.float32)
        e = _mm_ref(x, params["Wb"])
        h = jnp.maximum(_bn_ref(_mm_ref(e, params["W1"])), 0.0)
        h = jnp.maximum(_bn_ref(_mm_ref(h, params["W2"])), 0.0)
        return _bn_ref(_mm_ref(h, params["W3"]))

    z1n, z2n = branch(y1), branch(y2)
    c = lax.dot_general(
        z1n.astype(jnp.bfloat16), z2n.astype(jnp.bfloat16),
        dimension_numbers=(((0,), (0,)), ((), ())),
        preferred_element_type=jnp.float32,
    ) / B
    diag = jnp.diagonal(c)
    on_diag = jnp.sum((diag - 1.0) ** 2)
    off_diag = jnp.sum(c * c) - jnp.sum(diag * diag)
    return on_diag + lambd * off_diag


# ---------------------------------- main ------------------------------------- #

if __name__ == "__main__":
    # Small shapes consistent with the module's forward, chosen lane-dense:
    # every feature dim a multiple of 128, batch 128 so the loss contraction
    # (and BN batch statistics) use a full MXU depth / sublane set.
    B, C, H, W = 128, 4, 8, 8      # flatten -> 256 features
    in_features = 128              # synthetic backbone output width
    proj_dim = 256                 # stand-in for 8192 at synthetic scale
    lambd = 0.0051

    key = jax.random.PRNGKey(0)
    k_y1, k_y2, k_wb, k_w1, k_w2, k_w3 = jax.random.split(key, 6)

    flat = C * H * W
    params = {
        "Wb": jax.random.normal(k_wb, (flat, in_features), jnp.float32) / np.sqrt(flat),
        "W1": jax.random.normal(k_w1, (in_features, proj_dim), jnp.float32) / np.sqrt(in_features),
        "W2": jax.random.normal(k_w2, (proj_dim, proj_dim), jnp.float32) / np.sqrt(proj_dim),
        "W3": jax.random.normal(k_w3, (proj_dim, proj_dim), jnp.float32) / np.sqrt(proj_dim),
    }

    y1 = jax.random.normal(k_y1, (B, C, H, W), jnp.float32)
    y2 = jax.random.normal(k_y2, (B, C, H, W), jnp.float32)

    loss = jax.jit(functools.partial(barlow_twins_forward, lambd=lambd))(y1, y2, params)
    jax.block_until_ready(loss)

    ref = _reference(y1, y2, params, lambd)
    np.testing.assert_allclose(np.asarray(loss, dtype=np.float32),
                               np.asarray(ref, dtype=np.float32),
                               rtol=5e-3, atol=5e-3)

    print("KERNEL_OK")
</pallas_src>

<mosaic_0001>
module attributes {stable_mosaic.version = 11 : i64} {
  func.func @barlow_twins_kernel(%arg0: memref<256x256xbf16, #tpu.memory_space<vmem>>, %arg1: memref<256x128xbf16, #tpu.memory_space<vmem>>, %arg2: memref<128x256xbf16, #tpu.memory_space<vmem>>, %arg3: memref<256x256xbf16, #tpu.memory_space<vmem>>, %arg4: memref<256x256xbf16, #tpu.memory_space<vmem>>, %arg5: memref<1x1xf32, #tpu.memory_space<smem>>) attributes {dimension_semantics = [], scalar_prefetch = 0 : i64, scratch_operands = 0 : i64, tpu.core_type = #tpu.core_type<tc>} {
    %c0 = arith.constant 0 : index
    %c0_0 = arith.constant 0 : index
    %0 = vector.load %arg0[%c0, %c0_0] : memref<256x256xbf16, #tpu.memory_space<vmem>>, vector<256x256xbf16>
    %c0_1 = arith.constant 0 : index
    %c0_2 = arith.constant 0 : index
    %1 = vector.load %arg1[%c0_1, %c0_2] : memref<256x128xbf16, #tpu.memory_space<vmem>>, vector<256x128xbf16>
    %cst = arith.constant dense<0.000000e+00> : vector<256x128xf32>
    %2 = tpu.matmul %0, %1, %cst {dimension_numbers = #tpu.dot_dimension_numbers<[1], [0], [0], [1], [0, 0, 1, 1], [], []>} : vector<256x256xbf16>, vector<256x128xbf16>, vector<256x128xf32> -> vector<256x128xf32>
    %3 = arith.truncf %2 : vector<256x128xf32> to vector<256x128xbf16>
    %c0_3 = arith.constant 0 : index
    %c0_4 = arith.constant 0 : index
    %4 = vector.load %arg2[%c0_3, %c0_4] : memref<128x256xbf16, #tpu.memory_space<vmem>>, vector<128x256xbf16>
    %cst_5 = arith.constant dense<0.000000e+00> : vector<256x256xf32>
    %5 = tpu.matmul %3, %4, %cst_5 {dimension_numbers = #tpu.dot_dimension_numbers<[1], [0], [0], [1], [0, 0, 1, 1], [], []>} : vector<256x128xbf16>, vector<128x256xbf16>, vector<256x256xf32> -> vector<256x256xf32>
    %6 = vector.shape_cast %5 : vector<256x256xf32> to vector<2x128x256xf32>
    %cst_6 = arith.constant dense<0.000000e+00> : vector<2x256xf32>
    %7 = vector.multi_reduction <add>, %6, %cst_6 [1] : vector<2x128x256xf32> to vector<2x256xf32>
    %8 = vector.shape_cast %7 : vector<2x256xf32> to vector<2x1x256xf32>
    %cst_7 = arith.constant 1.280000e+02 : f32
    %9 = vector.broadcast %cst_7 : f32 to vector<2x1x256xf32>
    %10 = arith.divf %8, %9 : vector<2x1x256xf32>
    %11 = arith.mulf %6, %6 : vector<2x128x256xf32>
    %cst_8 = arith.constant dense<0.000000e+00> : vector<2x256xf32>
    %12 = vector.multi_reduction <add>, %11, %cst_8 [1] : vector<2x128x256xf32> to vector<2x256xf32>
    %13 = vector.shape_cast %12 : vector<2x256xf32> to vector<2x1x256xf32>
    %cst_9 = arith.constant 1.280000e+02 : f32
    %14 = vector.broadcast %cst_9 : f32 to vector<2x1x256xf32>
    %15 = arith.divf %13, %14 : vector<2x1x256xf32>
    %16 = arith.mulf %10, %10 : vector<2x1x256xf32>
    %17 = arith.subf %15, %16 : vector<2x1x256xf32>
    %cst_10 = arith.constant 0.000000e+00 : f32
    %18 = vector.broadcast %cst_10 : f32 to vector<2x1x256xf32>
    %19 = arith.maximumf %17, %18 : vector<2x1x256xf32>
    %20 = vector.broadcast %10 : vector<2x1x256xf32> to vector<2x128x256xf32>
    %21 = arith.subf %6, %20 : vector<2x128x256xf32>
    %cst_11 = arith.constant 9.99999974E-6 : f32
    %22 = vector.broadcast %cst_11 : f32 to vector<2x1x256xf32>
    %23 = arith.addf %19, %22 : vector<2x1x256xf32>
    %24 = math.rsqrt %23 : vector<2x1x256xf32>
    %25 = vector.broadcast %24 : vector<2x1x256xf32> to vector<2x128x256xf32>
    %26 = arith.mulf %21, %25 : vector<2x128x256xf32>
    %cst_12 = arith.constant 0.000000e+00 : f32
    %27 = vector.broadcast %cst_12 : f32 to vector<2x128x256xf32>
    %28 = arith.maximumf %26, %27 : vector<2x128x256xf32>
    %29 = vector.shape_cast %28 : vector<2x128x256xf32> to vector<256x256xf32>
    %30 = arith.truncf %29 : vector<256x256xf32> to vector<256x256xbf16>
    %c0_13 = arith.constant 0 : index
    %c0_14 = arith.constant 0 : index
    %31 = vector.load %arg3[%c0_13, %c0_14] : memref<256x256xbf16, #tpu.memory_space<vmem>>, vector<256x256xbf16>
    %cst_15 = arith.constant dense<0.000000e+00> : vector<256x256xf32>
    %32 = tpu.matmul %30, %31, %cst_15 {dimension_numbers = #tpu.dot_dimension_numbers<[1], [0], [0], [1], [0, 0, 1, 1], [], []>} : vector<256x256xbf16>, vector<256x256xbf16>, vector<256x256xf32> -> vector<256x256xf32>
    %33 = vector.shape_cast %32 : vector<256x256xf32> to vector<2x128x256xf32>
    %cst_16 = arith.constant dense<0.000000e+00> : vector<2x256xf32>
    %34 = vector.multi_reduction <add>, %33, %cst_16 [1] : vector<2x128x256xf32> to vector<2x256xf32>
    %35 = vector.shape_cast %34 : vector<2x256xf32> to vector<2x1x256xf32>
    %cst_17 = arith.constant 1.280000e+02 : f32
    %36 = vector.broadcast %cst_17 : f32 to vector<2x1x256xf32>
    %37 = arith.divf %35, %36 : vector<2x1x256xf32>
    %38 = arith.mulf %33, %33 : vector<2x128x256xf32>
    %cst_18 = arith.constant dense<0.000000e+00> : vector<2x256xf32>
    %39 = vector.multi_reduction <add>, %38, %cst_18 [1] : vector<2x128x256xf32> to vector<2x256xf32>
    %40 = vector.shape_cast %39 : vector<2x256xf32> to vector<2x1x256xf32>
    %cst_19 = arith.constant 1.280000e+02 : f32
    %41 = vector.broadcast %cst_19 : f32 to vector<2x1x256xf32>
    %42 = arith.divf %40, %41 : vector<2x1x256xf32>
    %43 = arith.mulf %37, %37 : vector<2x1x256xf32>
    %44 = arith.subf %42, %43 : vector<2x1x256xf32>
    %cst_20 = arith.constant 0.000000e+00 : f32
    %45 = vector.broadcast %cst_20 : f32 to vector<2x1x256xf32>
    %46 = arith.maximumf %44, %45 : vector<2x1x256xf32>
    %47 = vector.broadcast %37 : vector<2x1x256xf32> to vector<2x128x256xf32>
    %48 = arith.subf %33, %47 : vector<2x128x256xf32>
    %cst_21 = arith.constant 9.99999974E-6 : f32
    %49 = vector.broadcast %cst_21 : f32 to vector<2x1x256xf32>
    %50 = arith.addf %46, %49 : vector<2x1x256xf32>
    %51 = math.rsqrt %50 : vector<2x1x256xf32>
    %52 = vector.broadcast %51 : vector<2x1x256xf32> to vector<2x128x256xf32>
    %53 = arith.mulf %48, %52 : vector<2x128x256xf32>
    %cst_22 = arith.constant 0.000000e+00 : f32
    %54 = vector.broadcast %cst_22 : f32 to vector<2x128x256xf32>
    %55 = arith.maximumf %53, %54 : vector<2x128x256xf32>
    %56 = vector.shape_cast %55 : vector<2x128x256xf32> to vector<256x256xf32>
    %57 = arith.truncf %56 : vector<256x256xf32> to vector<256x256xbf16>
    %c0_23 = arith.constant 0 : index
    %c0_24 = arith.constant 0 : index
    %58 = vector.load %arg4[%c0_23, %c0_24] : memref<256x256xbf16, #tpu.memory_space<vmem>>, vector<256x256xbf16>
    %cst_25 = arith.constant dense<0.000000e+00> : vector<256x256xf32>
    %59 = tpu.matmul %57, %58, %cst_25 {dimension_numbers = #tpu.dot_dimension_numbers<[1], [0], [0], [1], [0, 0, 1, 1], [], []>} : vector<256x256xbf16>, vector<256x256xbf16>, vector<256x256xf32> -> vector<256x256xf32>
    %60 = vector.shape_cast %59 : vector<256x256xf32> to vector<2x128x256xf32>
    %cst_26 = arith.constant dense<0.000000e+00> : vector<2x256xf32>
    %61 = vector.multi_reduction <add>, %60, %cst_26 [1] : vector<2x128x256xf32> to vector<2x256xf32>
    %62 = vector.shape_cast %61 : vector<2x256xf32> to vector<2x1x256xf32>
    %cst_27 = arith.constant 1.280000e+02 : f32
    %63 = vector.broadcast %cst_27 : f32 to vector<2x1x256xf32>
    %64 = arith.divf %62, %63 : vector<2x1x256xf32>
    %65 = arith.mulf %60, %60 : vector<2x128x256xf32>
    %cst_28 = arith.constant dense<0.000000e+00> : vector<2x256xf32>
    %66 = vector.multi_reduction <add>, %65, %cst_28 [1] : vector<2x128x256xf32> to vector<2x256xf32>
    %67 = vector.shape_cast %66 : vector<2x256xf32> to vector<2x1x256xf32>
    %cst_29 = arith.constant 1.280000e+02 : f32
    %68 = vector.broadcast %cst_29 : f32 to vector<2x1x256xf32>
    %69 = arith.divf %67, %68 : vector<2x1x256xf32>
    %70 = arith.mulf %64, %64 : vector<2x1x256xf32>
    %71 = arith.subf %69, %70 : vector<2x1x256xf32>
    %cst_30 = arith.constant 0.000000e+00 : f32
    %72 = vector.broadcast %cst_30 : f32 to vector<2x1x256xf32>
    %73 = arith.maximumf %71, %72 : vector<2x1x256xf32>
    %74 = vector.broadcast %64 : vector<2x1x256xf32> to vector<2x128x256xf32>
    %75 = arith.subf %60, %74 : vector<2x128x256xf32>
    %cst_31 = arith.constant 9.99999974E-6 : f32
    %76 = vector.broadcast %cst_31 : f32 to vector<2x1x256xf32>
    %77 = arith.addf %73, %76 : vector<2x1x256xf32>
    %78 = math.rsqrt %77 : vector<2x1x256xf32>
    %79 = vector.broadcast %78 : vector<2x1x256xf32> to vector<2x128x256xf32>
    %80 = arith.mulf %75, %79 : vector<2x128x256xf32>
    %81 = vector.extract_strided_slice %80 {offsets = [0, 0, 0], sizes = [1, 128, 256], strides = [1, 1, 1]} : vector<2x128x256xf32> to vector<1x128x256xf32>
    %82 = vector.shape_cast %81 : vector<1x128x256xf32> to vector<128x256xf32>
    %83 = arith.truncf %82 : vector<128x256xf32> to vector<128x256xbf16>
    %84 = vector.extract_strided_slice %80 {offsets = [1, 0, 0], sizes = [1, 128, 256], strides = [1, 1, 1]} : vector<2x128x256xf32> to vector<1x128x256xf32>
    %85 = vector.shape_cast %84 : vector<1x128x256xf32> to vector<128x256xf32>
    %86 = arith.truncf %85 : vector<128x256xf32> to vector<128x256xbf16>
    %cst_32 = arith.constant dense<0.000000e+00> : vector<256x256xf32>
    %87 = tpu.matmul %83, %86, %cst_32 {dimension_numbers = #tpu.dot_dimension_numbers<[0], [0], [1], [1], [0, 1, 1, 1], [], []>} : vector<128x256xbf16>, vector<128x256xbf16>, vector<256x256xf32> -> vector<256x256xf32>
    %cst_33 = arith.constant 7.812500e-03 : f32
    %88 = vector.broadcast %cst_33 : f32 to vector<256x256xf32>
    %89 = arith.mulf %87, %88 : vector<256x256xf32>
    %90 = tpu.iota {dimensions = array<i32: 0>} : vector<256x256xi32>
    %91 = tpu.iota {dimensions = array<i32: 1>} : vector<256x256xi32>
    %92 = arith.cmpi eq, %90, %91 : vector<256x256xi32>
    %93 = arith.mulf %89, %89 : vector<256x256xf32>
    %94 = vector.shape_cast %93 : vector<256x256xf32> to vector<1x256x256xf32>
    %cst_34 = arith.constant dense<0.000000e+00> : vector<1xf32>
    %95 = vector.multi_reduction <add>, %94, %cst_34 [1, 2] : vector<1x256x256xf32> to vector<1xf32>
    %96 = vector.shape_cast %95 : vector<1xf32> to vector<1x1x1xf32>
    %97 = vector.extract %96[0, 0, 0] : f32 from vector<1x1x1xf32>
    %cst_35 = arith.constant 5.100000e-03 : f32
    %98 = arith.mulf %cst_35, %97 : f32
    %cst_36 = arith.constant 1.000000e+00 : f32
    %99 = vector.broadcast %cst_36 : f32 to vector<256x256xf32>
    %100 = arith.subf %89, %99 : vector<256x256xf32>
    %101 = arith.mulf %100, %100 : vector<256x256xf32>
    %cst_37 = arith.constant 5.100000e-03 : f32
    %102 = vector.broadcast %cst_37 : f32 to vector<256x256xf32>
    %103 = arith.mulf %102, %93 : vector<256x256xf32>
    %104 = arith.subf %101, %103 : vector<256x256xf32>
    %cst_38 = arith.constant 0.000000e+00 : f32
    %105 = vector.broadcast %cst_38 : f32 to vector<256x256xf32>
    %106 = arith.select %92, %104, %105 : vector<256x256xi1>, vector<256x256xf32>
    %107 = vector.shape_cast %106 : vector<256x256xf32> to vector<1x256x256xf32>
    %cst_39 = arith.constant dense<0.000000e+00> : vector<1xf32>
    %108 = vector.multi_reduction <add>, %107, %cst_39 [1, 2] : vector<1x256x256xf32> to vector<1xf32>
    %109 = vector.shape_cast %108 : vector<1xf32> to vector<1x1x1xf32>
    %110 = vector.extract %109[0, 0, 0] : f32 from vector<1x1x1xf32>
    %111 = arith.addf %98, %110 : f32
    %c0_40 = arith.constant 0 : index
    %c0_41 = arith.constant 0 : index
    %112 = memref.load %arg5[%c0_40, %c0_41] : memref<1x1xf32, #tpu.memory_space<smem>>
    memref.store %111, %arg5[%c0_40, %c0_41] : memref<1x1xf32, #tpu.memory_space<smem>>
    return
  }
}

</mosaic_0001>

<bundles_post_ra>
// kernel: barlow_twins_forward.1
= control target key start
LH: loop header
LB: loop body
LE: loop exit
PB: predicated region body
PF: predicated region fallthrough
CT: control target
= control target key end

     0   :  { %s7267_s0 = inlined_call_operand.vmem [shape: bf16[256,256], index: 0, kind: input, shape index: {}]   ;;  %s7268_s1 = inlined_call_operand.vmem [shape: bf16[256,128], index: 1, kind: input, shape index: {}]   ;;  %s7269_s2 = inlined_call_operand.vmem [shape: bf16[128,256], index: 2, kind: input, shape index: {}]   ;;  %s7270_s3 = inlined_call_operand.vmem [shape: bf16[256,256], index: 3, kind: input, shape index: {}]   ;;  %s7271_s4 = inlined_call_operand.vmem [shape: bf16[256,256], index: 4, kind: input, shape index: {}]   ;;  %s7272_s5 = inlined_call_operand.hbm [shape: f32[1,1], index: 5, kind: output, shape index: {}]  }
   0x1   :  { %v4227_v0 = vld [vmem:[%s7268_s1 + $0x78] sm:$0xff]   ;;  %v4229_v2 = vld [vmem:[%s7268_s1 + $0x70] sm:$0xff]   ;;  %v4231_v4 = vld [vmem:[%s7268_s1 + $0x68] sm:$0xff]  }
   0x2   :  { %v4228_v1 = vld [vmem:[%s7268_s1 + $0x38] sm:$0xff]   ;;  %4093 = vmatprep.subr.bf16.mxu0 %v4227_v0  ;;  %4205 = vmatprep.subr.bf16.mxu1 %v4227_v0  ;;  %v4230_v3 = vld [vmem:[%s7268_s1 + $0x30] sm:$0xff]   ;;  %v4232_v5 = vld [vmem:[%s7268_s1 + $0x28] sm:$0xff]  }
   0x3   :  { %4094 = vmatpush3.bf16.msra.mxu0 %v4228_v1  ;;  %4213 = vmatpush3.bf16.msra.mxu1 %v4228_v1  ;;  %v4233_v6 = vld [vmem:[%s7268_s1 + $0x60] sm:$0xff]   ;;  %v4235_v8 = vld [vmem:[%s7268_s1 + $0x58] sm:$0xff]   ;;  %v4237_v10 = vld [vmem:[%s7268_s1 + $0x50] sm:$0xff]  }
   0x4   :  { %4095 = vmatprep.subr.bf16.mxu0 %v4229_v2  ;;  %4206 = vmatprep.subr.bf16.mxu1 %v4229_v2  ;;  %v4234_v7 = vld [vmem:[%s7268_s1 + $0x20] sm:$0xff]   ;;  %v4236_v9 = vld [vmem:[%s7268_s1 + $0x18] sm:$0xff]   ;;  %v4238_v12 = vld [vmem:[%s7268_s1 + $0x10] sm:$0xff]  }
   0x5   :  { %v4245_v11 = vld [vmem:[%s7267_s0 + $0x4] ss:$8 sps:$4 sm:$0xff]   ;;  %v4243_v18 = vld [vmem:[%s7267_s0] ss:$8 sps:$4 sm:$0xff]   ;;  %v4246_v19 = vld [vmem:[%s7267_s0 + $0x14] ss:$8 sps:$4 sm:$0xff]  }
   0x6   :  { %374 = vmatprep.mubr.bf16.mxu0 %v4245_v11  ;;  %v4239_v13 = vld [vmem:[%s7268_s1 + $0x48] sm:$0xff]   ;;  %v4241_v15 = vld [vmem:[%s7268_s1 + $0x40] sm:$0xff]   ;;  %v4270_v21 = vld [vmem:[%s7267_s0 + $0x94] ss:$8 sps:$4 sm:$0xff]  }
   0x7   :  { %4096 = vmatpush3.bf16.msra.mxu0 %v4230_v3  ;;  %4214 = vmatpush3.bf16.msra.mxu1 %v4230_v3  ;;  %v4240_v14 = vld [vmem:[%s7268_s1 + $0x8] sm:$0xff]   ;;  %v4242_v16 = vld [vmem:[%s7268_s1] sm:$0xff]   ;;  %v4248_v22 = vld [vmem:[%s7267_s0 + $0x10] ss:$8 sps:$4 sm:$0xff]  }
   0x8   :  { %4097 = vmatprep.subr.bf16.mxu0 %v4231_v4  ;;  %4207 = vmatprep.subr.bf16.mxu1 %v4231_v4  ;;  %v4269_v17 = vld [vmem:[%s7267_s0 + $0x84] ss:$8 sps:$4 sm:$0xff]   ;;  %v4267_v20 = vld [vmem:[%s7267_s0 + $0x80] ss:$8 sps:$4 sm:$0xff]   ;;  %v4291_v24 = vld [vmem:[%s7269_s2 + $0x70] ss:$8 sps:$4 sm:$0xff]  }
   0x9   :  { %438 = vmatprep.mubr.bf16.mxu1 %v4269_v17  ;;  %v4249_v23 = vld [vmem:[%s7267_s0 + $0x24] ss:$8 sps:$4 sm:$0xff]   ;;  %v4293_v25 = vld [vmem:[%s7269_s2 + $0x74] ss:$8 sps:$4 sm:$0xff]   ;;  %v4272_v26 = vld [vmem:[%s7267_s0 + $0x90] ss:$8 sps:$4 sm:$0xff]  }
   0xa   :  { %v4296_v27 = vld [vmem:[%s7269_s2 + $0x64] ss:$8 sps:$4 sm:$0xff]   ;;  %v4294_v29 = vld [vmem:[%s7269_s2 + $0x60] ss:$8 sps:$4 sm:$0xff]   ;;  %v4299_v30 = vld [vmem:[%s7269_s2 + $0x54] ss:$8 sps:$4 sm:$0xff]  }
   0xb   :  { %4098 = vmatpush3.bf16.msra.mxu0 %v4232_v5  ;;  %4215 = vmatpush3.bf16.msra.mxu1 %v4232_v5  ;;  %v4273_v28 = vld [vmem:[%s7267_s0 + $0xa4] ss:$8 sps:$4 sm:$0xff]   ;;  %v4251_v31 = vld [vmem:[%s7267_s0 + $0x20] ss:$8 sps:$4 sm:$0xff]   ;;  %v4297_v32 = vld [vmem:[%s7269_s2 + $0x50] ss:$8 sps:$4 sm:$0xff]  }
   0xc   :  { %4099 = vmatprep.subr.bf16.mxu0 %v4233_v6  ;;  %4208 = vmatprep.subr.bf16.mxu1 %v4233_v6  ;;  %v4252_v33 = vld [vmem:[%s7267_s0 + $0x34] ss:$8 sps:$4 sm:$0xff]   ;;  %v4275_v34 = vld [vmem:[%s7267_s0 + $0xa0] ss:$8 sps:$4 sm:$0xff]   ;;  %v4302_v35 = vld [vmem:[%s7269_s2 + $0x44] ss:$8 sps:$4 sm:$0xff]  }
   0xd   :  { %v4276_v36 = vld [vmem:[%s7267_s0 + $0xb4] ss:$8 sps:$4 sm:$0xff]   ;;  %v4300_v37 = vld [vmem:[%s7269_s2 + $0x40] ss:$8 sps:$4 sm:$0xff]   ;;  %v4303_v39 = vld [vmem:[%s7269_s2 + $0x30] ss:$8 sps:$4 sm:$0xff]  }
   0xe   :  { %v4305_v38 = vld [vmem:[%s7269_s2 + $0x34] ss:$8 sps:$4 sm:$0xff]   ;;  %v4254_v40 = vld [vmem:[%s7267_s0 + $0x30] ss:$8 sps:$4 sm:$0xff]   ;;  %v4308_v41 = vld [vmem:[%s7269_s2 + $0x24] ss:$8 sps:$4 sm:$0xff]  }
   0xf   :  { %4100 = vmatpush3.bf16.msra.mxu0 %v4234_v7  ;;  %4216 = vmatpush3.bf16.msra.mxu1 %v4234_v7  ;;  %v4255_v42 = vld [vmem:[%s7267_s0 + $0x44] ss:$8 sps:$4 sm:$0xff]   ;;  %v4278_v43 = vld [vmem:[%s7267_s0 + $0xb0] ss:$8 sps:$4 sm:$0xff]   ;;  %v4306_v45 = vld [vmem:[%s7269_s2 + $0x20] ss:$8 sps:$4 sm:$0xff]  }
  0x10   :  { %4101 = vmatprep.subr.bf16.mxu0 %v4235_v8  ;;  %4209 = vmatprep.subr.bf16.mxu1 %v4235_v8  ;;  %v4279_v44 = vld [vmem:[%s7267_s0 + $0xc4] ss:$8 sps:$4 sm:$0xff]   ;;  %v4257_v46 = vld [vmem:[%s7267_s0 + $0x40] ss:$8 sps:$4 sm:$0xff]   ;;  %v4258_v47 = vld [vmem:[%s7267_s0 + $0x54] ss:$8 sps:$4 sm:$0xff]  }
  0x11   :  { %v4281_v48 = vld [vmem:[%s7267_s0 + $0xc0] ss:$8 sps:$4 sm:$0xff]   ;;  %v4282_v49 = vld [vmem:[%s7267_s0 + $0xd4] ss:$8 sps:$4 sm:$0xff]  }
  0x13   :  { %4102 = vmatpush3.bf16.msra.mxu0 %v4236_v9  ;;  %4217 = vmatpush3.bf16.msra.mxu1 %v4236_v9 }
  0x14   :  { %4103 = vmatprep.subr.bf16.mxu0 %v4237_v10  ;;  %4210 = vmatprep.subr.bf16.mxu1 %v4237_v10 }
  0x17   :  { %4104 = vmatpush3.bf16.msra.mxu0 %v4238_v12  ;;  %4218 = vmatpush3.bf16.msra.mxu1 %v4238_v12 }
  0x18   :  { %4105 = vmatprep.subr.bf16.mxu0 %v4239_v13  ;;  %4211 = vmatprep.subr.bf16.mxu1 %v4239_v13 }
  0x1b   :  { %4106 = vmatpush3.bf16.msra.mxu0 %v4240_v14  ;;  %4219 = vmatpush3.bf16.msra.mxu1 %v4240_v14 }
  0x1c   :  { %4107 = vmatprep.subr.bf16.mxu0 %v4241_v15  ;;  %4212 = vmatprep.subr.bf16.mxu1 %v4241_v15 }
  0x1f   :  { %4108 = vmatpush3.bf16.msra.mxu0 %v4242_v16  ;;  %4220 = vmatpush3.bf16.msra.mxu1 %v4242_v16 }
  0x20   :  { %615 = vmatprep.subr.bf16.mxu1 %v4293_v25 }
  0x22   :  { %375 = vmatmul.mubr.bf16.vlgmr.msra.gmra.mxu0 %v4243_v18  ;;  %439 = vmatmul.mubr.bf16.vlgmr.msra.gmra.mxu1 %v4267_v20 }
  0x23   :  { %382 = vmatprep.mubr.bf16.mxu0 %v4246_v19  ;;  %446 = vmatprep.mubr.bf16.mxu1 %v4270_v21 }
  0x24   :  { %616 = vmatpush1.bf16.msra.mxu1 %v4291_v24 }
  0x25   :  { %617 = vmatprep.subr.bf16.mxu1 %v4296_v27 }
  0x28   :  { %618 = vmatpush1.bf16.msra.mxu1 %v4294_v29 }
  0x29   :  { %619 = vmatprep.subr.bf16.mxu1 %v4299_v30 }
  0x2a   :  { %383 = vmatmul.mubr.bf16.gmra.mxu0 %v4248_v22  ;;  %447 = vmatmul.mubr.bf16.gmra.mxu1 %v4272_v26 }
  0x2b   :  { %390 = vmatprep.mubr.bf16.mxu0 %v4249_v23  ;;  %454 = vmatprep.mubr.bf16.mxu1 %v4273_v28 }
  0x2c   :  { %620 = vmatpush1.bf16.msra.mxu1 %v4297_v32 }
  0x2d   :  { %621 = vmatprep.subr.bf16.mxu1 %v4302_v35 }
  0x30   :  { %622 = vmatpush1.bf16.msra.mxu1 %v4300_v37 }
  0x31   :  { %623 = vmatprep.subr.bf16.mxu1 %v4305_v38 }
  0x32   :  { %391 = vmatmul.mubr.bf16.gmra.mxu0 %v4251_v31  ;;  %455 = vmatmul.mubr.bf16.gmra.mxu1 %v4275_v34 }
  0x33   :  { %398 = vmatprep.mubr.bf16.mxu0 %v4252_v33  ;;  %462 = vmatprep.mubr.bf16.mxu1 %v4276_v36 }
  0x34   :  { %624 = vmatpush1.bf16.msra.mxu1 %v4303_v39 }
  0x35   :  { %625 = vmatprep.subr.bf16.mxu1 %v4308_v41 }
  0x38   :  { %626 = vmatpush1.bf16.msra.mxu1 %v4306_v45 }
  0x3a   :  { %399 = vmatmul.mubr.bf16.gmra.mxu0 %v4254_v40  ;;  %463 = vmatmul.mubr.bf16.gmra.mxu1 %v4278_v43 }
  0x3b   :  { %406 = vmatprep.mubr.bf16.mxu0 %v4255_v42  ;;  %470 = vmatprep.mubr.bf16.mxu1 %v4279_v44 }
  0x42   :  { %407 = vmatmul.mubr.bf16.gmra.mxu0 %v4257_v46  ;;  %471 = vmatmul.mubr.bf16.gmra.mxu1 %v4281_v48 }
  0x43   :  { %414 = vmatprep.mubr.bf16.mxu0 %v4258_v47  ;;  %478 = vmatprep.mubr.bf16.mxu1 %v4282_v49 }
  0x44   :  { %10 = vsyncpa [#allocation3], 0  ;;  %v4260_v50 = vld [vmem:[%s7267_s0 + $0x50] ss:$8 sps:$4 sm:$0xff]   ;;  %v4261_v51 = vld [vmem:[%s7267_s0 + $0x64] ss:$8 sps:$4 sm:$0xff]  }
  0x45   :  { %v4284_v52 = vld [vmem:[%s7267_s0 + $0xd0] ss:$8 sps:$4 sm:$0xff]   ;;  %v4285_v53 = vld [vmem:[%s7267_s0 + $0xe4] ss:$8 sps:$4 sm:$0xff]   ;;  %v4263_v54 = vld [vmem:[%s7267_s0 + $0x60] ss:$8 sps:$4 sm:$0xff]  }
  0x46   :  { %v4264_v55 = vld [vmem:[%s7267_s0 + $0x74] ss:$8 sps:$4 sm:$0xff]   ;;  %v4287_v56 = vld [vmem:[%s7267_s0 + $0xe0] ss:$8 sps:$4 sm:$0xff]   ;;  %v4266_v58 = vld [vmem:[%s7267_s0 + $0x70] ss:$8 sps:$4 sm:$0xff]  }
  0x47   :  { %v4288_v57 = vld [vmem:[%s7267_s0 + $0xf4] ss:$8 sps:$4 sm:$0xff]   ;;  %v4290_v59 = vld [vmem:[%s7267_s0 + $0xf0] ss:$8 sps:$4 sm:$0xff]   ;;  %v4314_v62 = vld [vmem:[%s7269_s2 + $0x4] ss:$8 sps:$4 sm:$0xff]  }
  0x48   :  { %v4311_v60 = vld [vmem:[%s7269_s2 + $0x14] ss:$8 sps:$4 sm:$0xff]   ;;  %v4309_v61 = vld [vmem:[%s7269_s2 + $0x10] ss:$8 sps:$4 sm:$0xff]   ;;  %v4312_v63 = vld [vmem:[%s7269_s2] ss:$8 sps:$4 sm:$0xff]  }
  0x49   :  { %627 = vmatprep.subr.bf16.mxu1 %v4311_v60  ;;  %v7273_v0 = vmov 0   ;;  %s4446_s6 = smov [#allocation2]  }
  0x4a   :  { %415 = vmatmul.mubr.bf16.gmra.mxu0 %v4260_v50  ;;  %479 = vmatmul.mubr.bf16.gmra.mxu1 %v4284_v52 }
  0x4b   :  { %422 = vmatprep.mubr.bf16.mxu0 %v4261_v51  ;;  %486 = vmatprep.mubr.bf16.mxu1 %v4285_v53 }
  0x4c   :  { %628 = vmatpush1.bf16.msra.mxu1 %v4309_v61 }
  0x4d   :  { %629 = vmatprep.subr.bf16.mxu1 %v4314_v62 }
  0x50   :  { %630 = vmatpush1.bf16.msra.mxu1 %v4312_v63 }
  0x52   :  { %423 = vmatmul.mubr.bf16.gmra.mxu0 %v4263_v54  ;;  %487 = vmatmul.mubr.bf16.gmra.mxu1 %v4287_v56 }
  0x53   :  { %430 = vmatprep.mubr.bf16.mxu0 %v4264_v55  ;;  %494 = vmatprep.mubr.bf16.mxu1 %v4288_v57 }
  0x5a   :  { %431 = vmatmul.mubr.bf16.gmra.mxu0 %v4266_v58  ;;  %495 = vmatmul.mubr.bf16.gmra.mxu1 %v4290_v59 }
  0x5b   :  { %647 = vmatprep.mubr.bf16.mxu1 %v7273_v0 }
  0xe2   :  { %v4109_v1 = vpop.f32.mrf.mxu0  ;;  %v4670_v2 = vpop.f32.mrf.mxu1 }
  0xe4   :  { %v4110_v3 = vpop.f32.mrf.mxu0  ;;  %v4672_v4 = vpop.f32.mrf.mxu1 }
  0xe5   :  { %v4111_v8 = vadd.f32 %v4110_v3, %v4109_v1 }
  0xe6   :  { %v4112_v5 = vpop.f32.mrf.mxu0  ;;  %v4674_v7 = vpop.f32.mrf.mxu1 }
  0xe8   :  { %v4113_v6 = vpop.f32.mrf.mxu0  ;;  %v4676_v13 = vpop.f32.mrf.mxu1 }
  0xe9   :  { %v4114_v9 = vadd.f32 %v4113_v6, %v4112_v5 }
  0xea   :  { %v4115_v10 = vpop.f32.mrf.mxu0  ;;  %v4679_v16 = vpop.f32.mrf.mxu1 }
  0xeb   :  { %v503_v11 = vpack.c.bf16 %v4114_v9, %v4111_v8 }
  0xec   :  { %v4116_v12 = vpop.f32.mrf.mxu0  ;;  %v4681_v22 = vpop.f32.mrf.mxu1 }
  0xed   :  { %648 = vmatmul.mubr.bf16.vlgmr.msra.gmra.mxu1 %v503_v11  ;;  %v4117_v17 = vadd.f32 %v4116_v12, %v4115_v10 }
  0xee   :  { %v4118_v14 = vpop.f32.mrf.mxu0  ;;  %657 = vmatprep.mubr.bf16.mxu1 %v7273_v0  ;;  %v4684_v25 = vpop.f32.mrf.mxu1 }
  0xf0   :  { %v4119_v15 = vpop.f32.mrf.mxu0  ;;  %v4686_v31 = vpop.f32.mrf.mxu1 }
  0xf1   :  { %v4120_v18 = vadd.f32 %v4119_v15, %v4118_v14 }
  0xf2   :  { %v4121_v19 = vpop.f32.mrf.mxu0  ;;  %v4689_v34 = vpop.f32.mrf.mxu1 }
  0xf3   :  { %v504_v20 = vpack.c.bf16 %v4120_v18, %v4117_v17  ;;  %v4159_v17 = vadd.f32 %v4672_v4, %v4670_v2  ;;  %v4162_v18 = vadd.f32 %v4676_v13, %v4674_v7 }
  0xf4   :  { %v4122_v21 = vpop.f32.mrf.mxu0  ;;  %v4170_v40 = vpop.f32.mrf.mxu1 }
  0xf5   :  { %658 = vmatmul.mubr.bf16.gmra.mxu1 %v504_v20  ;;  %v4123_v26 = vadd.f32 %v4122_v21, %v4121_v19  ;;  %v511_v20 = vpack.c.bf16 %v4162_v18, %v4159_v17  ;;  %v4171_v2 = vadd.f32 %v4170_v40, %v4689_v34  ;;  %v4351_v17 = vld [vmem:[%s7270_s3 + $0xb0] ss:$8 sps:$4 sm:$0xff]   ;;  %v4356_v18 = vld [vmem:[%s7270_s3 + $0xa4] ss:$8 sps:$4 sm:$0xff]  }
  0xf6   :  { %v4124_v23 = vpop.f32.mrf.mxu0  ;;  %667 = vmatprep.mubr.bf16.mxu1 %v7273_v0  ;;  %v4172_v43 = vpop.f32.mrf.mxu1 }
  0xf8   :  { %v4125_v24 = vpop.f32.mrf.mxu0  ;;  %v4173_v49 = vpop.f32.mrf.mxu1 }
  0xf9   :  { %v4126_v27 = vadd.f32 %v4125_v24, %v4124_v23  ;;  %v4165_v23 = vadd.f32 %v4681_v22, %v4679_v16  ;;  %v4168_v24 = vadd.f32 %v4686_v31, %v4684_v25  ;;  %v4174_v4 = vadd.f32 %v4173_v49, %v4172_v43 }
  0xfa   :  { %v4127_v28 = vpop.f32.mrf.mxu0  ;;  %v4175_v52 = vpop.f32.mrf.mxu1 }
  0xfb   :  { %v505_v29 = vpack.c.bf16 %v4126_v27, %v4123_v26  ;;  %v512_v27 = vpack.c.bf16 %v4168_v24, %v4165_v23  ;;  %v513_v13 = vpack.c.bf16 %v4174_v4, %v4171_v2  ;;  %v4362_v23 = vld [vmem:[%s7270_s3 + $0x84] ss:$8 sps:$4 sm:$0xff]   ;;  %v4360_v24 = vld [vmem:[%s7270_s3 + $0x80] ss:$8 sps:$4 sm:$0xff]  }
  0xfc   :  { %v4128_v30 = vpop.f32.mrf.mxu0  ;;  %v4176_v58 = vpop.f32.mrf.mxu1 }
  0xfd   :  { %668 = vmatmul.mubr.bf16.gmra.mxu1 %v505_v29  ;;  %v4129_v35 = vadd.f32 %v4128_v30, %v4127_v28  ;;  %v4177_v30 = vadd.f32 %v4176_v58, %v4175_v52  ;;  %v4329_v58 = vld [vmem:[%s7270_s3 + $0x34] ss:$8 sps:$4 sm:$0xff]  }
  0xfe   :  { %v4130_v32 = vpop.f32.mrf.mxu0  ;;  %677 = vmatprep.mubr.bf16.mxu1 %v7273_v0  ;;  %v4178_v61 = vpop.f32.mrf.mxu1 }
 0x100   :  { %v4131_v33 = vpop.f32.mrf.mxu0  ;;  %v4179_v6 = vpop.f32.mrf.mxu1 }
 0x101   :  { %v4132_v36 = vadd.f32 %v4131_v33, %v4130_v32  ;;  %v4180_v16 = vadd.f32 %v4179_v6, %v4178_v61  ;;  %v4330_v61 = vld [vmem:[%s7270_s3 + $0x20] ss:$8 sps:$4 sm:$0xff]   ;;  %v4339_v6 = vld [vmem:[%s7270_s3 + $0xf0] ss:$8 sps:$4 sm:$0xff]  }
 0x102   :  { %v4133_v37 = vpop.f32.mrf.mxu0  ;;  %v4181_v10 = vpop.f32.mrf.mxu1 }
 0x103   :  { %v506_v38 = vpack.c.bf16 %v4132_v36, %v4129_v35  ;;  %v514_v32 = vpack.c.bf16 %v4180_v16, %v4177_v30 }
 0x104   :  { %v4134_v39 = vpop.f32.mrf.mxu0  ;;  %v4182_v15 = vpop.f32.mrf.mxu1 }
 0x105   :  { %678 = vmatmul.mubr.bf16.gmra.mxu1 %v506_v38  ;;  %v4135_v44 = vadd.f32 %v4134_v39, %v4133_v37  ;;  %v4183_v31 = vadd.f32 %v4182_v15, %v4181_v10  ;;  %v4347_v10 = vld [vmem:[%s7270_s3 + $0xd4] ss:$8 sps:$4 sm:$0xff]  }
 0x106   :  { %v4136_v41 = vpop.f32.mrf.mxu0  ;;  %687 = vmatprep.mubr.bf16.mxu1 %v7273_v0  ;;  %v4184_v19 = vpop.f32.mrf.mxu1  ;;  %v4353_v15 = vld [vmem:[%s7270_s3 + $0xb4] ss:$8 sps:$4 sm:$0xff]  }
 0x108   :  { %v4137_v42 = vpop.f32.mrf.mxu0  ;;  %v4185_v21 = vpop.f32.mrf.mxu1 }
 0x109   :  { %v4138_v45 = vadd.f32 %v4137_v42, %v4136_v41  ;;  %v4186_v33 = vadd.f32 %v4185_v21, %v4184_v19  ;;  %v4354_v19 = vld [vmem:[%s7270_s3 + $0xa0] ss:$8 sps:$4 sm:$0xff]   ;;  %v4357_v21 = vld [vmem:[%s7270_s3 + $0x90] ss:$8 sps:$4 sm:$0xff]  }
 0x10a   :  { %v4139_v46 = vpop.f32.mrf.mxu0  ;;  %v4187_v26 = vpop.f32.mrf.mxu1 }
 0x10b   :  { %v507_v47 = vpack.c.bf16 %v4138_v45, %v4135_v44  ;;  %v515_v36 = vpack.c.bf16 %v4186_v33, %v4183_v31  ;;  %v4317_v44 = vld [vmem:[%s7270_s3 + $0x74] ss:$8 sps:$4 sm:$0xff]  }
 0x10c   :  { %v4140_v48 = vpop.f32.mrf.mxu0  ;;  %v4188_v28 = vpop.f32.mrf.mxu1  ;;  %1485 = vmatprep.subr.bf16.mxu0 %v4317_v44 }
 0x10d   :  { %688 = vmatmul.mubr.bf16.gmra.mxu1 %v507_v47  ;;  %v4141_v53 = vadd.f32 %v4140_v48, %v4139_v46  ;;  %v4189_v37 = vadd.f32 %v4188_v28, %v4187_v26  ;;  %v4315_v46 = vld [vmem:[%s7270_s3 + $0x70] ss:$8 sps:$4 sm:$0xff]   ;;  %v4320_v48 = vld [vmem:[%s7270_s3 + $0x64] ss:$8 sps:$4 sm:$0xff]  }
 0x10e   :  { %v4142_v50 = vpop.f32.mrf.mxu0  ;;  %697 = vmatprep.mubr.bf16.mxu1 %v7273_v0  ;;  %v4190_v7 = vpop.f32.mrf.mxu1  ;;  %1486 = vmatpush1.bf16.msra.mxu0 %v4315_v46 }
 0x10f   :  { %1487 = vmatprep.subr.bf16.mxu0 %v4320_v48 }
 0x110   :  { %v4143_v51 = vpop.f32.mrf.mxu0  ;;  %v4191_v29 = vpop.f32.mrf.mxu1 }
 0x111   :  { %v4144_v54 = vadd.f32 %v4143_v51, %v4142_v50  ;;  %v4192_v38 = vadd.f32 %v4191_v29, %v4190_v7  ;;  %v4318_v50 = vld [vmem:[%s7270_s3 + $0x60] ss:$8 sps:$4 sm:$0xff]  }
 0x112   :  { %v4145_v55 = vpop.f32.mrf.mxu0  ;;  %v4193_v22 = vpop.f32.mrf.mxu1  ;;  %1488 = vmatpush1.bf16.msra.mxu0 %v4318_v50 }
 0x113   :  { %v508_v56 = vpack.c.bf16 %v4144_v54, %v4141_v53  ;;  %v516_v40 = vpack.c.bf16 %v4192_v38, %v4189_v37  ;;  %v4323_v53 = vld [vmem:[%s7270_s3 + $0x54] ss:$8 sps:$4 sm:$0xff]   ;;  %v4321_v54 = vld [vmem:[%s7270_s3 + $0x50] ss:$8 sps:$4 sm:$0xff]  }
 0x114   :  { %v4146_v57 = vpop.f32.mrf.mxu0  ;;  %v4194_v25 = vpop.f32.mrf.mxu1  ;;  %1489 = vmatprep.subr.bf16.mxu0 %v4323_v53 }
 0x115   :  { %698 = vmatmul.mubr.bf16.gmra.mxu1 %v508_v56  ;;  %v4147_v62 = vadd.f32 %v4146_v57, %v4145_v55  ;;  %v4195_v42 = vadd.f32 %v4194_v25, %v4193_v22  ;;  %v4326_v56 = vld [vmem:[%s7270_s3 + $0x44] ss:$8 sps:$4 sm:$0xff]   ;;  %v4324_v57 = vld [vmem:[%s7270_s3 + $0x40] ss:$8 sps:$4 sm:$0xff]  }
 0x116   :  { %v4148_v59 = vpop.f32.mrf.mxu0  ;;  %707 = vmatprep.mubr.bf16.mxu1 %v7273_v0  ;;  %v4196_v35 = vpop.f32.mrf.mxu1  ;;  %1490 = vmatpush1.bf16.msra.mxu0 %v4321_v54 }
 0x117   :  { %1491 = vmatprep.subr.bf16.mxu0 %v4326_v56 }
 0x118   :  { %v4149_v60 = vpop.f32.mrf.mxu0  ;;  %v4197_v34 = vpop.f32.mrf.mxu1 }
 0x119   :  { %v4150_v63 = vadd.f32 %v4149_v60, %v4148_v59  ;;  %v4198_v43 = vadd.f32 %v4197_v34, %v4196_v35  ;;  %v4327_v59 = vld [vmem:[%s7270_s3 + $0x30] ss:$8 sps:$4 sm:$0xff]   ;;  %v4332_v60 = vld [vmem:[%s7270_s3 + $0x24] ss:$8 sps:$4 sm:$0xff]  }
 0x11a   :  { %v4151_v1 = vpop.f32.mrf.mxu0  ;;  %v4199_v39 = vpop.f32.mrf.mxu1  ;;  %1492 = vmatpush1.bf16.msra.mxu0 %v4324_v57 }
 0x11b   :  { %v509_v3 = vpack.c.bf16 %v4150_v63, %v4147_v62  ;;  %v517_v47 = vpack.c.bf16 %v4198_v43, %v4195_v42  ;;  %1493 = vmatprep.subr.bf16.mxu0 %v4329_v58  ;;  %v4335_v62 = vld [vmem:[%s7270_s3 + $0x14] ss:$8 sps:$4 sm:$0xff]   ;;  %v4333_v63 = vld [vmem:[%s7270_s3 + $0x10] ss:$8 sps:$4 sm:$0xff]  }
 0x11c   :  { %v4152_v5 = vpop.f32.mrf.mxu0  ;;  %v4200_v41 = vpop.f32.mrf.mxu1 }
 0x11d   :  { %708 = vmatmul.mubr.bf16.gmra.mxu1 %v509_v3  ;;  %v4153_v11 = vadd.f32 %v4152_v5, %v4151_v1  ;;  %v4201_v51 = vadd.f32 %v4200_v41, %v4199_v39  ;;  %v4338_v1 = vld [vmem:[%s7270_s3 + $0x4] ss:$8 sps:$4 sm:$0xff]   ;;  %v4336_v3 = vld [vmem:[%s7270_s3] ss:$8 sps:$4 sm:$0xff]   ;;  %v4341_v5 = vld [vmem:[%s7270_s3 + $0xf4] ss:$8 sps:$4 sm:$0xff]  }
 0x11e   :  { %v4154_v8 = vpop.f32.mrf.mxu0  ;;  %717 = vmatprep.mubr.bf16.mxu1 %v7273_v0  ;;  %v4202_v45 = vpop.f32.mrf.mxu1  ;;  %1494 = vmatpush1.bf16.msra.mxu0 %v4327_v59 }
 0x11f   :  { %1495 = vmatprep.subr.bf16.mxu0 %v4332_v60 }
 0x120   :  { %v4155_v9 = vpop.f32.mrf.mxu0  ;;  %v4203_v49 = vpop.f32.mrf.mxu1 }
 0x121   :  { %v4156_v12 = vadd.f32 %v4155_v9, %v4154_v8  ;;  %v4204_v52 = vadd.f32 %v4203_v49, %v4202_v45  ;;  %v4344_v8 = vld [vmem:[%s7270_s3 + $0xe4] ss:$8 sps:$4 sm:$0xff]   ;;  %v4342_v9 = vld [vmem:[%s7270_s3 + $0xe0] ss:$8 sps:$4 sm:$0xff]  }
 0x122   :  { %1496 = vmatpush1.bf16.msra.mxu0 %v4330_v61 }
 0x123   :  { %v510_v14 = vpack.c.bf16 %v4156_v12, %v4153_v11  ;;  %v518_v55 = vpack.c.bf16 %v4204_v52, %v4201_v51  ;;  %1497 = vmatprep.subr.bf16.mxu0 %v4335_v62  ;;  %v4345_v11 = vld [vmem:[%s7270_s3 + $0xd0] ss:$8 sps:$4 sm:$0xff]   ;;  %v4350_v12 = vld [vmem:[%s7270_s3 + $0xc4] ss:$8 sps:$4 sm:$0xff]  }
 0x125   :  { %718 = vmatmul.mubr.bf16.gmra.mxu1 %v510_v14  ;;  %v4348_v14 = vld [vmem:[%s7270_s3 + $0xc0] ss:$8 sps:$4 sm:$0xff]  }
 0x126   :  { %727 = vmatprep.mubr.bf16.mxu1 %v7273_v0  ;;  %1498 = vmatpush1.bf16.msra.mxu0 %v4333_v63 }
 0x127   :  { %1499 = vmatprep.subr.bf16.mxu0 %v4338_v1 }
 0x12a   :  { %1500 = vmatpush1.bf16.msra.mxu0 %v4336_v3 }
 0x12b   :  { %1501 = vmatprep.subr.bf16.mxu0 %v4341_v5 }
 0x12d   :  { %728 = vmatmul.mubr.bf16.gmra.mxu1 %v511_v20  ;;  %v4359_v20 = vld [vmem:[%s7270_s3 + $0x94] ss:$8 sps:$4 sm:$0xff]  }
 0x12e   :  { %737 = vmatprep.mubr.bf16.mxu1 %v7273_v0  ;;  %1502 = vmatpush2.bf16.msra.mxu0 %v4339_v6 }
 0x12f   :  { %1503 = vmatprep.subr.bf16.mxu0 %v4344_v8 }
 0x132   :  { %1504 = vmatpush2.bf16.msra.mxu0 %v4342_v9 }
 0x133   :  { %1505 = vmatprep.subr.bf16.mxu0 %v4347_v10 }
 0x135   :  { %738 = vmatmul.mubr.bf16.gmra.mxu1 %v512_v27 }
 0x136   :  { %747 = vmatprep.mubr.bf16.mxu1 %v7273_v0  ;;  %1506 = vmatpush2.bf16.msra.mxu0 %v4345_v11 }
 0x137   :  { %1507 = vmatprep.subr.bf16.mxu0 %v4350_v12 }
 0x13a   :  { %1508 = vmatpush2.bf16.msra.mxu0 %v4348_v14 }
 0x13b   :  { %1509 = vmatprep.subr.bf16.mxu0 %v4353_v15 }
 0x13d   :  { %748 = vmatmul.mubr.bf16.gmra.mxu1 %v513_v13 }
 0x13e   :  { %757 = vmatprep.mubr.bf16.mxu1 %v7273_v0  ;;  %1510 = vmatpush2.bf16.msra.mxu0 %v4351_v17 }
 0x13f   :  { %1511 = vmatprep.subr.bf16.mxu0 %v4356_v18 }
 0x142   :  { %1512 = vmatpush2.bf16.msra.mxu0 %v4354_v19 }
 0x143   :  { %1513 = vmatprep.subr.bf16.mxu0 %v4359_v20 }
 0x145   :  { %758 = vmatmul.mubr.bf16.gmra.mxu1 %v514_v32 }
 0x146   :  { %767 = vmatprep.mubr.bf16.mxu1 %v7273_v0  ;;  %1514 = vmatpush2.bf16.msra.mxu0 %v4357_v21 }
 0x147   :  { %1515 = vmatprep.subr.bf16.mxu0 %v4362_v23 }
 0x14a   :  { %1516 = vmatpush2.bf16.msra.mxu0 %v4360_v24 }
 0x14d   :  { %768 = vmatmul.mubr.bf16.gmra.mxu1 %v515_v36 }
 0x14e   :  { %777 = vmatprep.mubr.bf16.mxu1 %v7273_v0 }
 0x155   :  { %778 = vmatmul.mubr.bf16.gmra.mxu1 %v516_v40 }
 0x156   :  { %787 = vmatprep.mubr.bf16.mxu1 %v7273_v0 }
 0x15d   :  { %788 = vmatmul.mubr.bf16.gmra.mxu1 %v517_v47 }
 0x15e   :  { %797 = vmatprep.mubr.bf16.mxu1 %v7273_v0 }
 0x165   :  { %798 = vmatmul.mubr.bf16.gmra.mxu1 %v518_v55 }
 0x1ad   :  { %v4808_v26 = vpop.f32.mrf.mxu1 }
 0x1ae   :  { %v897_v38 = vmul.f32 %v4808_v26, %v4808_v26 }
 0x1af   :  { %v4810_v27 = vpop.f32.mrf.mxu1 }
 0x1b0   :  { %v898_v41 = vmul.f32 %v4810_v27, %v4810_v27 }
 0x1b1   :  { %v4812_v28 = vpop.f32.mrf.mxu1 }
 0x1b2   :  { %v899_v36 = vmul.f32 %v4812_v28, %v4812_v28  ;;  %v808_v39 = vadd.f32 %v4812_v28, %v4808_v26 }
 0x1b3   :  { %v4814_v2 = vpop.f32.mrf.mxu1 }
 0x1b4   :  { %v900_v34 = vmul.f32 %v4814_v2, %v4814_v2  ;;  %v961_v44 = vadd.f32 %v899_v36, %v897_v38  ;;  %v829_v46 = vadd.f32 %v4814_v2, %v4810_v27 }
 0x1b5   :  { %v4816_v4 = vpop.f32.mrf.mxu1 }
 0x1b6   :  { %v901_v40 = vmul.f32 %v4816_v4, %v4816_v4  ;;  %v809_v45 = vadd.f32 %v808_v39, %v4816_v4  ;;  %v982_v48 = vadd.f32 %v900_v34, %v898_v41 }
 0x1b7   :  { %v4818_v7 = vpop.f32.mrf.mxu1 }
 0x1b8   :  { %v902_v42 = vmul.f32 %v4818_v7, %v4818_v7  ;;  %v962_v51 = vadd.f32 %v961_v44, %v901_v40  ;;  %v830_v52 = vadd.f32 %v829_v46, %v4818_v7 }
 0x1b9   :  { %v4820_v13 = vpop.f32.mrf.mxu1 }
 0x1ba   :  { %v903_v47 = vmul.f32 %v4820_v13, %v4820_v13  ;;  %v810_v53 = vadd.f32 %v809_v45, %v4820_v13  ;;  %v983_v55 = vadd.f32 %v982_v48, %v902_v42 }
 0x1bb   :  { %v4822_v29 = vpop.f32.mrf.mxu1 }
 0x1bc   :  { %v904_v49 = vmul.f32 %v4822_v29, %v4822_v29  ;;  %v963_v58 = vadd.f32 %v962_v51, %v903_v47  ;;  %v831_v60 = vadd.f32 %v830_v52, %v4822_v29 }
 0x1bd   :  { %v4824_v30 = vpop.f32.mrf.mxu1 }
 0x1be   :  { %v905_v54 = vmul.f32 %v4824_v30, %v4824_v30  ;;  %v811_v59 = vadd.f32 %v810_v53, %v4824_v30  ;;  %v984_v62 = vadd.f32 %v983_v55, %v904_v49 }
 0x1bf   :  { %v4826_v16 = vpop.f32.mrf.mxu1 }
 0x1c0   :  { %v906_v56 = vmul.f32 %v4826_v16, %v4826_v16  ;;  %v964_v3 = vadd.f32 %v963_v58, %v905_v54  ;;  %v832_v5 = vadd.f32 %v831_v60, %v4826_v16 }
 0x1c1   :  { %v4828_v22 = vpop.f32.mrf.mxu1 }
 0x1c2   :  { %v907_v61 = vmul.f32 %v4828_v22, %v4828_v22  ;;  %v812_v6 = vadd.f32 %v811_v59, %v4828_v22  ;;  %v985_v9 = vadd.f32 %v984_v62, %v906_v56 }
 0x1c3   :  { %v4830_v32 = vpop.f32.mrf.mxu1 }
 0x1c4   :  { %v908_v63 = vmul.f32 %v4830_v32, %v4830_v32  ;;  %v965_v12 = vadd.f32 %v964_v3, %v907_v61  ;;  %v833_v15 = vadd.f32 %v832_v5, %v4830_v32 }
 0x1c5   :  { %v4832_v25 = vpop.f32.mrf.mxu1 }
 0x1c6   :  { %v909_v8 = vmul.f32 %v4832_v25, %v4832_v25  ;;  %v813_v14 = vadd.f32 %v812_v6, %v4832_v25  ;;  %v986_v18 = vadd.f32 %v985_v9, %v908_v63 }
 0x1c7   :  { %v4834_v31 = vpop.f32.mrf.mxu1 }
 0x1c8   :  { %v910_v10 = vmul.f32 %v4834_v31, %v4834_v31  ;;  %v966_v21 = vadd.f32 %v965_v12, %v909_v8  ;;  %v834_v23 = vadd.f32 %v833_v15, %v4834_v31 }
 0x1c9   :  { %v4836_v33 = vpop.f32.mrf.mxu1 }
 0x1ca   :  { %v911_v17 = vmul.f32 %v4836_v33, %v4836_v33  ;;  %v814_v24 = vadd.f32 %v813_v14, %v4836_v33  ;;  %v987_v34 = vadd.f32 %v986_v18, %v910_v10 }
 0x1cb   :  { %v4838_v35 = vpop.f32.mrf.mxu1 }
 0x1cc   :  { %v912_v19 = vmul.f32 %v4838_v35, %v4838_v35  ;;  %v967_v40 = vadd.f32 %v966_v21, %v911_v17  ;;  %v835_v42 = vadd.f32 %v834_v23, %v4838_v35 }
 0x1cd   :  { %v4844_v37 = vpop.f32.mrf.mxu1 }
 0x1ce   :  { %v913_v36 = vmul.f32 %v4844_v37, %v4844_v37  ;;  %v815_v41 = vadd.f32 %v814_v24, %v4844_v37  ;;  %v988_v45 = vadd.f32 %v987_v34, %v912_v19 }
 0x1cf   :  { %v4856_v43 = vpop.f32.mrf.mxu1 }
 0x1d0   :  { %v914_v38 = vmul.f32 %v4856_v43, %v4856_v43  ;;  %v968_v48 = vadd.f32 %v967_v40, %v913_v36  ;;  %v836_v49 = vadd.f32 %v835_v42, %v4856_v43 }
 0x1d1   :  { %v4865_v50 = vpop.f32.mrf.mxu1 }
 0x1d2   :  { %v915_v44 = vmul.f32 %v4865_v50, %v4865_v50  ;;  %v816_v51 = vadd.f32 %v815_v41, %v4865_v50  ;;  %v989_v53 = vadd.f32 %v988_v45, %v914_v38 }
 0x1d3   :  { %v4873_v57 = vpop.f32.mrf.mxu1 }
 0x1d4   :  { %v916_v46 = vmul.f32 %v4873_v57, %v4873_v57  ;;  %v969_v56 = vadd.f32 %v968_v48, %v915_v44  ;;  %v837_v58 = vadd.f32 %v836_v49, %v4873_v57 }
 0x1d5   :  { %v4881_v1 = vpop.f32.mrf.mxu1 }
 0x1d6   :  { %v917_v52 = vmul.f32 %v4881_v1, %v4881_v1  ;;  %v817_v59 = vadd.f32 %v816_v51, %v4881_v1  ;;  %v990_v61 = vadd.f32 %v989_v53, %v916_v46 }
 0x1d7   :  { %v4889_v11 = vpop.f32.mrf.mxu1 }
 0x1d8   :  { %v918_v54 = vmul.f32 %v4889_v11, %v4889_v11  ;;  %v970_v3 = vadd.f32 %v969_v56, %v917_v52  ;;  %v838_v5 = vadd.f32 %v837_v58, %v4889_v11 }
 0x1d9   :  { %v4897_v20 = vpop.f32.mrf.mxu1 }
 0x1da   :  { %v919_v60 = vmul.f32 %v4897_v20, %v4897_v20  ;;  %v818_v6 = vadd.f32 %v817_v59, %v4897_v20  ;;  %v991_v9 = vadd.f32 %v990_v61, %v918_v54 }
 0x1db   :  { %v4905_v39 = vpop.f32.mrf.mxu1 }
 0x1dc   :  { %v920_v62 = vmul.f32 %v4905_v39, %v4905_v39  ;;  %v971_v14 = vadd.f32 %v970_v3, %v919_v60  ;;  %v839_v15 = vadd.f32 %v838_v5, %v4905_v39 }
 0x1dd   :  { %v4913_v47 = vpop.f32.mrf.mxu1 }
 0x1de   :  { %v921_v8 = vmul.f32 %v4913_v47, %v4913_v47  ;;  %v819_v17 = vadd.f32 %v818_v6, %v4913_v47  ;;  %v992_v19 = vadd.f32 %v991_v9, %v920_v62 }
 0x1df   :  { %v4921_v55 = vpop.f32.mrf.mxu1 }
 0x1e0   :  { %v922_v10 = vmul.f32 %v4921_v55, %v4921_v55  ;;  %v972_v24 = vadd.f32 %v971_v14, %v921_v8  ;;  %v840_v36 = vadd.f32 %v839_v15, %v4921_v55 }
 0x1e1   :  { %v4929_v63 = vpop.f32.mrf.mxu1 }
 0x1e2   :  { %v923_v18 = vmul.f32 %v4929_v63, %v4929_v63  ;;  %v820_v34 = vadd.f32 %v819_v17, %v4929_v63  ;;  %v993_v40 = vadd.f32 %v992_v19, %v922_v10 }
 0x1e3   :  { %v4937_v12 = vpop.f32.mrf.mxu1 }
 0x1e4   :  { %v924_v21 = vmul.f32 %v4937_v12, %v4937_v12  ;;  %v973_v42 = vadd.f32 %v972_v24, %v923_v18  ;;  %v841_v44 = vadd.f32 %v840_v36, %v4937_v12 }
 0x1e5   :  { %v4945_v23 = vpop.f32.mrf.mxu1 }
 0x1e6   :  { %v925_v38 = vmul.f32 %v4945_v23, %v4945_v23  ;;  %v821_v45 = vadd.f32 %v820_v34, %v4945_v23  ;;  %v994_v48 = vadd.f32 %v993_v40, %v924_v21 }
 0x1e7   :  { %v4951_v41 = vpop.f32.mrf.mxu1 }
 0x1e8   :  { %v926_v46 = vmul.f32 %v4951_v41, %v4951_v41  ;;  %v974_v51 = vadd.f32 %v973_v42, %v925_v38  ;;  %v842_v52 = vadd.f32 %v841_v44, %v4951_v41 }
 0x1e9   :  { %v4957_v49 = vpop.f32.mrf.mxu1 }
 0x1ea   :  { %v822_v53 = vadd.f32 %v821_v45, %v4957_v49  ;;  %v927_v54 = vmul.f32 %v4957_v49, %v4957_v49  ;;  %v995_v56 = vadd.f32 %v994_v48, %v926_v46 }
 0x1eb   :  { %v4963_v58 = vpop.f32.mrf.mxu1 }
 0x1ec   :  { %v823_v59 = vrot.slane %v822_v53, 4  ;;  %v975_v60 = vadd.f32 %v974_v51, %v927_v54  ;;  %v843_v61 = vadd.f32 %v842_v52, %v4963_v58  ;;  %v928_v62 = vmul.f32 %v4963_v58, %v4963_v58 }
 0x1ed   :  { %v4968_v3 = vpop.f32.mrf.mxu1 }
 0x1ee   :  { %v824_v5 = vadd.f32 %v823_v59, %v822_v53  ;;  %v976_v6 = vrot.slane %v975_v60, 4  ;;  %v844_v8 = vrot.slane %v843_v61, 4  ;;  %v996_v9 = vadd.f32 %v995_v56, %v928_v62 }
 0x1ef   :  { %v4970_v10 = vpop.f32.mrf.mxu1  ;;  %v929_v54 = vmul.f32 %v4968_v3, %v4968_v3 }
 0x1f0   :  { %v825_v14 = vrot.slane %v824_v5, 2  ;;  %v977_v15 = vadd.f32 %v976_v6, %v975_v60  ;;  %v845_v17 = vadd.f32 %v844_v8, %v843_v61  ;;  %v997_v18 = vrot.slane %v996_v9, 4 }
 0x1f1   :  { %v4972_v19 = vpop.f32.mrf.mxu1  ;;  %v930_v6 = vmul.f32 %v4970_v10, %v4970_v10 }
 0x1f2   :  { %v826_v21 = vadd.f32 %v825_v14, %v824_v5  ;;  %v978_v24 = vrot.slane %v977_v15, 2  ;;  %v846_v36 = vrot.slane %v845_v17, 2  ;;  %v998_v34 = vadd.f32 %v997_v18, %v996_v9 }
 0x1f3   :  { %v4974_v38 = vpop.f32.mrf.mxu1  ;;  %v931_v56 = vmul.f32 %v4972_v19, %v4972_v19  ;;  %v850_v8 = vadd.f32 %v4972_v19, %v4968_v3 }
 0x1f4   :  { %7307 = vst [vmem:[#allocation5_spill] sm:$0xff] %v4974_v38  ;;  %v827_v40 = vrot.slane %v826_v21, 1  ;;  %v979_v42 = vadd.f32 %v978_v24, %v977_v15  ;;  %v847_v44 = vadd.f32 %v846_v36, %v845_v17  ;;  %v999_v45 = vrot.slane %v998_v34, 2 }
 0x1f5   :  { %v4976_v46 = vpop.f32.mrf.mxu1  ;;  %v932_v9 = vmul.f32 %v4974_v38, %v4974_v38 }
 0x1f6   :  { %v828_v48 = vadd.f32 %v827_v40, %v826_v21  ;;  %v980_v51 = vrot.slane %v979_v42, 1  ;;  %v848_v52 = vrot.slane %v847_v44, 1  ;;  %v1000_v53 = vadd.f32 %v999_v45, %v998_v34 }
 0x1f7   :  { %v4982_v59 = vpop.f32.mrf.mxu1  ;;  %v933_v14 = vmul.f32 %v4976_v46, %v4976_v46  ;;  %v1003_v34 = vadd.f32 %v931_v56, %v929_v54  ;;  %v871_v40 = vadd.f32 %v4974_v38, %v4970_v10  ;;  %v1024_v54 = vadd.f32 %v932_v9, %v930_v6 }
 0x1f8   :  { %v4984_v60 = vmul.f32 0.0078125, %v828_v48  ;;  %v981_v61 = vadd.f32 %v980_v51, %v979_v42  ;;  %v849_v62 = vadd.f32 %v848_v52, %v847_v44  ;;  %v1001_v5 = vrot.slane %v1000_v53, 1 }
 0x1f9   :  { %v4994_v15 = vpop.f32.mrf.mxu1  ;;  %v934_v42 = vmul.f32 %v4982_v59, %v4982_v59  ;;  %v851_v56 = vadd.f32 %v850_v8, %v4976_v46  ;;  %v872_v0 = vadd.f32 %v871_v40, %v4982_v59 }
 0x1fa   :  { %v1045_v17 = vmul.f32 0.0078125, %v981_v61  ;;  %v1049_v18 = vmul.f32 %v4984_v60, %v4984_v60  ;;  %v5000_v24 = vmul.f32 0.0078125, %v849_v62  ;;  %v1002_v36 = vadd.f32 %v1001_v5, %v1000_v53 }
 0x1fb   :  { %v5006_v44 = vpop.f32.mrf.mxu1  ;;  %v935_v52 = vmul.f32 %v4994_v15, %v4994_v15  ;;  %v1004_v5 = vadd.f32 %v1003_v34, %v933_v14  ;;  %v852_v21 = vadd.f32 %v851_v56, %v4994_v15  ;;  %v1025_v9 = vadd.f32 %v1024_v54, %v934_v42 }
 0x1fc   :  { %v1053_v45 = vsub.f32 %v1045_v17, %v1049_v18  ;;  %v1050_v48 = vmul.f32 %v5000_v24, %v5000_v24  ;;  %v1046_v53 = vmul.f32 0.0078125, %v1002_v36  ;;  %v936_v17 = vmul.f32 %v5006_v44, %v5006_v44 }
 0x1fd   :  { %v5015_v61 = vpop.f32.mrf.mxu1  ;;  %v1005_v8 = vadd.f32 %v1004_v5, %v935_v52  ;;  %v873_v36 = vadd.f32 %v872_v0, %v5006_v44 }
 0x1fe   :  { %7308 = vst [vmem:[#allocation6_spill] sm:$0xff] %v5015_v61  ;;  %v1057_v62 = vmax.f32 %v1053_v45, 0.0  ;;  %v1054_v18 = vsub.f32 %v1046_v53, %v1050_v48  ;;  %v937_v51 = vmul.f32 %v5015_v61, %v5015_v61  ;;  %v853_v14 = vadd.f32 %v852_v21, %v5015_v61 }
 0x1ff   :  { %v5023_v38 = vpop.f32.mrf.mxu1  ;;  %v1026_v53 = vadd.f32 %v1025_v9, %v936_v17 }
 0x200   :  { %v1125_v6 = vadd.f32 1e-05, %v1057_v62  ;;  %v1058_v45 = vmax.f32 %v1054_v18, 0.0  ;;  %v938_v34 = vmul.f32 %v5023_v38, %v5023_v38  ;;  %v1006_v52 = vadd.f32 %v1005_v8, %v937_v51 }
 0x201   :  { %v5029_v40 = vpop.f32.mrf.mxu1  ;;  %v1063_v62 = vsub.f32 %v4812_v28, %v4984_v60  ;;  %v874_v5 = vadd.f32 %v873_v36, %v5023_v38  ;;  %v1065_v28 = vsub.f32 %v4816_v4, %v4984_v60  ;;  %v1069_v4 = vsub.f32 %v4824_v30, %v4984_v60 }
 0x202   :  { %7309 = vst [vmem:[#allocation7_spill] sm:$0xff] %v5029_v40  ;;  %4411 = vrsqrt.f32 %v1125_v6  ;;  %v1126_v0 = vadd.f32 1e-05, %v1058_v45  ;;  %v939_v21 = vmul.f32 %v5029_v40, %v5029_v40  ;;  %v1027_v51 = vadd.f32 %v1026_v53, %v938_v34 }
 0x203   :  { %v5039_v54 = vpop.f32.mrf.mxu1  ;;  %v854_v9 = vadd.f32 %v853_v14, %v5029_v40  ;;  %v1067_v45 = vsub.f32 %v4820_v13, %v4984_v60 }
 0x204   :  { %v940_v17 = vmul.f32 %v5039_v54, %v5039_v54  ;;  %4413 = vrsqrt.f32 %v1126_v0  ;;  %v1007_v34 = vadd.f32 %v1006_v52, %v939_v21  ;;  %v875_v14 = vadd.f32 %v874_v5, %v5039_v54 }
 0x205   :  { %v5051_v8 = vpop.f32.mrf.mxu1 }
 0x206   :  { %7310 = vst [vmem:[#allocation8_spill] sm:$0xff] %v5051_v8  ;;  %v941_v36 = vmul.f32 %v5051_v8, %v5051_v8  ;;  %v1028_v56 = vadd.f32 %v1027_v51, %v940_v17  ;;  %v855_v13 = vadd.f32 %v854_v9, %v5051_v8 }
 0x207   :  { %v5064_v53 = vpop.f32.mrf.mxu1 }
 0x208   :  { %7311 = vst [vmem:[#allocation9_spill] sm:$0xff] %v5064_v53  ;;  %v942_v52 = vmul.f32 %v5064_v53, %v5064_v53  ;;  %v1008_v51 = vadd.f32 %v1007_v34, %v941_v36  ;;  %v876_v6 = vadd.f32 %v875_v14, %v5064_v53 }
 0x209   :  { %v5077_v21 = vpop.f32.mrf.mxu1 }
 0x20a   :  { %7312 = vst [vmem:[#allocation10_spill] sm:$0xff] %v5077_v21  ;;  %v943_v9 = vmul.f32 %v5077_v21, %v5077_v21  ;;  %v1029_v30 = vadd.f32 %v1028_v56, %v942_v52  ;;  %v856_v5 = vadd.f32 %v855_v13, %v5077_v21 }
 0x20b   :  { %v5092_v48 = vpop.f32.mrf.mxu1 }
 0x20c   :  { %7313 = vst [vmem:[#allocation11_spill] sm:$0xff] %v5092_v48  ;;  %v944_v34 = vmul.f32 %v5092_v48, %v5092_v48  ;;  %v1009_v8 = vadd.f32 %v1008_v51, %v943_v9  ;;  %v877_v0 = vadd.f32 %v876_v6, %v5092_v48  ;;  %v7316_v6 = vsub.f32 %v4957_v49, %v4984_v60 }
 0x20d   :  { %v5109_v42 = vpop.f32.mrf.mxu1 }
 0x20e   :  { %7314 = vst [vmem:[#allocation12_spill] sm:$0xff] %v5109_v42  ;;  %v945_v14 = vmul.f32 %v5109_v42, %v5109_v42  ;;  %v1030_v13 = vadd.f32 %v1029_v30, %v944_v34  ;;  %v857_v52 = vadd.f32 %v856_v5, %v5109_v42  ;;  %v7318_v34 = vsub.f32 %v4808_v26, %v4984_v60 }
 0x20f   :  { %v5120_v56 = vpop.eup %4411  ;;  %v5123_v21 = vpop.f32.mrf.mxu1  ;;  %v7319_v26 = vsub.f32 %v4963_v58, %v5000_v24 }
 0x210   :  { %7315 = vst [vmem:[#allocation13_spill] sm:$0xff] %v5123_v21  ;;  %v5133_v9 = vmul.f32 %v5120_v56, %v7316_v6  ;;  %v1010_v18 = vadd.f32 %v1009_v8, %v945_v14  ;;  %v878_v17 = vadd.f32 %v877_v0, %v5123_v21  ;;  %v946_v30 = vmul.f32 %v5123_v21, %v5123_v21 }
 0x211   :  { %v5138_v5 = vpop.f32.mrf.mxu1  ;;  %v1133_v36 = vmul.f32 %v5120_v56, %v7318_v34  ;;  %v1135_v51 = vmul.f32 %v5120_v56, %v1063_v62  ;;  %v1137_v49 = vmul.f32 %v5120_v56, %v1065_v28  ;;  %v1139_v6 = vmul.f32 %v5120_v56, %v1067_v45  ;;  %v5147_v42 = vpop.eup %4413 }
 0x212   :  { %7317 = vst [vmem:[#allocation14_spill] sm:$0xff] %v5138_v5  ;;  %v1031_v8 = vadd.f32 %v1030_v13, %v946_v30  ;;  %v858_v0 = vadd.f32 %v857_v52, %v5138_v5  ;;  %v947_v14 = vmul.f32 %v5138_v5, %v5138_v5  ;;  %v1141_v21 = vmul.f32 %v5120_v56, %v1069_v4 }
 0x213   :  { %v5157_v34 = vmul.f32 %v5147_v42, %v7319_v26  ;;  %v5159_v62 = vpop.f32.mrf.mxu1  ;;  %v7321_v28 = vsub.f32 %v4810_v27, %v5000_v24  ;;  %v7322_v13 = vsub.f32 %v4814_v2, %v5000_v24  ;;  %v1197_v30 = vmax.f32 %v1133_v36, 0.0 }
 0x214   :  { %7320 = vst [vmem:[#allocation15_spill] sm:$0xff] %v5159_v62  ;;  %v1011_v4 = vadd.f32 %v1010_v18, %v947_v14  ;;  %v879_v5 = vadd.f32 %v878_v17, %v5159_v62  ;;  %v948_v58 = vmul.f32 %v5159_v62, %v5159_v62  ;;  %v1199_v26 = vmax.f32 %v1135_v51, 0.0 }
 0x215   :  { %v1134_v45 = vmul.f32 %v5147_v42, %v7321_v28  ;;  %v1136_v52 = vmul.f32 %v5147_v42, %v7322_v13  ;;  %v5172_v48 = vpop.f32.mrf.mxu1  ;;  %v7323_v27 = vsub.f32 %v4818_v7, %v5000_v24  ;;  %v7324_v2 = vsub.f32 %v4822_v29, %v5000_v24 }
 0x216   :  { %v1032_v36 = vadd.f32 %v1031_v8, %v948_v58  ;;  %v859_v17 = vadd.f32 %v858_v0, %v5172_v48  ;;  %v949_v51 = vmul.f32 %v5172_v48, %v5172_v48  ;;  %v1261_v14 = vpack.c.bf16 %v1199_v26, %v1197_v30 }
 0x217   :  { %v1198_v53 = vmax.f32 %v1134_v45, 0.0  ;;  %v1200_v40 = vmax.f32 %v1136_v52, 0.0  ;;  %v1138_v28 = vmul.f32 %v5147_v42, %v7323_v27  ;;  %v1140_v18 = vmul.f32 %v5147_v42, %v7324_v2  ;;  %v5185_v13 = vpop.f32.mrf.mxu1 }
 0x218   :  { %v1201_v7 = vmax.f32 %v1137_v49, 0.0  ;;  %v1012_v61 = vadd.f32 %v1011_v4, %v949_v51  ;;  %v880_v27 = vadd.f32 %v879_v5, %v5185_v13  ;;  %v950_v29 = vmul.f32 %v5185_v13, %v5185_v13 }
 0x219   :  { %v1262_v45 = vpack.c.bf16 %v1200_v40, %v1198_v53  ;;  %v1202_v52 = vmax.f32 %v1138_v28, 0.0  ;;  %v1204_v62 = vmax.f32 %v1140_v18, 0.0  ;;  %v1203_v2 = vmax.f32 %v1139_v6, 0.0  ;;  %v5190_v8 = vpop.f32.mrf.mxu1 }
 0x21a   :  { %v7325_v30 = vsub.f32 %v4826_v16, %v5000_v24  ;;  %v7326_v40 = vsub.f32 %v4830_v32, %v5000_v24  ;;  %v7327_v5 = vsub.f32 %v4828_v22, %v4984_v60  ;;  %v1033_v6 = vadd.f32 %v1032_v36, %v950_v29 }
 0x21b   :  { %1517 = vmatprep.mubr.bf16.mxu0 %v1262_v45  ;;  %v1264_v0 = vpack.c.bf16 %v1204_v62, %v1202_v52  ;;  %v860_v4 = vadd.f32 %v859_v17, %v5190_v8  ;;  %v951_v62 = vmul.f32 %v5190_v8, %v5190_v8  ;;  %v1263_v16 = vpack.c.bf16 %v1203_v2, %v1201_v7  ;;  %v5207_v26 = vpop.f32.mrf.mxu1 }
 0x21c   :  { %v1142_v58 = vmul.f32 %v5147_v42, %v7325_v30  ;;  %v1144_v53 = vmul.f32 %v5147_v42, %v7326_v40  ;;  %v1143_v49 = vmul.f32 %v5120_v56, %v7327_v5  ;;  %1518 = vmatmul.mubr.bf16.vlgmr.msra.gmra.mxu0 %v1261_v14  ;;  %v1205_v18 = vmax.f32 %v1141_v21, 0.0 }
 0x21d   :  { %1527 = vmatprep.mubr.bf16.mxu0 %v1264_v0  ;;  %v1013_v45 = vadd.f32 %v1012_v61, %v951_v62  ;;  %v881_v22 = vadd.f32 %v880_v27, %v5207_v26  ;;  %v952_v36 = vmul.f32 %v5207_v26, %v5207_v26  ;;  %v7328_v17 = vsub.f32 %v4834_v31, %v5000_v24  ;;  %v5216_v14 = vpop.f32.mrf.mxu1 }
 0x21e   :  { %v1206_v28 = vmax.f32 %v1142_v58, 0.0  ;;  %v1208_v32 = vmax.f32 %v1144_v53, 0.0  ;;  %v1207_v51 = vmax.f32 %v1143_v49, 0.0  ;;  %v7329_v2 = vsub.f32 %v4838_v35, %v5000_v24 }
 0x21f   :  { %v1146_v52 = vmul.f32 %v5147_v42, %v7328_v17  ;;  %v7330_v61 = vsub.f32 %v4832_v25, %v4984_v60  ;;  %v1034_v0 = vadd.f32 %v1033_v6, %v952_v36  ;;  %v861_v30 = vadd.f32 %v860_v4, %v5216_v14  ;;  %v5229_v40 = vpop.f32.mrf.mxu1 }
 0x220   :  { %v1266_v7 = vpack.c.bf16 %v1208_v32, %v1206_v28  ;;  %v1265_v29 = vpack.c.bf16 %v1207_v51, %v1205_v18  ;;  %v1148_v21 = vmul.f32 %v5147_v42, %v7329_v2  ;;  %v953_v31 = vmul.f32 %v5216_v14, %v5216_v14 }
 0x221   :  { %v1145_v27 = vmul.f32 %v5120_v56, %v7330_v61  ;;  %v1210_v58 = vmax.f32 %v1146_v52, 0.0  ;;  %v7331_v35 = vsub.f32 %v4836_v33, %v4984_v60  ;;  %v7332_v25 = vsub.f32 %v4856_v43, %v5000_v24  ;;  %v5246_v33 = vpop.f32.mrf.mxu1 }
 0x222   :  { %v1212_v53 = vmax.f32 %v1148_v21, 0.0  ;;  %v1014_v62 = vadd.f32 %v1013_v45, %v953_v31  ;;  %v882_v4 = vadd.f32 %v881_v22, %v5229_v40  ;;  %v954_v28 = vmul.f32 %v5229_v40, %v5229_v40 }
 0x223   :  { %v1147_v5 = vmul.f32 %v5120_v56, %v7331_v35  ;;  %v1209_v49 = vmax.f32 %v1145_v27, 0.0  ;;  %v1150_v6 = vmul.f32 %v5147_v42, %v7332_v25  ;;  %v7333_v32 = vsub.f32 %v4873_v57, %v5000_v24  ;;  %v5255_v21 = vpop.f32.mrf.mxu1 }
 0x224   :  { %v1268_v51 = vpack.c.bf16 %v1212_v53, %v1210_v58  ;;  %v7334_v43 = vsub.f32 %v4844_v37, %v4984_v60  ;;  %v1035_v52 = vadd.f32 %v1034_v0, %v954_v28  ;;  %v862_v22 = vadd.f32 %v861_v30, %v5246_v33  ;;  %1528 = vmatmul.mubr.bf16.gmra.mxu0 %v1263_v16 }
 0x225   :  { %v1152_v18 = vmul.f32 %v5147_v42, %v7333_v32  ;;  %v1211_v36 = vmax.f32 %v1147_v5, 0.0  ;;  %v1214_v17 = vmax.f32 %v1150_v6, 0.0  ;;  %v955_v2 = vmul.f32 %v5246_v33, %v5246_v33  ;;  %1537 = vmatprep.mubr.bf16.mxu0 %v1266_v7  ;;  %v5270_v35 = vpop.f32.mrf.mxu1 }
 0x226   :  { %v1149_v45 = vmul.f32 %v5120_v56, %v7334_v43  ;;  %v7335_v27 = vsub.f32 %v4865_v50, %v4984_v60  ;;  %v7336_v0 = vsub.f32 %v4889_v11, %v5000_v24  ;;  %v883_v16 = vadd.f32 %v882_v4, %v5255_v21 }
 0x227   :  { %v1216_v57 = vmax.f32 %v1152_v18, 0.0  ;;  %v5257_v61 = vpack.c.bf16 %v1211_v36, %v1209_v49  ;;  %v1015_v58 = vadd.f32 %v1014_v62, %v955_v2  ;;  %v956_v7 = vmul.f32 %v5255_v21, %v5255_v21 }
 0x228   :  { %v1151_v37 = vmul.f32 %v5120_v56, %v7335_v27  ;;  %v1213_v31 = vmax.f32 %v1149_v45, 0.0  ;;  %v1154_v30 = vmul.f32 %v5147_v42, %v7336_v0  ;;  %v7337_v50 = vsub.f32 %v4905_v39, %v5000_v24  ;;  %v5287_v39 = vpop.f32.mrf.mxu1 }
 0x229   :  { %v1270_v53 = vpack.c.bf16 %v1216_v57, %v1214_v17  ;;  %v7338_v11 = vsub.f32 %v4881_v1, %v4984_v60  ;;  %v1036_v62 = vadd.f32 %v1035_v52, %v956_v7  ;;  %v863_v4 = vadd.f32 %v862_v22, %v5270_v35 }
 0x22a   :  { %v1215_v5 = vmax.f32 %v1151_v37, 0.0  ;;  %v1156_v49 = vmul.f32 %v5147_v42, %v7337_v50  ;;  %v1218_v25 = vmax.f32 %v1154_v30, 0.0  ;;  %v957_v28 = vmul.f32 %v5270_v35, %v5270_v35  ;;  %v5298_v57 = vpop.f32.mrf.mxu1 }
 0x22b   :  { %v1153_v6 = vmul.f32 %v5120_v56, %v7338_v11  ;;  %v7339_v32 = vsub.f32 %v4897_v20, %v4984_v60  ;;  %v7340_v1 = vsub.f32 %v4921_v55, %v5000_v24  ;;  %v884_v22 = vadd.f32 %v883_v16, %v5287_v39 }
 0x22c   :  { %v5289_v36 = vpack.c.bf16 %v1215_v5, %v1213_v31  ;;  %v1220_v17 = vmax.f32 %v1156_v49, 0.0  ;;  %v1016_v52 = vadd.f32 %v1015_v58, %v957_v28  ;;  %v958_v2 = vmul.f32 %v5287_v39, %v5287_v39  ;;  %1538 = vmatmul.mubr.bf16.gmra.mxu0 %v1265_v29  ;;  %v5311_v50 = vpop.f32.mrf.mxu1 }
 0x22d   :  { %v1155_v18 = vmul.f32 %v5120_v56, %v7339_v32  ;;  %v1217_v43 = vmax.f32 %v1153_v6, 0.0  ;;  %v1158_v45 = vmul.f32 %v5147_v42, %v7340_v1  ;;  %v7341_v37 = vsub.f32 %v4937_v12, %v5000_v24  ;;  %1547 = vmatprep.mubr.bf16.mxu0 %v1268_v51 }
 0x22e   :  { %v1272_v27 = vpack.c.bf16 %v1220_v17, %v1218_v25  ;;  %v7342_v55 = vsub.f32 %v4913_v47, %v4984_v60  ;;  %v1037_v58 = vadd.f32 %v1036_v62, %v958_v2  ;;  %v864_v16 = vadd.f32 %v863_v4, %v5298_v57 }
 0x22f   :  { %v1219_v20 = vmax.f32 %v1155_v18, 0.0  ;;  %v1160_v31 = vmul.f32 %v5147_v42, %v7341_v37  ;;  %v1222_v0 = vmax.f32 %v1158_v45, 0.0  ;;  %v959_v7 = vmul.f32 %v5298_v57, %v5298_v57 }
 0x230   :  { %v1157_v30 = vmul.f32 %v5120_v56, %v7342_v55  ;;  %v7343_v49 = vsub.f32 %v4929_v63, %v4984_v60  ;;  %v7344_v11 = vsub.f32 %v4951_v41, %v5000_v24  ;;  %v865_v62 = vrot.slane %v864_v16, 4 }
 0x231   :  { %v1271_v5 = vpack.c.bf16 %v1219_v20, %v1217_v43  ;;  %v1224_v12 = vmax.f32 %v1160_v31, 0.0  ;;  %v1017_v4 = vadd.f32 %v1016_v52, %v959_v7  ;;  %v885_v29 = vadd.f32 %v884_v22, %v5311_v50 }
 0x232   :  { %v1159_v25 = vmul.f32 %v5120_v56, %v7343_v49  ;;  %v1221_v47 = vmax.f32 %v1157_v30, 0.0  ;;  %v1162_v6 = vmul.f32 %v5147_v42, %v7344_v11  ;;  %v960_v51 = vmul.f32 %v5311_v50, %v5311_v50 }
 0x233   :  { %v1274_v28 = vpack.c.bf16 %v1224_v12, %v1222_v0  ;;  %v1228_v63 = vmax.f32 %v5157_v34, 0.0  ;;  %v866_v17 = vadd.f32 %v865_v62, %v864_v16  ;;  %v1018_v43 = vrot.slane %v1017_v4, 4 }
 0x234   :  { %v1223_v32 = vmax.f32 %v1159_v25, 0.0  ;;  %v1226_v18 = vmax.f32 %v1162_v6, 0.0  ;;  %v886_v1 = vrot.slane %v885_v29, 4  ;;  %v1038_v45 = vadd.f32 %v1037_v58, %v960_v51  ;;  %1548 = vmatmul.mubr.bf16.gmra.mxu0 %v5257_v61 }
 0x235   :  { %v7345_v24 = vsub.f32 %v4945_v23, %v4984_v60  ;;  %v1227_v52 = vmax.f32 %v5133_v9, 0.0  ;;  %v867_v22 = vrot.slane %v866_v17, 2  ;;  %v1019_v20 = vadd.f32 %v1018_v43, %v1017_v4  ;;  %1557 = vmatprep.mubr.bf16.mxu0 %v1270_v53 }
 0x236   :  { %v1273_v2 = vpack.c.bf16 %v1223_v32, %v1221_v47  ;;  %v1276_v41 = vpack.c.bf16 %v1228_v63, %v1226_v18  ;;  %v887_v37 = vadd.f32 %v886_v1, %v885_v29  ;;  %v1039_v31 = vrot.slane %v1038_v45, 4 }
 0x237   :  { %v1161_v42 = vmul.f32 %v5120_v56, %v7345_v24  ;;  %v868_v55 = vadd.f32 %v867_v22, %v866_v17  ;;  %v1020_v34 = vrot.slane %v1019_v20, 2 }
 0x238   :  { %v888_v30 = vrot.slane %v887_v37, 2  ;;  %v1040_v16 = vadd.f32 %v1039_v31, %v1038_v45 }
 0x239   :  { %v1225_v0 = vmax.f32 %v1161_v42, 0.0  ;;  %v869_v7 = vrot.slane %v868_v55, 1  ;;  %v1021_v23 = vadd.f32 %v1020_v34, %v1019_v20 }
 0x23a   :  { %v889_v60 = vadd.f32 %v888_v30, %v887_v37  ;;  %v1041_v56 = vrot.slane %v1040_v16, 2  ;;  %v7346_v37 = vld [vmem:[#allocation5_spill] sm:$0xff] }
 0x23b   :  { %v5331_v58 = vpack.c.bf16 %v1227_v52, %v1225_v0  ;;  %v870_v12 = vadd.f32 %v869_v7, %v868_v55  ;;  %v1022_v9 = vrot.slane %v1021_v23, 1  ;;  %v7348_v0 = vld [vmem:[#allocation7_spill] sm:$0xff] }
 0x23c   :  { %v890_v49 = vrot.slane %v889_v60, 1  ;;  %v1042_v25 = vadd.f32 %v1041_v56, %v1040_v16  ;;  %1558 = vmatmul.mubr.bf16.gmra.mxu0 %v5289_v36 }
 0x23d   :  { %v5333_v47 = vmul.f32 0.0078125, %v870_v12  ;;  %v1023_v11 = vadd.f32 %v1022_v9, %v1021_v23  ;;  %1567 = vmatprep.mubr.bf16.mxu0 %v1272_v27  ;;  %v7355_v12 = vld [vmem:[#allocation12_spill] sm:$0xff] }
 0x23e   :  { %v891_v6 = vadd.f32 %v890_v49, %v889_v60  ;;  %v1043_v62 = vrot.slane %v1042_v25, 1  ;;  %v7354_v60 = vld [vmem:[#allocation15_spill] sm:$0xff] }
 0x23f   :  { %v1047_v4 = vmul.f32 0.0078125, %v1023_v11  ;;  %v1051_v61 = vmul.f32 %v5333_v47, %v5333_v47  ;;  %v1123_v53 = vsub.f32 %v5298_v57, %v5333_v47  ;;  %v1117_v57 = vsub.f32 %v5216_v14, %v5333_v47 }
 0x240   :  { %v5339_v29 = vmul.f32 0.0078125, %v891_v6  ;;  %v1044_v51 = vadd.f32 %v1043_v62, %v1042_v25  ;;  %v1119_v36 = vsub.f32 %v5246_v33, %v5333_v47  ;;  %v1121_v42 = vsub.f32 %v5270_v35, %v5333_v47  ;;  %v7356_v25 = vld [vmem:[#allocation14_spill] sm:$0xff]  ;;  %v4363_v35 = vld [vmem:[%s7271_s4 + $0x70] ss:$8 sps:$4 sm:$0xff]  }
 0x241   :  { %v1055_v32 = vsub.f32 %v1047_v4, %v1051_v61  ;;  %v1097_v22 = vsub.f32 %v4976_v46, %v5333_v47  ;;  %v1103_v55 = vsub.f32 %v7348_v0, %v5333_v47  ;;  %v1109_v9 = vsub.f32 %v7355_v12, %v5333_v47 }
 0x242   :  { %v1052_v18 = vmul.f32 %v5339_v29, %v5339_v29  ;;  %v1048_v63 = vmul.f32 0.0078125, %v1044_v51  ;;  %v1122_v27 = vsub.f32 %v5287_v39, %v5339_v29  ;;  %v1124_v52 = vsub.f32 %v5311_v50, %v5339_v29 }
 0x243   :  { %v1059_v17 = vmax.f32 %v1055_v32, 0.0  ;;  %v1094_v20 = vsub.f32 %v4970_v10, %v5339_v29  ;;  %v1096_v31 = vsub.f32 %v7346_v37, %v5339_v29  ;;  %v1098_v50 = vsub.f32 %v4982_v59, %v5339_v29  ;;  %v7347_v10 = vld [vmem:[#allocation6_spill] sm:$0xff]  ;;  %v7349_v59 = vld [vmem:[#allocation9_spill] sm:$0xff] }
 0x244   :  { %v1056_v43 = vsub.f32 %v1048_v63, %v1052_v18  ;;  %1568 = vmatmul.mubr.bf16.gmra.mxu0 %v1271_v5  ;;  %v1093_v5 = vsub.f32 %v4968_v3, %v5333_v47  ;;  %v1099_v3 = vsub.f32 %v4994_v15, %v5333_v47  ;;  %v1104_v46 = vsub.f32 %v5039_v54, %v5339_v29  ;;  %v7351_v15 = vld [vmem:[#allocation8_spill] sm:$0xff]  ;;  %v7353_v54 = vld [vmem:[#allocation13_spill] sm:$0xff] }
 0x245   :  { %v1127_v1 = vadd.f32 1e-05, %v1059_v17  ;;  %1577 = vmatprep.mubr.bf16.mxu0 %v1274_v28  ;;  %v1095_v28 = vsub.f32 %v4972_v19, %v5333_v47  ;;  %v1102_v19 = vsub.f32 %v5023_v38, %v5339_v29  ;;  %v1106_v34 = vsub.f32 %v7349_v59, %v5339_v29  ;;  %v7352_v38 = vld [vmem:[#allocation10_spill] sm:$0xff] }
 0x246   :  { %v1060_v45 = vmax.f32 %v1056_v43, 0.0  ;;  %v1105_v16 = vsub.f32 %v7351_v15, %v5333_v47  ;;  %v1107_v7 = vsub.f32 %v7352_v38, %v5333_v47  ;;  %v1110_v23 = vsub.f32 %v7353_v54, %v5339_v29 }
 0x247   :  { %4415 = vrsqrt.f32 %v1127_v1  ;;  %v1112_v56 = vsub.f32 %v7354_v60, %v5339_v29  ;;  %v1111_v11 = vsub.f32 %v7356_v25, %v5333_v47  ;;  %v1114_v6 = vsub.f32 %v5185_v13, %v5339_v29 }
 0x248   :  { %v1128_v24 = vadd.f32 1e-05, %v1060_v45  ;;  %v1116_v62 = vsub.f32 %v5207_v26, %v5339_v29  ;;  %v1113_v4 = vsub.f32 %v5172_v48, %v5333_v47  ;;  %v1115_v13 = vsub.f32 %v5190_v8, %v5333_v47 }
 0x249   :  { %v1118_v26 = vsub.f32 %v5229_v40, %v5339_v29  ;;  %v1120_v48 = vsub.f32 %v5255_v21, %v5339_v29 }
 0x24a   :  { %4417 = vrsqrt.f32 %v1128_v24 }
 0x24c   :  { %1578 = vmatmul.mubr.bf16.gmra.mxu0 %v1273_v2  ;;  %v1100_v2 = vsub.f32 %v5006_v44, %v5339_v29  ;;  %v7350_v44 = vld [vmem:[#allocation11_spill] sm:$0xff] }
 0x24d   :  { %1587 = vmatprep.mubr.bf16.mxu0 %v1276_v41  ;;  %v1101_v41 = vsub.f32 %v7347_v10, %v5333_v47  ;;  %v1108_v30 = vsub.f32 %v7350_v44, %v5339_v29  ;;  %v4365_v47 = vld [vmem:[%s7271_s4 + $0x74] ss:$8 sps:$4 sm:$0xff]  }
 0x24e   :  { %2354 = vmatprep.subr.bf16.mxu1 %v4365_v47 }
 0x24f   :  { %2355 = vmatpush1.bf16.msra.mxu1 %v4363_v35 }
 0x254   :  { %v5392_v49 = vpop.eup %4415  ;;  %1588 = vmatmul.mubr.bf16.gmra.mxu0 %v5331_v58 }
 0x255   :  { %v5403_v61 = vmul.f32 %v5392_v49, %v1123_v53  ;;  %v1165_v51 = vmul.f32 %v5392_v49, %v1093_v5  ;;  %v1167_v32 = vmul.f32 %v5392_v49, %v1095_v28  ;;  %v1169_v18 = vmul.f32 %v5392_v49, %v1097_v22 }
 0x256   :  { %v1171_v63 = vmul.f32 %v5392_v49, %v1099_v3  ;;  %v5419_v1 = vmul.f32 %v5392_v49, %v1101_v41  ;;  %v1177_v45 = vmul.f32 %v5392_v49, %v1105_v16  ;;  %v1179_v58 = vmul.f32 %v5392_v49, %v1107_v7 }
 0x257   :  { %v5415_v17 = vpop.eup %4417  ;;  %v1229_v53 = vmax.f32 %v1165_v51, 0.0  ;;  %v1231_v43 = vmax.f32 %v1167_v32, 0.0  ;;  %v1233_v5 = vmax.f32 %v1169_v18, 0.0  ;;  %v1181_v51 = vmul.f32 %v5392_v49, %v1109_v9 }
 0x258   :  { %v1166_v24 = vmul.f32 %v5415_v17, %v1094_v20  ;;  %v1168_v8 = vmul.f32 %v5415_v17, %v1096_v31  ;;  %v1170_v40 = vmul.f32 %v5415_v17, %v1098_v50  ;;  %v1172_v21 = vmul.f32 %v5415_v17, %v1100_v2 }
 0x259   :  { %v1235_v28 = vmax.f32 %v1171_v63, 0.0  ;;  %v1174_v22 = vmul.f32 %v5415_v17, %v1102_v19  ;;  %v1176_v41 = vmul.f32 %v5415_v17, %v1104_v46  ;;  %v1196_v0 = vmul.f32 %v5415_v17, %v1124_v52 }
 0x25a   :  { %v1230_v37 = vmax.f32 %v1166_v24, 0.0  ;;  %v1232_v3 = vmax.f32 %v1168_v8, 0.0  ;;  %v1234_v10 = vmax.f32 %v1170_v40, 0.0  ;;  %v1236_v20 = vmax.f32 %v1172_v21, 0.0 }
 0x25b   :  { %v1238_v59 = vmax.f32 %v1174_v22, 0.0  ;;  %v1175_v31 = vmul.f32 %v5392_v49, %v1103_v55  ;;  %v1277_v44 = vpack.c.bf16 %v1231_v43, %v1229_v53  ;;  %v1240_v15 = vmax.f32 %v1176_v41, 0.0 }
 0x25c   :  { %v1278_v50 = vpack.c.bf16 %v1232_v3, %v1230_v37  ;;  %v1178_v2 = vmul.f32 %v5415_v17, %v1106_v34  ;;  %v1279_v16 = vpack.c.bf16 %v1235_v28, %v1233_v5  ;;  %v1180_v19 = vmul.f32 %v5415_v17, %v1108_v30 }
 0x25d   :  { %v1241_v38 = vmax.f32 %v1177_v45, 0.0  ;;  %v1243_v7 = vmax.f32 %v1179_v58, 0.0  ;;  %v1280_v54 = vpack.c.bf16 %v1236_v20, %v1234_v10  ;;  %v1282_v60 = vpack.c.bf16 %v1240_v15, %v1238_v59  ;;  %v4372_v59 = vld [vmem:[%s7271_s4 + $0x40] ss:$8 sps:$4 sm:$0xff]   ;;  %v4380_v15 = vld [vmem:[%s7271_s4 + $0x24] ss:$8 sps:$4 sm:$0xff]  }
 0x25e   :  { %1597 = vmatprep.mubr.bf16.mxu0 %v1278_v50  ;;  %v1242_v46 = vmax.f32 %v1178_v2, 0.0  ;;  %v1182_v52 = vmul.f32 %v5415_v17, %v1110_v23  ;;  %v1244_v12 = vmax.f32 %v1180_v19, 0.0  ;;  %v1184_v55 = vmul.f32 %v5415_v17, %v1112_v56  ;;  %v4377_v50 = vld [vmem:[%s7271_s4 + $0x34] ss:$8 sps:$4 sm:$0xff]   ;;  %v4378_v2 = vld [vmem:[%s7271_s4 + $0x20] ss:$8 sps:$4 sm:$0xff]  }
 0x25f   :  { %1598 = vmatmul.mubr.bf16.gmra.mxu0 %v1277_v44  ;;  %v1283_v25 = vpack.c.bf16 %v1243_v7, %v1241_v38  ;;  %v1183_v32 = vmul.f32 %v5392_v49, %v1111_v11  ;;  %v1186_v30 = vmul.f32 %v5415_v17, %v1114_v6  ;;  %v1188_v18 = vmul.f32 %v5415_v17, %v1116_v62  ;;  %v4375_v44 = vld [vmem:[%s7271_s4 + $0x30] ss:$8 sps:$4 sm:$0xff]   ;;  %v4386_v38 = vld [vmem:[%s7271_s4 + $0x4] ss:$8 sps:$4 sm:$0xff]   ;;  %v4384_v7 = vld [vmem:[%s7271_s4] ss:$8 sps:$4 sm:$0xff]  }
 0x260   :  { %1607 = vmatprep.mubr.bf16.mxu0 %v1280_v54  ;;  %v1246_v34 = vmax.f32 %v1182_v52, 0.0  ;;  %v1284_v63 = vpack.c.bf16 %v1244_v12, %v1242_v46  ;;  %v1248_v53 = vmax.f32 %v1184_v55, 0.0  ;;  %v1245_v43 = vmax.f32 %v1181_v51, 0.0  ;;  %v4381_v19 = vld [vmem:[%s7271_s4 + $0x10] ss:$8 sps:$4 sm:$0xff]  }
 0x261   :  { %v1185_v23 = vmul.f32 %v5392_v49, %v1113_v4  ;;  %v1247_v45 = vmax.f32 %v1183_v32, 0.0  ;;  %v1250_v24 = vmax.f32 %v1186_v30, 0.0  ;;  %v1252_v8 = vmax.f32 %v1188_v18, 0.0  ;;  %v4389_v54 = vld [vmem:[%s7271_s4 + $0xf4] ss:$8 sps:$4 sm:$0xff]  }
 0x262   :  { %v1187_v56 = vmul.f32 %v5392_v49, %v1115_v13  ;;  %v1286_v40 = vpack.c.bf16 %v1248_v53, %v1246_v34  ;;  %v1190_v5 = vmul.f32 %v5415_v17, %v1118_v26  ;;  %v1192_v11 = vmul.f32 %v5415_v17, %v1120_v48  ;;  %v4392_v46 = vld [vmem:[%s7271_s4 + $0xe4] ss:$8 sps:$4 sm:$0xff]   ;;  %v4390_v52 = vld [vmem:[%s7271_s4 + $0xe0] ss:$8 sps:$4 sm:$0xff]   ;;  %v4395_v12 = vld [vmem:[%s7271_s4 + $0xd4] ss:$8 sps:$4 sm:$0xff]  }
 0x263   :  { %v1249_v9 = vmax.f32 %v1185_v23, 0.0  ;;  %v1285_v21 = vpack.c.bf16 %v1247_v45, %v1245_v43  ;;  %v1288_v6 = vpack.c.bf16 %v1252_v8, %v1250_v24  ;;  %v1189_v62 = vmul.f32 %v5392_v49, %v1117_v57  ;;  %v4398_v55 = vld [vmem:[%s7271_s4 + $0xc4] ss:$8 sps:$4 sm:$0xff]   ;;  %v4396_v51 = vld [vmem:[%s7271_s4 + $0xc0] ss:$8 sps:$4 sm:$0xff]  }
 0x264   :  { %v1251_v28 = vmax.f32 %v1187_v56, 0.0  ;;  %v1254_v4 = vmax.f32 %v1190_v5, 0.0  ;;  %v1256_v22 = vmax.f32 %v1192_v11, 0.0  ;;  %v1191_v13 = vmul.f32 %v5392_v49, %v1119_v36  ;;  %v4401_v34 = vld [vmem:[%s7271_s4 + $0xb4] ss:$8 sps:$4 sm:$0xff]  }
 0x265   :  { %v1194_v26 = vmul.f32 %v5415_v17, %v1122_v27  ;;  %v1253_v58 = vmax.f32 %v1189_v62, 0.0  ;;  %v1260_v37 = vmax.f32 %v1196_v0, 0.0  ;;  %v1193_v14 = vmul.f32 %v5392_v49, %v1121_v42  ;;  %v4366_v42 = vld [vmem:[%s7271_s4 + $0x60] ss:$8 sps:$4 sm:$0xff]   ;;  %v4368_v49 = vld [vmem:[%s7271_s4 + $0x64] ss:$8 sps:$4 sm:$0xff]  }
 0x266   :  { %v1287_v48 = vpack.c.bf16 %v1251_v28, %v1249_v9  ;;  %v1290_v57 = vpack.c.bf16 %v1256_v22, %v1254_v4  ;;  %v1255_v3 = vmax.f32 %v1191_v13, 0.0  ;;  %v1259_v33 = vmax.f32 %v5403_v61, 0.0  ;;  %2356 = vmatprep.subr.bf16.mxu1 %v4368_v49  ;;  %v4369_v61 = vld [vmem:[%s7271_s4 + $0x50] ss:$8 sps:$4 sm:$0xff]   ;;  %v4404_v30 = vld [vmem:[%s7271_s4 + $0xa4] ss:$8 sps:$4 sm:$0xff]  }
 0x267   :  { %1608 = vmatmul.mubr.bf16.gmra.mxu0 %v1279_v16  ;;  %v1258_v10 = vmax.f32 %v1194_v26, 0.0  ;;  %v1257_v36 = vmax.f32 %v1193_v14, 0.0  ;;  %v1237_v39 = vmax.f32 %v5419_v1, 0.0  ;;  %v1239_v29 = vmax.f32 %v1175_v31, 0.0  ;;  %2357 = vmatpush1.bf16.msra.mxu1 %v4366_v42  ;;  %v4371_v1 = vld [vmem:[%s7271_s4 + $0x54] ss:$8 sps:$4 sm:$0xff]  }
 0x268   :  { %1617 = vmatprep.mubr.bf16.mxu0 %v1282_v60  ;;  %v1289_v27 = vpack.c.bf16 %v1255_v3, %v1253_v58  ;;  %2358 = vmatprep.subr.bf16.mxu1 %v4371_v1  ;;  %v7357_v20 = vmov 0   ;;  %v4374_v31 = vld [vmem:[%s7271_s4 + $0x44] ss:$8 sps:$4 sm:$0xff]   ;;  %v4383_v16 = vld [vmem:[%s7271_s4 + $0x14] ss:$8 sps:$4 sm:$0xff]  }
 0x269   :  { %v1292_v17 = vpack.c.bf16 %v1260_v37, %v1258_v10  ;;  %v1291_v41 = vpack.c.bf16 %v1259_v33, %v1257_v36  ;;  %v1281_v0 = vpack.c.bf16 %v1239_v29, %v1237_v39  ;;  %v4387_v60 = vld [vmem:[%s7271_s4 + $0xf0] ss:$8 sps:$4 sm:$0xff]   ;;  %v4402_v18 = vld [vmem:[%s7271_s4 + $0xa0] ss:$8 sps:$4 sm:$0xff]   ;;  %v4410_v23 = vld [vmem:[%s7271_s4 + $0x84] ss:$8 sps:$4 sm:$0xff]  }
 0x26a   :  { %v4399_v32 = vld [vmem:[%s7271_s4 + $0xb0] ss:$8 sps:$4 sm:$0xff]   ;;  %v4408_v24 = vld [vmem:[%s7271_s4 + $0x80] ss:$8 sps:$4 sm:$0xff]  }
 0x26b   :  { %2359 = vmatpush1.bf16.msra.mxu1 %v4369_v61  ;;  %v4405_v53 = vld [vmem:[%s7271_s4 + $0x90] ss:$8 sps:$4 sm:$0xff]  }
 0x26c   :  { %2360 = vmatprep.subr.bf16.mxu1 %v4374_v31 }
 0x26f   :  { %1618 = vmatmul.mubr.bf16.gmra.mxu0 %v1281_v0  ;;  %2361 = vmatpush1.bf16.msra.mxu1 %v4372_v59 }
 0x270   :  { %1627 = vmatprep.mubr.bf16.mxu0 %v1284_v63  ;;  %2362 = vmatprep.subr.bf16.mxu1 %v4377_v50  ;;  %v4407_v63 = vld [vmem:[%s7271_s4 + $0x94] ss:$8 sps:$4 sm:$0xff]  }
 0x273   :  { %2363 = vmatpush1.bf16.msra.mxu1 %v4375_v44 }
 0x274   :  { %2364 = vmatprep.subr.bf16.mxu1 %v4380_v15 }
 0x277   :  { %1628 = vmatmul.mubr.bf16.gmra.mxu0 %v1283_v25  ;;  %2365 = vmatpush1.bf16.msra.mxu1 %v4378_v2  ;;  %v4393_v25 = vld [vmem:[%s7271_s4 + $0xd0] ss:$8 sps:$4 sm:$0xff]  }
 0x278   :  { %1637 = vmatprep.mubr.bf16.mxu0 %v1286_v40  ;;  %2366 = vmatprep.subr.bf16.mxu1 %v4383_v16 }
 0x27b   :  { %2367 = vmatpush1.bf16.msra.mxu1 %v4381_v19 }
 0x27c   :  { %2368 = vmatprep.subr.bf16.mxu1 %v4386_v38 }
 0x27f   :  { %1638 = vmatmul.mubr.bf16.gmra.mxu0 %v1285_v21  ;;  %2369 = vmatpush1.bf16.msra.mxu1 %v4384_v7 }
 0x280   :  { %1647 = vmatprep.mubr.bf16.mxu0 %v1288_v6  ;;  %2370 = vmatprep.subr.bf16.mxu1 %v4389_v54 }
 0x283   :  { %2371 = vmatpush2.bf16.msra.mxu1 %v4387_v60 }
 0x284   :  { %2372 = vmatprep.subr.bf16.mxu1 %v4392_v46 }
 0x287   :  { %1648 = vmatmul.mubr.bf16.gmra.mxu0 %v1287_v48  ;;  %2373 = vmatpush2.bf16.msra.mxu1 %v4390_v52 }
 0x288   :  { %1657 = vmatprep.mubr.bf16.mxu0 %v1290_v57  ;;  %2374 = vmatprep.subr.bf16.mxu1 %v4395_v12 }
 0x28b   :  { %2375 = vmatpush2.bf16.msra.mxu1 %v4393_v25 }
 0x28c   :  { %2376 = vmatprep.subr.bf16.mxu1 %v4398_v55 }
 0x28f   :  { %1658 = vmatmul.mubr.bf16.gmra.mxu0 %v1289_v27  ;;  %2377 = vmatpush2.bf16.msra.mxu1 %v4396_v51 }
 0x290   :  { %1667 = vmatprep.mubr.bf16.mxu0 %v1292_v17  ;;  %2378 = vmatprep.subr.bf16.mxu1 %v4401_v34 }
 0x293   :  { %2379 = vmatpush2.bf16.msra.mxu1 %v4399_v32 }
 0x294   :  { %2380 = vmatprep.subr.bf16.mxu1 %v4404_v30 }
 0x297   :  { %1668 = vmatmul.mubr.bf16.gmra.mxu0 %v1291_v41  ;;  %2381 = vmatpush2.bf16.msra.mxu1 %v4402_v18 }
 0x298   :  { %3031 = vmatprep.mubr.bf16.mxu0 %v7357_v20  ;;  %2382 = vmatprep.subr.bf16.mxu1 %v4407_v63 }
 0x29b   :  { %2383 = vmatpush2.bf16.msra.mxu1 %v4405_v53 }
 0x29c   :  { %2384 = vmatprep.subr.bf16.mxu1 %v4410_v23 }
 0x29f   :  { %2385 = vmatpush2.bf16.msra.mxu1 %v4408_v24 }
 0x2dc   :  { %v5552_v43 = vpop.f32.mrf.mxu0 }
 0x2dd   :  { %v1766_v14 = vmul.f32 %v5552_v43, %v5552_v43 }
 0x2de   :  { %v5557_v45 = vpop.f32.mrf.mxu0 }
 0x2df   :  { %v1767_v10 = vmul.f32 %v5557_v45, %v5557_v45 }
 0x2e0   :  { %v5562_v8 = vpop.f32.mrf.mxu0 }
 0x2e1   :  { %v1768_v48 = vmul.f32 %v5562_v8, %v5562_v8  ;;  %v1678_v57 = vadd.f32 %v5562_v8, %v5552_v43 }
 0x2e2   :  { %v5564_v56 = vpop.f32.mrf.mxu0 }
 0x2e3   :  { %v1769_v58 = vmul.f32 %v5564_v56, %v5564_v56  ;;  %v1830_v39 = vadd.f32 %v1768_v48, %v1766_v14  ;;  %v1699_v27 = vadd.f32 %v5564_v56, %v5557_v45 }
 0x2e4   :  { %v5566_v40 = vpop.f32.mrf.mxu0 }
 0x2e5   :  { %v1770_v3 = vmul.f32 %v5566_v40, %v5566_v40  ;;  %v1679_v29 = vadd.f32 %v1678_v57, %v5566_v40  ;;  %v1851_v41 = vadd.f32 %v1769_v58, %v1767_v10 }
 0x2e6   :  { %v5568_v9 = vpop.f32.mrf.mxu0 }
 0x2e7   :  { %v1771_v33 = vmul.f32 %v5568_v9, %v5568_v9  ;;  %v1831_v47 = vadd.f32 %v1830_v39, %v1770_v3  ;;  %v1700_v42 = vadd.f32 %v1699_v27, %v5568_v9 }
 0x2e8   :  { %v5570_v5 = vpop.f32.mrf.mxu0 }
 0x2e9   :  { %v1772_v17 = vmul.f32 %v5570_v5, %v5570_v5  ;;  %v1680_v49 = vadd.f32 %v1679_v29, %v5570_v5  ;;  %v1852_v1 = vadd.f32 %v1851_v41, %v1771_v33 }
 0x2ea   :  { %v5572_v11 = vpop.f32.mrf.mxu0 }
 0x2eb   :  { %v1773_v0 = vmul.f32 %v5572_v11, %v5572_v11  ;;  %v1832_v50 = vadd.f32 %v1831_v47, %v1772_v17  ;;  %v1701_v15 = vadd.f32 %v1700_v42, %v5572_v11 }
 0x2ec   :  { %v5574_v21 = vpop.f32.mrf.mxu0 }
 0x2ed   :  { %v1774_v61 = vmul.f32 %v5574_v21, %v5574_v21  ;;  %v1681_v44 = vadd.f32 %v1680_v49, %v5574_v21  ;;  %v1853_v16 = vadd.f32 %v1852_v1, %v1773_v0 }
 0x2ee   :  { %v5576_v6 = vpop.f32.mrf.mxu0 }
 0x2ef   :  { %v1775_v59 = vmul.f32 %v5576_v6, %v5576_v6  ;;  %v1833_v7 = vadd.f32 %v1832_v50, %v1774_v61  ;;  %v1702_v54 = vadd.f32 %v1701_v15, %v5576_v6 }
 0x2f0   :  { %v5578_v28 = vpop.f32.mrf.mxu0 }
 0x2f1   :  { %v1776_v2 = vmul.f32 %v5578_v28, %v5578_v28  ;;  %v1682_v60 = vadd.f32 %v1681_v44, %v5578_v28  ;;  %v1854_v52 = vadd.f32 %v1853_v16, %v1775_v59 }
 0x2f2   :  { %v5580_v62 = vpop.f32.mrf.mxu0 }
 0x2f3   :  { %v1777_v19 = vmul.f32 %v5580_v62, %v5580_v62  ;;  %v1834_v55 = vadd.f32 %v1833_v7, %v1776_v2  ;;  %v1703_v34 = vadd.f32 %v1702_v54, %v5580_v62 }
 0x2f4   :  { %v5582_v4 = vpop.f32.mrf.mxu0 }
 0x2f5   :  { %v1778_v46 = vmul.f32 %v5582_v4, %v5582_v4  ;;  %v1683_v51 = vadd.f32 %v1682_v60, %v5582_v4  ;;  %v1855_v30 = vadd.f32 %v1854_v52, %v1777_v19 }
 0x2f6   :  { %v5584_v22 = vpop.f32.mrf.mxu0 }
 0x2f7   :  { %v1779_v12 = vmul.f32 %v5584_v22, %v5584_v22  ;;  %v1835_v53 = vadd.f32 %v1834_v55, %v1778_v46  ;;  %v1704_v23 = vadd.f32 %v1703_v34, %v5584_v22 }
 0x2f8   :  { %v5586_v13 = vpop.f32.mrf.mxu0 }
 0x2f9   :  { %v1780_v32 = vmul.f32 %v5586_v13, %v5586_v13  ;;  %v1684_v24 = vadd.f32 %v1683_v51, %v5586_v13  ;;  %v1856_v58 = vadd.f32 %v1855_v30, %v1779_v12 }
 0x2fa   :  { %v5588_v26 = vpop.f32.mrf.mxu0 }
 0x2fb   :  { %v1781_v18 = vmul.f32 %v5588_v26, %v5588_v26  ;;  %v1836_v3 = vadd.f32 %v1835_v53, %v1780_v32  ;;  %v1705_v33 = vadd.f32 %v1704_v23, %v5588_v26 }
 0x2fc   :  { %v5594_v37 = vpop.f32.mrf.mxu0 }
 0x2fd   :  { %v1782_v48 = vmul.f32 %v5594_v37, %v5594_v37  ;;  %v1685_v10 = vadd.f32 %v1684_v24, %v5594_v37  ;;  %v1857_v29 = vadd.f32 %v1856_v58, %v1781_v18 }
 0x2fe   :  { %v5606_v36 = vpop.f32.mrf.mxu0 }
 0x2ff   :  { %v1783_v14 = vmul.f32 %v5606_v36, %v5606_v36  ;;  %v1837_v41 = vadd.f32 %v1836_v3, %v1782_v48  ;;  %v1706_v0 = vadd.f32 %v1705_v33, %v5606_v36 }
 0x300   :  { %v5615_v35 = vpop.f32.mrf.mxu0 }
 0x301   :  { %v1784_v39 = vmul.f32 %v5615_v35, %v5615_v35  ;;  %v1686_v47 = vadd.f32 %v1685_v10, %v5615_v35  ;;  %v1858_v49 = vadd.f32 %v1857_v29, %v1783_v14 }
 0x302   :  { %v5623_v31 = vpop.f32.mrf.mxu0 }
 0x303   :  { %v1785_v27 = vmul.f32 %v5623_v31, %v5623_v31  ;;  %v1838_v59 = vadd.f32 %v1837_v41, %v1784_v39  ;;  %v1707_v50 = vadd.f32 %v1706_v0, %v5623_v31 }
 0x304   :  { %v5631_v38 = vpop.f32.mrf.mxu0 }
 0x305   :  { %v1786_v42 = vmul.f32 %v5631_v38, %v5631_v38  ;;  %v1687_v44 = vadd.f32 %v1686_v47, %v5631_v38  ;;  %v1859_v2 = vadd.f32 %v1858_v49, %v1785_v27 }
 0x306   :  { %v5639_v25 = vpop.f32.mrf.mxu0 }
 0x307   :  { %v1787_v61 = vmul.f32 %v5639_v25, %v5639_v25  ;;  %v1839_v7 = vadd.f32 %v1838_v59, %v1786_v42  ;;  %v1708_v54 = vadd.f32 %v1707_v50, %v5639_v25 }
 0x308   :  { %v5647_v63 = vpop.f32.mrf.mxu0 }
 0x309   :  { %v1788_v15 = vmul.f32 %v5647_v63, %v5647_v63  ;;  %v1688_v60 = vadd.f32 %v1687_v44, %v5647_v63  ;;  %v1860_v52 = vadd.f32 %v1859_v2, %v1787_v61 }
 0x30a   :  { %v5655_v57 = vpop.f32.mrf.mxu0 }
 0x30b   :  { %v1789_v16 = vmul.f32 %v5655_v57, %v5655_v57  ;;  %v1840_v51 = vadd.f32 %v1839_v7, %v1788_v15  ;;  %v1709_v34 = vadd.f32 %v1708_v54, %v5655_v57 }
 0x30c   :  { %v5663_v17 = vpop.f32.mrf.mxu0 }
 0x30d   :  { %v1790_v46 = vmul.f32 %v5663_v17, %v5663_v17  ;;  %v1689_v32 = vadd.f32 %v1688_v60, %v5663_v17  ;;  %v1861_v18 = vadd.f32 %v1860_v52, %v1789_v16 }
 0x30e   :  { %v5671_v1 = vpop.f32.mrf.mxu0 }
 0x30f   :  { %v1791_v12 = vmul.f32 %v5671_v1, %v5671_v1  ;;  %v1841_v24 = vadd.f32 %v1840_v51, %v1790_v46  ;;  %v1710_v48 = vadd.f32 %v1709_v34, %v5671_v1 }
 0x310   :  { %v5679_v19 = vpop.f32.mrf.mxu0 }
 0x311   :  { %v1792_v30 = vmul.f32 %v5679_v19, %v5679_v19  ;;  %v1690_v58 = vadd.f32 %v1689_v32, %v5679_v19  ;;  %v1862_v3 = vadd.f32 %v1861_v18, %v1791_v12 }
 0x312   :  { %v5687_v55 = vpop.f32.mrf.mxu0 }
 0x313   :  { %v1793_v53 = vmul.f32 %v5687_v55, %v5687_v55  ;;  %v1842_v33 = vadd.f32 %v1841_v24, %v1792_v30  ;;  %v1711_v39 = vadd.f32 %v1710_v48, %v5687_v55 }
 0x314   :  { %v5695_v23 = vpop.f32.mrf.mxu0 }
 0x315   :  { %v1794_v14 = vmul.f32 %v5695_v23, %v5695_v23  ;;  %v1691_v29 = vadd.f32 %v1690_v58, %v5695_v23  ;;  %v1863_v41 = vadd.f32 %v1862_v3, %v1793_v53 }
 0x316   :  { %v5701_v10 = vpop.f32.mrf.mxu0 }
 0x317   :  { %v1795_v27 = vmul.f32 %v5701_v10, %v5701_v10  ;;  %v1843_v47 = vadd.f32 %v1842_v33, %v1794_v14  ;;  %v1712_v42 = vadd.f32 %v1711_v39, %v5701_v10 }
 0x318   :  { %v5707_v0 = vpop.f32.mrf.mxu0 }
 0x319   :  { %v1692_v49 = vadd.f32 %v1691_v29, %v5707_v0  ;;  %v1796_v61 = vmul.f32 %v5707_v0, %v5707_v0  ;;  %v1864_v59 = vadd.f32 %v1863_v41, %v1795_v27 }
 0x31a   :  { %v5713_v50 = vpop.f32.mrf.mxu0 }
 0x31b   :  { %v1693_v44 = vrot.slane %v1692_v49, 4  ;;  %v1844_v15 = vadd.f32 %v1843_v47, %v1796_v61  ;;  %v1713_v2 = vadd.f32 %v1712_v42, %v5713_v50  ;;  %v1797_v16 = vmul.f32 %v5713_v50, %v5713_v50 }
 0x31d   :  { %v1694_v54 = vadd.f32 %v1693_v44, %v1692_v49  ;;  %v1845_v60 = vrot.slane %v1844_v15, 4  ;;  %v1714_v46 = vrot.slane %v1713_v2, 4  ;;  %v1865_v52 = vadd.f32 %v1864_v59, %v1797_v16 }
 0x31f   :  { %v5718_v7 = vpop.f32.mrf.mxu0  ;;  %v1695_v51 = vrot.slane %v1694_v54, 2  ;;  %v1846_v34 = vadd.f32 %v1845_v60, %v1844_v15  ;;  %v1715_v32 = vadd.f32 %v1714_v46, %v1713_v2  ;;  %v1866_v30 = vrot.slane %v1865_v52, 4 }
 0x320   :  { %v1798_v16 = vmul.f32 %v5718_v7, %v5718_v7 }
 0x321   :  { %v5720_v12 = vpop.f32.mrf.mxu0  ;;  %v1696_v53 = vadd.f32 %v1695_v51, %v1694_v54  ;;  %v1847_v24 = vrot.slane %v1846_v34, 2  ;;  %v1716_v48 = vrot.slane %v1715_v32, 2  ;;  %v1867_v58 = vadd.f32 %v1866_v30, %v1865_v52 }
 0x322   :  { %v1799_v54 = vmul.f32 %v5720_v12, %v5720_v12 }
 0x323   :  { %v5722_v18 = vpop.f32.mrf.mxu0  ;;  %v1697_v3 = vrot.slane %v1696_v53, 1  ;;  %v1848_v33 = vadd.f32 %v1847_v24, %v1846_v34  ;;  %v1717_v39 = vadd.f32 %v1716_v48, %v1715_v32  ;;  %v1868_v29 = vrot.slane %v1867_v58, 2 }
 0x324   :  { %7358 = vst [vmem:[#allocation5_spill] sm:$0xff] %v5722_v18  ;;  %v1800_v60 = vmul.f32 %v5722_v18, %v5722_v18  ;;  %v1720_v24 = vadd.f32 %v5722_v18, %v5718_v7 }
 0x325   :  { %v5724_v14 = vpop.f32.mrf.mxu0  ;;  %v1698_v41 = vadd.f32 %v1697_v3, %v1696_v53  ;;  %v1849_v47 = vrot.slane %v1848_v33, 1  ;;  %v1718_v42 = vrot.slane %v1717_v39, 1  ;;  %v1869_v49 = vadd.f32 %v1868_v29, %v1867_v58 }
 0x326   :  { %7359 = vst [vmem:[#allocation6_spill] sm:$0xff] %v5724_v14  ;;  %v1801_v46 = vmul.f32 %v5724_v14, %v5724_v14 }
 0x327   :  { %v5726_v27 = vpop.f32.mrf.mxu0  ;;  %v5730_v59 = vmul.f32 0.0078125, %v1698_v41  ;;  %v1850_v44 = vadd.f32 %v1849_v47, %v1848_v33  ;;  %v1719_v15 = vadd.f32 %v1718_v42, %v1717_v39  ;;  %v1870_v2 = vrot.slane %v1869_v49, 1 }
 0x328   :  { %v1802_v48 = vmul.f32 %v5726_v27, %v5726_v27  ;;  %v1741_v41 = vadd.f32 %v5724_v14, %v5720_v12  ;;  %v1872_v42 = vadd.f32 %v1800_v60, %v1798_v16 }
 0x329   :  { %v5728_v61 = vpop.f32.mrf.mxu0  ;;  %v1914_v51 = vmul.f32 0.0078125, %v1850_v44  ;;  %v1918_v34 = vmul.f32 %v5730_v59, %v5730_v59  ;;  %v5746_v30 = vmul.f32 0.0078125, %v1719_v15  ;;  %v1871_v53 = vadd.f32 %v1870_v2, %v1869_v49 }
 0x32a   :  { %v1803_v58 = vmul.f32 %v5728_v61, %v5728_v61  ;;  %v1893_v49 = vadd.f32 %v1801_v46, %v1799_v54  ;;  %v1873_v20 = vadd.f32 %v1872_v42, %v1802_v48  ;;  %v7369_v48 = vsub.f32 %v5552_v43, %v5730_v59 }
 0x32b   :  { %v5740_v52 = vpop.f32.mrf.mxu0  ;;  %v1922_v33 = vsub.f32 %v1914_v51, %v1918_v34  ;;  %v1919_v39 = vmul.f32 %v5746_v30, %v5746_v30  ;;  %v1915_v47 = vmul.f32 0.0078125, %v1871_v53  ;;  %v1721_v51 = vadd.f32 %v1720_v24, %v5726_v27 }
 0x32c   :  { %v1804_v44 = vmul.f32 %v5740_v52, %v5740_v52  ;;  %v1742_v34 = vadd.f32 %v1741_v41, %v5728_v61  ;;  %v1894_v18 = vadd.f32 %v1893_v49, %v1803_v58  ;;  %v7371_v43 = vsub.f32 %v5713_v50, %v5746_v30 }
 0x32d   :  { %v5754_v3 = vpop.f32.mrf.mxu0  ;;  %v1926_v2 = vmax.f32 %v1922_v33, 0.0  ;;  %v1923_v29 = vsub.f32 %v1915_v47, %v1919_v39  ;;  %v1722_v54 = vadd.f32 %v1721_v51, %v5740_v52 }
 0x32e   :  { %v1805_v32 = vmul.f32 %v5754_v3, %v5754_v3  ;;  %v1743_v60 = vadd.f32 %v1742_v34, %v5754_v3  ;;  %v1874_v24 = vadd.f32 %v1873_v20, %v1804_v44 }
 0x32f   :  { %v5764_v15 = vpop.f32.mrf.mxu0  ;;  %v1994_v16 = vadd.f32 1e-05, %v1926_v2  ;;  %v1927_v53 = vmax.f32 %v1923_v29, 0.0 }
 0x330   :  { %v1806_v46 = vmul.f32 %v5764_v15, %v5764_v15  ;;  %v1895_v58 = vadd.f32 %v1894_v18, %v1805_v32  ;;  %v1723_v39 = vadd.f32 %v1722_v54, %v5764_v15 }
 0x331   :  { %v5770_v14 = vpop.f32.mrf.mxu0  ;;  %4419 = vrsqrt.f32 %v1994_v16  ;;  %v1995_v42 = vadd.f32 1e-05, %v1927_v53  ;;  %v1934_v53 = vsub.f32 %v5566_v40, %v5730_v59 }
 0x332   :  { %v1807_v33 = vmul.f32 %v5770_v14, %v5770_v14  ;;  %v1875_v2 = vadd.f32 %v1874_v24, %v1806_v46  ;;  %v1744_v18 = vadd.f32 %v1743_v60, %v5770_v14  ;;  %v1936_v60 = vsub.f32 %v5570_v5, %v5730_v59 }
 0x333   :  { %v5778_v41 = vpop.f32.mrf.mxu0  ;;  %4421 = vrsqrt.f32 %v1995_v42 }
 0x334   :  { %7360 = vst [vmem:[#allocation7_spill] sm:$0xff] %v5778_v41  ;;  %v1808_v29 = vmul.f32 %v5778_v41, %v5778_v41  ;;  %v1896_v34 = vadd.f32 %v1895_v58, %v1807_v33  ;;  %v1724_v46 = vadd.f32 %v1723_v39, %v5778_v41 }
 0x335   :  { %v5787_v20 = vpop.f32.mrf.mxu0 }
 0x336   :  { %v1809_v32 = vmul.f32 %v5787_v20, %v5787_v20  ;;  %v1876_v33 = vadd.f32 %v1875_v2, %v1808_v29  ;;  %v1745_v58 = vadd.f32 %v1744_v18, %v5787_v20 }
 0x337   :  { %v5798_v16 = vpop.f32.mrf.mxu0 }
 0x338   :  { %7361 = vst [vmem:[#allocation9_spill] sm:$0xff] %v5798_v16  ;;  %v1810_v54 = vmul.f32 %v5798_v16, %v5798_v16  ;;  %v1897_v39 = vadd.f32 %v1896_v34, %v1809_v32  ;;  %v1725_v2 = vadd.f32 %v1724_v46, %v5798_v16 }
 0x339   :  { %v5814_v51 = vpop.f32.mrf.mxu0 }
 0x33a   :  { %7362 = vst [vmem:[#allocation11_spill] sm:$0xff] %v5814_v51  ;;  %v1811_v18 = vmul.f32 %v5814_v51, %v5814_v51  ;;  %v1877_v5 = vadd.f32 %v1876_v33, %v1810_v54  ;;  %v1746_v24 = vadd.f32 %v1745_v58, %v5814_v51 }
 0x33b   :  { %v5827_v42 = vpop.f32.mrf.mxu0 }
 0x33c   :  { %7363 = vst [vmem:[#allocation8_spill] sm:$0xff] %v5827_v42  ;;  %v1812_v34 = vmul.f32 %v5827_v42, %v5827_v42  ;;  %v1898_v33 = vadd.f32 %v1897_v39, %v1811_v18  ;;  %v1726_v40 = vadd.f32 %v1725_v2, %v5827_v42 }
 0x33d   :  { %v5841_v47 = vpop.f32.mrf.mxu0 }
 0x33e   :  { %7364 = vst [vmem:[#allocation10_spill] sm:$0xff] %v5841_v47  ;;  %v1813_v46 = vmul.f32 %v5841_v47, %v5841_v47  ;;  %v1878_v49 = vadd.f32 %v1877_v5, %v1812_v34  ;;  %v5869_v18 = vpop.eup %4419  ;;  %v1747_v54 = vadd.f32 %v1746_v24, %v5841_v47  ;;  %v7367_v5 = vsub.f32 %v5707_v0, %v5730_v59 }
 0x33f   :  { %v5856_v44 = vpop.f32.mrf.mxu0  ;;  %v2002_v2 = vmul.f32 %v5869_v18, %v7369_v48  ;;  %v7370_v0 = vsub.f32 %v5562_v8, %v5730_v59 }
 0x340   :  { %7365 = vst [vmem:[#allocation13_spill] sm:$0xff] %v5856_v44  ;;  %v1814_v29 = vmul.f32 %v5856_v44, %v5856_v44  ;;  %v1899_v32 = vadd.f32 %v1898_v33, %v1813_v46  ;;  %v5882_v34 = vmul.f32 %v5869_v18, %v7367_v5  ;;  %v1727_v39 = vadd.f32 %v1726_v40, %v5856_v44 }
 0x341   :  { %v5872_v16 = vpop.f32.mrf.mxu0  ;;  %v2004_v5 = vmul.f32 %v5869_v18, %v7370_v0  ;;  %v2006_v40 = vmul.f32 %v5869_v18, %v1934_v53  ;;  %v7373_v53 = vsub.f32 %v5557_v45, %v5746_v30  ;;  %v2066_v0 = vmax.f32 %v2002_v2, 0.0 }
 0x342   :  { %7366 = vst [vmem:[#allocation15_spill] sm:$0xff] %v5872_v16  ;;  %v1879_v58 = vadd.f32 %v1878_v49, %v1814_v29  ;;  %v1815_v24 = vmul.f32 %v5872_v16, %v5872_v16  ;;  %v1748_v46 = vadd.f32 %v1747_v54, %v5872_v16  ;;  %v5899_v49 = vpop.eup %4421  ;;  %v2008_v16 = vmul.f32 %v5869_v18, %v1936_v60 }
 0x343   :  { %v5888_v33 = vpop.f32.mrf.mxu0  ;;  %v5909_v48 = vmul.f32 %v5899_v49, %v7371_v43  ;;  %v2068_v43 = vmax.f32 %v2004_v5, 0.0  ;;  %v7375_v45 = vsub.f32 %v5568_v9, %v5746_v30  ;;  %v2070_v9 = vmax.f32 %v2006_v40, 0.0 }
 0x344   :  { %7368 = vst [vmem:[#allocation12_spill] sm:$0xff] %v5888_v33  ;;  %v1900_v29 = vadd.f32 %v1899_v32, %v1815_v24  ;;  %v1728_v44 = vadd.f32 %v1727_v39, %v5888_v33  ;;  %v1816_v54 = vmul.f32 %v5888_v33, %v5888_v33  ;;  %v2003_v32 = vmul.f32 %v5899_v49, %v7373_v53 }
 0x345   :  { %v5911_v8 = vpop.f32.mrf.mxu0  ;;  %v7374_v39 = vsub.f32 %v5564_v56, %v5746_v30  ;;  %v2007_v53 = vmul.f32 %v5899_v49, %v7375_v45  ;;  %v7376_v56 = vsub.f32 %v5572_v11, %v5746_v30 }
 0x346   :  { %7372 = vst [vmem:[#allocation14_spill] sm:$0xff] %v5911_v8  ;;  %v1880_v60 = vadd.f32 %v1879_v58, %v1816_v54  ;;  %v1749_v33 = vadd.f32 %v1748_v46, %v5911_v8  ;;  %v1817_v50 = vmul.f32 %v5911_v8, %v5911_v8  ;;  %v2067_v47 = vmax.f32 %v2003_v32, 0.0 }
 0x347   :  { %v2005_v24 = vmul.f32 %v5899_v49, %v7374_v39  ;;  %v5924_v42 = vpop.f32.mrf.mxu0  ;;  %v2009_v58 = vmul.f32 %v5899_v49, %v7376_v56  ;;  %v2130_v54 = vpack.c.bf16 %v2068_v43, %v2066_v0  ;;  %v2072_v56 = vmax.f32 %v2008_v16, 0.0 }
 0x348   :  { %v1901_v2 = vadd.f32 %v1900_v29, %v1817_v50  ;;  %v1729_v46 = vadd.f32 %v1728_v44, %v5924_v42  ;;  %v1818_v5 = vmul.f32 %v5924_v42, %v5924_v42  ;;  %v7377_v0 = vsub.f32 %v5576_v6, %v5746_v30 }
 0x349   :  { %v2069_v51 = vmax.f32 %v2005_v24, 0.0  ;;  %v5937_v39 = vpop.f32.mrf.mxu0  ;;  %v2071_v24 = vmax.f32 %v2007_v53, 0.0  ;;  %v2073_v8 = vmax.f32 %v2009_v58, 0.0  ;;  %v2132_v6 = vpack.c.bf16 %v2072_v56, %v2070_v9 }
 0x34a   :  { %v1881_v41 = vadd.f32 %v1880_v60, %v1818_v5  ;;  %v1750_v45 = vadd.f32 %v1749_v33, %v5937_v39  ;;  %v1819_v11 = vmul.f32 %v5937_v39, %v5937_v39  ;;  %v2011_v50 = vmul.f32 %v5899_v49, %v7377_v0 }
 0x34b   :  { %v2131_v32 = vpack.c.bf16 %v2069_v51, %v2067_v47  ;;  %v5942_v29 = vpop.f32.mrf.mxu0  ;;  %v2133_v44 = vpack.c.bf16 %v2073_v8, %v2071_v24  ;;  %v7378_v47 = vsub.f32 %v5580_v62, %v5746_v30  ;;  %v7379_v33 = vsub.f32 %v5574_v21, %v5730_v59 }
 0x34c   :  { %v1902_v16 = vadd.f32 %v1901_v2, %v1819_v11  ;;  %v1730_v60 = vadd.f32 %v1729_v46, %v5942_v29  ;;  %v1820_v8 = vmul.f32 %v5942_v29, %v5942_v29  ;;  %v2075_v53 = vmax.f32 %v2011_v50, 0.0 }
 0x34d   :  { %2386 = vmatprep.mubr.bf16.mxu1 %v2131_v32  ;;  %v2013_v51 = vmul.f32 %v5899_v49, %v7378_v47  ;;  %v2010_v40 = vmul.f32 %v5869_v18, %v7379_v33  ;;  %v5959_v43 = vpop.f32.mrf.mxu0  ;;  %v7380_v58 = vsub.f32 %v5578_v28, %v5730_v59  ;;  %v7382_v28 = vsub.f32 %v5588_v26, %v5746_v30 }
 0x34e   :  { %2387 = vmatmul.mubr.bf16.vlgmr.msra.gmra.mxu1 %v2130_v54  ;;  %v1882_v32 = vadd.f32 %v1881_v41, %v1820_v8  ;;  %v1751_v2 = vadd.f32 %v1750_v45, %v5959_v43  ;;  %v1821_v46 = vmul.f32 %v5959_v43, %v5959_v43  ;;  %v7381_v54 = vsub.f32 %v5584_v22, %v5746_v30 }
 0x34f   :  { %2396 = vmatprep.mubr.bf16.mxu1 %v2133_v44  ;;  %v2077_v62 = vmax.f32 %v2013_v51, 0.0  ;;  %v2012_v21 = vmul.f32 %v5869_v18, %v7380_v58  ;;  %v2074_v5 = vmax.f32 %v2010_v40, 0.0  ;;  %v5972_v9 = vpop.f32.mrf.mxu0  ;;  %v2017_v44 = vmul.f32 %v5899_v49, %v7382_v28 }
 0x350   :  { %v2015_v24 = vmul.f32 %v5899_v49, %v7381_v54  ;;  %v7383_v41 = vsub.f32 %v5582_v4, %v5730_v59  ;;  %v1903_v0 = vadd.f32 %v1902_v16, %v1821_v46  ;;  %v1731_v50 = vadd.f32 %v1730_v60, %v5972_v9 }
 0x351   :  { %v2135_v11 = vpack.c.bf16 %v2077_v62, %v2075_v53  ;;  %v2076_v56 = vmax.f32 %v2012_v21, 0.0  ;;  %v1822_v22 = vmul.f32 %v5972_v9, %v5972_v9  ;;  %v5985_v51 = vpop.f32.mrf.mxu0  ;;  %v2081_v40 = vmax.f32 %v2017_v44, 0.0 }
 0x352   :  { %v2014_v45 = vmul.f32 %v5869_v18, %v7383_v41  ;;  %v2079_v47 = vmax.f32 %v2015_v24, 0.0  ;;  %v7384_v26 = vsub.f32 %v5586_v13, %v5730_v59  ;;  %v1752_v62 = vadd.f32 %v1751_v2, %v5985_v51 }
 0x353   :  { %v2134_v33 = vpack.c.bf16 %v2076_v56, %v2074_v5  ;;  %v1883_v4 = vadd.f32 %v1882_v32, %v1822_v22  ;;  %v1823_v16 = vmul.f32 %v5985_v51, %v5985_v51  ;;  %v7385_v60 = vsub.f32 %v5606_v36, %v5746_v30  ;;  %v5998_v21 = vpop.f32.mrf.mxu0 }
 0x354   :  { %v2016_v8 = vmul.f32 %v5869_v18, %v7384_v26  ;;  %v2078_v53 = vmax.f32 %v2014_v45, 0.0  ;;  %v2137_v5 = vpack.c.bf16 %v2081_v40, %v2079_v47  ;;  %v7386_v13 = vsub.f32 %v5623_v31, %v5746_v30 }
 0x355   :  { %v2019_v58 = vmul.f32 %v5899_v49, %v7385_v60  ;;  %v7387_v32 = vsub.f32 %v5594_v37, %v5730_v59  ;;  %v1904_v24 = vadd.f32 %v1903_v0, %v1823_v16  ;;  %v1732_v56 = vadd.f32 %v1731_v50, %v5998_v21  ;;  %v6011_v44 = vpop.f32.mrf.mxu0 }
 0x356   :  { %v2080_v46 = vmax.f32 %v2016_v8, 0.0  ;;  %v2021_v54 = vmul.f32 %v5899_v49, %v7386_v13  ;;  %v1824_v36 = vmul.f32 %v5998_v21, %v5998_v21  ;;  %2397 = vmatmul.mubr.bf16.gmra.mxu1 %v2132_v6  ;;  %v7388_v45 = vsub.f32 %v5615_v35, %v5730_v59 }
 0x357   :  { %v2018_v2 = vmul.f32 %v5869_v18, %v7387_v32  ;;  %v2083_v28 = vmax.f32 %v2019_v58, 0.0  ;;  %2406 = vmatprep.mubr.bf16.mxu1 %v2135_v11  ;;  %v1753_v50 = vadd.f32 %v1752_v62, %v6011_v44  ;;  %v1825_v47 = vmul.f32 %v6011_v44, %v6011_v44  ;;  %v6026_v40 = vpop.f32.mrf.mxu0 }
 0x358   :  { %v6013_v41 = vpack.c.bf16 %v2080_v46, %v2078_v53  ;;  %v2085_v31 = vmax.f32 %v2021_v54, 0.0  ;;  %v2020_v37 = vmul.f32 %v5869_v18, %v7388_v45  ;;  %v1884_v0 = vadd.f32 %v1883_v4, %v1824_v36 }
 0x359   :  { %v2082_v22 = vmax.f32 %v2018_v2, 0.0  ;;  %v7389_v6 = vsub.f32 %v5639_v25, %v5746_v30  ;;  %v7390_v35 = vsub.f32 %v5655_v57, %v5746_v30  ;;  %v7391_v4 = vsub.f32 %v5631_v38, %v5730_v59  ;;  %v6039_v46 = vpop.f32.mrf.mxu0 }
 0x35a   :  { %v2139_v26 = vpack.c.bf16 %v2085_v31, %v2083_v28  ;;  %v2084_v8 = vmax.f32 %v2020_v37, 0.0  ;;  %v1905_v16 = vadd.f32 %v1904_v24, %v1825_v47  ;;  %v1733_v60 = vadd.f32 %v1732_v56, %v6026_v40 }
 0x35b   :  { %v2023_v11 = vmul.f32 %v5899_v49, %v7389_v6  ;;  %v2025_v53 = vmul.f32 %v5899_v49, %v7390_v35  ;;  %v2022_v62 = vmul.f32 %v5869_v18, %v7391_v4  ;;  %v1826_v25 = vmul.f32 %v6026_v40, %v6026_v40  ;;  %v6054_v31 = vpop.f32.mrf.mxu0 }
 0x35c   :  { %v6041_v13 = vpack.c.bf16 %v2084_v8, %v2082_v22  ;;  %v7392_v57 = vsub.f32 %v5647_v63, %v5730_v59  ;;  %v1754_v24 = vadd.f32 %v1753_v50, %v6039_v46  ;;  %v1827_v56 = vmul.f32 %v6039_v46, %v6039_v46 }
 0x35d   :  { %v2087_v58 = vmax.f32 %v2023_v11, 0.0  ;;  %v2089_v54 = vmax.f32 %v2025_v53, 0.0  ;;  %v2086_v38 = vmax.f32 %v2022_v62, 0.0  ;;  %v1885_v2 = vadd.f32 %v1884_v0, %v1826_v25  ;;  %v6067_v8 = vpop.f32.mrf.mxu0 }
 0x35e   :  { %v2024_v32 = vmul.f32 %v5869_v18, %v7392_v57  ;;  %v7393_v36 = vsub.f32 %v5671_v1, %v5746_v30  ;;  %v7394_v63 = vsub.f32 %v5687_v55, %v5746_v30  ;;  %v7395_v0 = vsub.f32 %v5663_v17, %v5730_v59  ;;  %2407 = vmatmul.mubr.bf16.gmra.mxu1 %v2134_v33 }
 0x35f   :  { %v2141_v45 = vpack.c.bf16 %v2089_v54, %v2087_v58  ;;  %v1906_v47 = vadd.f32 %v1905_v16, %v1827_v56  ;;  %v1734_v6 = vadd.f32 %v1733_v60, %v6054_v31  ;;  %v1828_v1 = vmul.f32 %v6054_v31, %v6054_v31  ;;  %2416 = vmatprep.mubr.bf16.mxu1 %v2137_v5 }
 0x360   :  { %v2027_v28 = vmul.f32 %v5899_v49, %v7393_v36  ;;  %v2088_v37 = vmax.f32 %v2024_v32, 0.0  ;;  %v2029_v22 = vmul.f32 %v5899_v49, %v7394_v63  ;;  %v2026_v50 = vmul.f32 %v5869_v18, %v7395_v0 }
 0x361   :  { %v7396_v53 = vsub.f32 %v5679_v19, %v5730_v59  ;;  %v1735_v62 = vrot.slane %v1734_v6, 4  ;;  %v1886_v16 = vadd.f32 %v1885_v2, %v1828_v1  ;;  %v1755_v60 = vadd.f32 %v1754_v24, %v6067_v8 }
 0x362   :  { %v2091_v11 = vmax.f32 %v2027_v28, 0.0  ;;  %v2140_v35 = vpack.c.bf16 %v2088_v37, %v2086_v38  ;;  %v2093_v55 = vmax.f32 %v2029_v22, 0.0  ;;  %v2090_v4 = vmax.f32 %v2026_v50, 0.0 }
 0x363   :  { %v2028_v17 = vmul.f32 %v5869_v18, %v7396_v53  ;;  %v1829_v25 = vmul.f32 %v6067_v8, %v6067_v8  ;;  %v7397_v5 = vsub.f32 %v5701_v10, %v5746_v30  ;;  %v2097_v57 = vmax.f32 %v5909_v48, 0.0 }
 0x364   :  { %v2143_v33 = vpack.c.bf16 %v2093_v55, %v2091_v11  ;;  %v1736_v19 = vadd.f32 %v1735_v62, %v1734_v6  ;;  %v1887_v32 = vrot.slane %v1886_v16, 4  ;;  %v1756_v38 = vrot.slane %v1755_v60, 4 }
 0x365   :  { %v2092_v58 = vmax.f32 %v2028_v17, 0.0  ;;  %v2031_v54 = vmul.f32 %v5899_v49, %v7397_v5  ;;  %v1907_v56 = vadd.f32 %v1906_v47, %v1829_v25  ;;  %v2096_v2 = vmax.f32 %v5882_v34, 0.0 }
 0x366   :  { %v7398_v28 = vsub.f32 %v5695_v23, %v5730_v59  ;;  %v1737_v63 = vrot.slane %v1736_v19, 2  ;;  %v1888_v22 = vadd.f32 %v1887_v32, %v1886_v16  ;;  %v1757_v10 = vadd.f32 %v1756_v38, %v1755_v60  ;;  %2417 = vmatmul.mubr.bf16.gmra.mxu1 %v6013_v41 }
 0x367   :  { %v2142_v36 = vpack.c.bf16 %v2092_v58, %v2090_v4  ;;  %v2095_v24 = vmax.f32 %v2031_v54, 0.0  ;;  %v1908_v30 = vrot.slane %v1907_v56, 4  ;;  %2426 = vmatprep.mubr.bf16.mxu1 %v2139_v26 }
 0x368   :  { %v2030_v37 = vmul.f32 %v5869_v18, %v7398_v28  ;;  %v1738_v48 = vadd.f32 %v1737_v63, %v1736_v19  ;;  %v1889_v50 = vrot.slane %v1888_v22, 2  ;;  %v1758_v6 = vrot.slane %v1757_v10, 2 }
 0x369   :  { %v2145_v49 = vpack.c.bf16 %v2097_v57, %v2095_v24  ;;  %v1909_v1 = vadd.f32 %v1908_v30, %v1907_v56  ;;  %v7400_v30 = vld [vmem:[#allocation6_spill] sm:$0xff] }
 0x36a   :  { %v2094_v0 = vmax.f32 %v2030_v37, 0.0  ;;  %v1739_v47 = vrot.slane %v1738_v48, 1  ;;  %v1890_v11 = vadd.f32 %v1889_v50, %v1888_v22  ;;  %v1759_v23 = vadd.f32 %v1758_v6, %v1757_v10 }
 0x36b   :  { %v1910_v59 = vrot.slane %v1909_v1, 2 }
 0x36c   :  { %v6087_v34 = vpack.c.bf16 %v2096_v2, %v2094_v0  ;;  %v1740_v18 = vadd.f32 %v1739_v47, %v1738_v48  ;;  %v1891_v55 = vrot.slane %v1890_v11, 1  ;;  %v1760_v53 = vrot.slane %v1759_v23, 1 }
 0x36d   :  { %v1911_v17 = vadd.f32 %v1910_v59, %v1909_v1 }
 0x36e   :  { %v6089_v4 = vmul.f32 0.0078125, %v1740_v18  ;;  %v1892_v62 = vadd.f32 %v1891_v55, %v1890_v11  ;;  %v1761_v16 = vadd.f32 %v1760_v53, %v1759_v23  ;;  %2427 = vmatmul.mubr.bf16.gmra.mxu1 %v6041_v13  ;;  %v7408_v18 = vld [vmem:[#allocation13_spill] sm:$0xff] }
 0x36f   :  { %v1912_v60 = vrot.slane %v1911_v17, 1  ;;  %2436 = vmatprep.mubr.bf16.mxu1 %v2141_v45 }
 0x370   :  { %v1916_v25 = vmul.f32 0.0078125, %v1892_v62  ;;  %v1920_v41 = vmul.f32 %v6089_v4, %v6089_v4  ;;  %v1992_v26 = vsub.f32 %v6054_v31, %v6089_v4  ;;  %v6095_v58 = vmul.f32 0.0078125, %v1761_v16 }
 0x371   :  { %v1913_v5 = vadd.f32 %v1912_v60, %v1911_v17  ;;  %v1986_v31 = vsub.f32 %v5972_v9, %v6089_v4  ;;  %v1988_v13 = vsub.f32 %v5998_v21, %v6089_v4  ;;  %v1990_v28 = vsub.f32 %v6026_v40, %v6089_v4  ;;  %v7409_v17 = vld [vmem:[#allocation12_spill] sm:$0xff] }
 0x372   :  { %v1924_v54 = vsub.f32 %v1916_v25, %v1920_v41  ;;  %v1921_v57 = vmul.f32 %v6095_v58, %v6095_v58  ;;  %v1991_v45 = vsub.f32 %v6039_v46, %v6095_v58  ;;  %v1993_v37 = vsub.f32 %v6067_v8, %v6095_v58 }
 0x373   :  { %v1917_v19 = vmul.f32 0.0078125, %v1913_v5  ;;  %v1966_v22 = vsub.f32 %v5726_v27, %v6089_v4  ;;  %v1963_v10 = vsub.f32 %v5720_v12, %v6095_v58  ;;  %v1965_v0 = vsub.f32 %v7400_v30, %v6095_v58 }
 0x374   :  { %v1928_v32 = vmax.f32 %v1924_v54, 0.0  ;;  %v1967_v8 = vsub.f32 %v5728_v61, %v6095_v58  ;;  %v1971_v48 = vsub.f32 %v5770_v14, %v6095_v58  ;;  %v1973_v27 = vsub.f32 %v5787_v20, %v6095_v58  ;;  %v7402_v61 = vld [vmem:[#allocation11_spill] sm:$0xff]  ;;  %v7405_v14 = vld [vmem:[#allocation8_spill] sm:$0xff] }
 0x375   :  { %v1925_v38 = vsub.f32 %v1917_v19, %v1921_v57  ;;  %v1970_v12 = vsub.f32 %v5764_v15, %v6089_v4  ;;  %v1975_v6 = vsub.f32 %v7402_v61, %v6095_v58  ;;  %v1976_v11 = vsub.f32 %v7405_v14, %v6089_v4  ;;  %v7406_v20 = vld [vmem:[#allocation15_spill] sm:$0xff]  ;;  %v7407_v15 = vld [vmem:[#allocation14_spill] sm:$0xff] }
 0x376   :  { %v1996_v56 = vadd.f32 1e-05, %v1928_v32  ;;  %2437 = vmatmul.mubr.bf16.gmra.mxu1 %v2140_v35  ;;  %v1962_v35 = vsub.f32 %v5718_v7, %v6089_v4  ;;  %v1968_v7 = vsub.f32 %v5740_v52, %v6089_v4  ;;  %v7404_v52 = vld [vmem:[#allocation9_spill] sm:$0xff]  ;;  %v1979_v23 = vsub.f32 %v7406_v20, %v6095_v58 }
 0x377   :  { %v1929_v2 = vmax.f32 %v1925_v38, 0.0  ;;  %2446 = vmatprep.mubr.bf16.mxu1 %v2143_v33  ;;  %v7399_v33 = vld [vmem:[#allocation5_spill] sm:$0xff]  ;;  %v1974_v47 = vsub.f32 %v7404_v52, %v6089_v4  ;;  %v1981_v59 = vsub.f32 %v7407_v15, %v6095_v58  ;;  %v1978_v55 = vsub.f32 %v7408_v18, %v6089_v4 }
 0x378   :  { %4423 = vrsqrt.f32 %v1996_v56  ;;  %v1964_v63 = vsub.f32 %v7399_v33, %v6089_v4  ;;  %v1980_v62 = vsub.f32 %v7409_v17, %v6089_v4  ;;  %v1983_v16 = vsub.f32 %v5937_v39, %v6095_v58 }
 0x379   :  { %v1997_v24 = vadd.f32 1e-05, %v1929_v2  ;;  %v1985_v60 = vsub.f32 %v5959_v43, %v6095_v58  ;;  %v1982_v25 = vsub.f32 %v5924_v42, %v6089_v4  ;;  %v1984_v39 = vsub.f32 %v5942_v29, %v6089_v4 }
 0x37a   :  { %v1987_v43 = vsub.f32 %v5985_v51, %v6095_v58  ;;  %v1989_v42 = vsub.f32 %v6011_v44, %v6095_v58 }
 0x37b   :  { %4425 = vrsqrt.f32 %v1997_v24 }
 0x37e   :  { %2447 = vmatmul.mubr.bf16.gmra.mxu1 %v2142_v36  ;;  %v1969_v36 = vsub.f32 %v5754_v3, %v6095_v58  ;;  %v7403_v3 = vld [vmem:[#allocation10_spill] sm:$0xff] }
 0x37f   :  { %2456 = vmatprep.mubr.bf16.mxu1 %v2145_v49  ;;  %v7401_v49 = vld [vmem:[#allocation7_spill] sm:$0xff]  ;;  %v1977_v1 = vsub.f32 %v7403_v3, %v6095_v58 }
 0x380   :  { %v1972_v50 = vsub.f32 %v7401_v49, %v6089_v4 }
 0x385   :  { %v6148_v53 = vpop.eup %4423 }
 0x386   :  { %v6159_v41 = vmul.f32 %v6148_v53, %v1992_v26  ;;  %v2034_v5 = vmul.f32 %v6148_v53, %v1962_v35  ;;  %v2036_v54 = vmul.f32 %v6148_v53, %v1964_v63  ;;  %v2038_v57 = vmul.f32 %v6148_v53, %v1966_v22  ;;  %2457 = vmatmul.mubr.bf16.gmra.mxu1 %v6087_v34 }
 0x387   :  { %v2040_v19 = vmul.f32 %v6148_v53, %v1968_v7  ;;  %v6175_v38 = vmul.f32 %v6148_v53, %v1970_v12  ;;  %v6178_v56 = vmul.f32 %v6148_v53, %v1972_v50  ;;  %v2046_v2 = vmul.f32 %v6148_v53, %v1974_v47 }
 0x388   :  { %v6171_v32 = vpop.eup %4425  ;;  %v2098_v26 = vmax.f32 %v2034_v5, 0.0  ;;  %v2100_v24 = vmax.f32 %v2036_v54, 0.0  ;;  %v2102_v33 = vmax.f32 %v2038_v57, 0.0  ;;  %v2128_v49 = vmax.f32 %v6159_v41, 0.0 }
 0x389   :  { %v2035_v29 = vmul.f32 %v6171_v32, %v1963_v10  ;;  %v2037_v51 = vmul.f32 %v6171_v32, %v1965_v0  ;;  %v2039_v44 = vmul.f32 %v6171_v32, %v1967_v8  ;;  %v2041_v35 = vmul.f32 %v6171_v32, %v1969_v36 }
 0x38a   :  { %v2104_v34 = vmax.f32 %v2040_v19, 0.0  ;;  %v2043_v63 = vmul.f32 %v6171_v32, %v1971_v48  ;;  %v2045_v12 = vmul.f32 %v6171_v32, %v1973_v27  ;;  %v2065_v10 = vmul.f32 %v6171_v32, %v1993_v37 }
 0x38b   :  { %v2099_v22 = vmax.f32 %v2035_v29, 0.0  ;;  %v2101_v30 = vmax.f32 %v2037_v51, 0.0  ;;  %v2103_v7 = vmax.f32 %v2039_v44, 0.0  ;;  %v2105_v50 = vmax.f32 %v2041_v35, 0.0 }
 0x38c   :  { %v2107_v0 = vmax.f32 %v2043_v63, 0.0  ;;  %v2146_v3 = vpack.c.bf16 %v2100_v24, %v2098_v26  ;;  %v2109_v8 = vmax.f32 %v2045_v12, 0.0  ;;  %v2047_v36 = vmul.f32 %v6171_v32, %v1975_v6 }
 0x38d   :  { %v2147_v61 = vpack.c.bf16 %v2101_v30, %v2099_v22  ;;  %v2148_v52 = vpack.c.bf16 %v2104_v34, %v2102_v33  ;;  %v2049_v47 = vmul.f32 %v6171_v32, %v1977_v1  ;;  %v2048_v48 = vmul.f32 %v6148_v53, %v1976_v11 }
 0x38e   :  { %v2110_v14 = vmax.f32 %v2046_v2, 0.0  ;;  %v2149_v20 = vpack.c.bf16 %v2105_v50, %v2103_v7  ;;  %v2151_v27 = vpack.c.bf16 %v2109_v8, %v2107_v0  ;;  %v2111_v15 = vmax.f32 %v2047_v36, 0.0 }
 0x38f   :  { %2466 = vmatprep.mubr.bf16.mxu1 %v2147_v61  ;;  %v2051_v18 = vmul.f32 %v6171_v32, %v1979_v23  ;;  %v2113_v37 = vmax.f32 %v2049_v47, 0.0  ;;  %v2112_v17 = vmax.f32 %v2048_v48, 0.0  ;;  %v2053_v41 = vmul.f32 %v6171_v32, %v1981_v59 }
 0x390   :  { %2467 = vmatmul.mubr.bf16.gmra.mxu1 %v2146_v3  ;;  %v2050_v5 = vmul.f32 %v6148_v53, %v1978_v55  ;;  %v2052_v1 = vmul.f32 %v6148_v53, %v1980_v62  ;;  %v2055_v11 = vmul.f32 %v6171_v32, %v1983_v16  ;;  %v2057_v54 = vmul.f32 %v6171_v32, %v1985_v60 }
 0x391   :  { %2476 = vmatprep.mubr.bf16.mxu1 %v2149_v20  ;;  %v2115_v6 = vmax.f32 %v2051_v18, 0.0  ;;  %v2153_v57 = vpack.c.bf16 %v2113_v37, %v2111_v15  ;;  %v2152_v19 = vpack.c.bf16 %v2112_v17, %v2110_v14  ;;  %v2117_v26 = vmax.f32 %v2053_v41, 0.0 }
 0x392   :  { %v2114_v2 = vmax.f32 %v2050_v5, 0.0  ;;  %v2116_v23 = vmax.f32 %v2052_v1, 0.0  ;;  %v2119_v29 = vmax.f32 %v2055_v11, 0.0  ;;  %v2121_v51 = vmax.f32 %v2057_v54, 0.0 }
 0x393   :  { %v2054_v24 = vmul.f32 %v6148_v53, %v1982_v25  ;;  %v2155_v59 = vpack.c.bf16 %v2117_v26, %v2115_v6  ;;  %v2056_v55 = vmul.f32 %v6148_v53, %v1984_v39  ;;  %v2059_v44 = vmul.f32 %v6171_v32, %v1987_v43 }
 0x394   :  { %v2061_v62 = vmul.f32 %v6171_v32, %v1989_v42  ;;  %v2154_v35 = vpack.c.bf16 %v2116_v23, %v2114_v2  ;;  %v2157_v16 = vpack.c.bf16 %v2121_v51, %v2119_v29  ;;  %v2058_v60 = vmul.f32 %v6148_v53, %v1986_v31 }
 0x395   :  { %v2118_v33 = vmax.f32 %v2054_v24, 0.0  ;;  %v2120_v34 = vmax.f32 %v2056_v55, 0.0  ;;  %v2123_v63 = vmax.f32 %v2059_v44, 0.0  ;;  %v2060_v25 = vmul.f32 %v6148_v53, %v1988_v13 }
 0x396   :  { %v2125_v22 = vmax.f32 %v2061_v62, 0.0  ;;  %v2122_v39 = vmax.f32 %v2058_v60, 0.0  ;;  %v2063_v43 = vmul.f32 %v6171_v32, %v1991_v45  ;;  %v2129_v42 = vmax.f32 %v2065_v10, 0.0 }
 0x397   :  { %v2062_v9 = vmul.f32 %v6148_v53, %v1990_v28  ;;  %v2156_v31 = vpack.c.bf16 %v2120_v34, %v2118_v33  ;;  %v2124_v7 = vmax.f32 %v2060_v25, 0.0  ;;  %v2106_v13 = vmax.f32 %v6175_v38, 0.0 }
 0x398   :  { %2477 = vmatmul.mubr.bf16.gmra.mxu1 %v2148_v52  ;;  %v2159_v30 = vpack.c.bf16 %v2125_v22, %v2123_v63  ;;  %v2127_v21 = vmax.f32 %v2063_v43, 0.0  ;;  %v2108_v50 = vmax.f32 %v6178_v56, 0.0 }
 0x399   :  { %2486 = vmatprep.mubr.bf16.mxu1 %v2151_v27  ;;  %v2126_v12 = vmax.f32 %v2062_v9, 0.0  ;;  %v2158_v46 = vpack.c.bf16 %v2124_v7, %v2122_v39 }
 0x39a   :  { %v2161_v58 = vpack.c.bf16 %v2129_v42, %v2127_v21  ;;  %v2150_v32 = vpack.c.bf16 %v2108_v50, %v2106_v13 }
 0x39b   :  { %v2160_v45 = vpack.c.bf16 %v2128_v49, %v2126_v12 }
 0x3a0   :  { %2487 = vmatmul.mubr.bf16.gmra.mxu1 %v2150_v32 }
 0x3a1   :  { %2496 = vmatprep.mubr.bf16.mxu1 %v2153_v57 }
 0x3a8   :  { %2497 = vmatmul.mubr.bf16.gmra.mxu1 %v2152_v19 }
 0x3a9   :  { %2506 = vmatprep.mubr.bf16.mxu1 %v2155_v59 }
 0x3b0   :  { %2507 = vmatmul.mubr.bf16.gmra.mxu1 %v2154_v35 }
 0x3b1   :  { %2516 = vmatprep.mubr.bf16.mxu1 %v2157_v16 }
 0x3b8   :  { %2517 = vmatmul.mubr.bf16.gmra.mxu1 %v2156_v31 }
 0x3b9   :  { %2526 = vmatprep.mubr.bf16.mxu1 %v2159_v30 }
 0x3c0   :  { %2527 = vmatmul.mubr.bf16.gmra.mxu1 %v2158_v46 }
 0x3c1   :  { %2536 = vmatprep.mubr.bf16.mxu1 %v2161_v58 }
 0x3c8   :  { %2537 = vmatmul.mubr.bf16.gmra.mxu1 %v2160_v45 }
 0x40e   :  { %v6220_v40 = vpop.f32.mrf.mxu1 }
 0x40f   :  { %v2635_v15 = vmul.f32 %v6220_v40, %v6220_v40 }
 0x410   :  { %v6222_v4 = vpop.f32.mrf.mxu1 }
 0x411   :  { %v2636_v17 = vmul.f32 %v6222_v4, %v6222_v4 }
 0x412   :  { %v6224_v28 = vpop.f32.mrf.mxu1 }
 0x413   :  { %v2637_v14 = vmul.f32 %v6224_v28, %v6224_v28  ;;  %v2547_v18 = vadd.f32 %v6224_v28, %v6220_v40 }
 0x414   :  { %v6226_v53 = vpop.f32.mrf.mxu1 }
 0x415   :  { %v2638_v20 = vmul.f32 %v6226_v53, %v6226_v53  ;;  %v2699_v6 = vadd.f32 %v2637_v14, %v2635_v15  ;;  %v2568_v1 = vadd.f32 %v6226_v53, %v6222_v4 }
 0x416   :  { %v6228_v38 = vpop.f32.mrf.mxu1 }
 0x417   :  { %v2639_v37 = vmul.f32 %v6228_v38, %v6228_v38  ;;  %v2548_v11 = vadd.f32 %v2547_v18, %v6228_v38  ;;  %v2720_v57 = vadd.f32 %v2638_v20, %v2636_v17 }
 0x418   :  { %v6230_v56 = vpop.f32.mrf.mxu1 }
 0x419   :  { %v2640_v41 = vmul.f32 %v6230_v56, %v6230_v56  ;;  %v2700_v2 = vadd.f32 %v2699_v6, %v2639_v37  ;;  %v2569_v23 = vadd.f32 %v2568_v1, %v6230_v56 }
 0x41a   :  { %v6232_v49 = vpop.f32.mrf.mxu1 }
 0x41b   :  { %v2641_v54 = vmul.f32 %v6232_v49, %v6232_v49  ;;  %v2549_v29 = vadd.f32 %v2548_v11, %v6232_v49  ;;  %v2721_v24 = vadd.f32 %v2720_v57, %v2640_v41 }
 0x41c   :  { %v6234_v10 = vpop.f32.mrf.mxu1 }
 0x41d   :  { %v2642_v19 = vmul.f32 %v6234_v10, %v6234_v10  ;;  %v2701_v44 = vadd.f32 %v2700_v2, %v2641_v54  ;;  %v2570_v62 = vadd.f32 %v2569_v23, %v6234_v10 }
 0x41e   :  { %v6236_v0 = vpop.f32.mrf.mxu1 }
 0x41f   :  { %v2643_v51 = vmul.f32 %v6236_v0, %v6236_v0  ;;  %v2550_v35 = vadd.f32 %v2549_v29, %v6236_v0  ;;  %v2722_v33 = vadd.f32 %v2721_v24, %v2642_v19 }
 0x420   :  { %v6238_v61 = vpop.f32.mrf.mxu1 }
 0x421   :  { %v2644_v59 = vmul.f32 %v6238_v61, %v6238_v61  ;;  %v2702_v63 = vadd.f32 %v2701_v44, %v2643_v51  ;;  %v2571_v22 = vadd.f32 %v2570_v62, %v6238_v61 }
 0x422   :  { %v6240_v3 = vpop.f32.mrf.mxu1 }
 0x423   :  { %v2645_v16 = vmul.f32 %v6240_v3, %v6240_v3  ;;  %v2551_v25 = vadd.f32 %v2550_v35, %v6240_v3  ;;  %v2723_v43 = vadd.f32 %v2722_v33, %v2644_v59 }
 0x424   :  { %v6242_v8 = vpop.f32.mrf.mxu1 }
 0x425   :  { %v2646_v60 = vmul.f32 %v6242_v8, %v6242_v8  ;;  %v2703_v31 = vadd.f32 %v2702_v63, %v2645_v16  ;;  %v2572_v30 = vadd.f32 %v2571_v22, %v6242_v8 }
 0x426   :  { %v6244_v36 = vpop.f32.mrf.mxu1 }
 0x427   :  { %v2647_v39 = vmul.f32 %v6244_v36, %v6244_v36  ;;  %v2552_v7 = vadd.f32 %v2551_v25, %v6244_v36  ;;  %v2724_v12 = vadd.f32 %v2723_v43, %v2646_v60 }
 0x428   :  { %v6246_v52 = vpop.f32.mrf.mxu1 }
 0x429   :  { %v2648_v42 = vmul.f32 %v6246_v52, %v6246_v52  ;;  %v2704_v46 = vadd.f32 %v2703_v31, %v2647_v39  ;;  %v2573_v58 = vadd.f32 %v2572_v30, %v6246_v52 }
 0x42a   :  { %v6248_v47 = vpop.f32.mrf.mxu1 }
 0x42b   :  { %v2649_v21 = vmul.f32 %v6248_v47, %v6248_v47  ;;  %v2553_v45 = vadd.f32 %v2552_v7, %v6248_v47  ;;  %v2725_v14 = vadd.f32 %v2724_v12, %v2648_v42 }
 0x42c   :  { %v6250_v48 = vpop.f32.mrf.mxu1 }
 0x42d   :  { %v2650_v13 = vmul.f32 %v6250_v48, %v6250_v48  ;;  %v2705_v18 = vadd.f32 %v2704_v46, %v2649_v21  ;;  %v2574_v37 = vadd.f32 %v2573_v58, %v6250_v48 }
 0x42e   :  { %v6256_v27 = vpop.f32.mrf.mxu1 }
 0x42f   :  { %v2651_v32 = vmul.f32 %v6256_v27, %v6256_v27  ;;  %v2554_v17 = vadd.f32 %v2553_v45, %v6256_v27  ;;  %v2726_v6 = vadd.f32 %v2725_v14, %v2650_v13 }
 0x430   :  { %v6268_v5 = vpop.f32.mrf.mxu1 }
 0x431   :  { %v2652_v20 = vmul.f32 %v6268_v5, %v6268_v5  ;;  %v2706_v54 = vadd.f32 %v2705_v18, %v2651_v32  ;;  %v2575_v57 = vadd.f32 %v2574_v37, %v6268_v5 }
 0x432   :  { %v6277_v26 = vpop.f32.mrf.mxu1 }
 0x433   :  { %v2653_v41 = vmul.f32 %v6277_v26, %v6277_v26  ;;  %v2555_v19 = vadd.f32 %v2554_v17, %v6277_v26  ;;  %v2727_v23 = vadd.f32 %v2726_v6, %v2652_v20 }
 0x434   :  { %v6285_v55 = vpop.f32.mrf.mxu1 }
 0x435   :  { %v2654_v1 = vmul.f32 %v6285_v55, %v6285_v55  ;;  %v2707_v24 = vadd.f32 %v2706_v54, %v2653_v41  ;;  %v2576_v59 = vadd.f32 %v2575_v57, %v6285_v55 }
 0x436   :  { %v6293_v34 = vpop.f32.mrf.mxu1 }
 0x437   :  { %v2655_v2 = vmul.f32 %v6293_v34, %v6293_v34  ;;  %v2556_v44 = vadd.f32 %v2555_v19, %v6293_v34  ;;  %v2728_v35 = vadd.f32 %v2727_v23, %v2654_v1 }
 0x438   :  { %v6301_v9 = vpop.f32.mrf.mxu1 }
 0x439   :  { %v2656_v29 = vmul.f32 %v6301_v9, %v6301_v9  ;;  %v2708_v60 = vadd.f32 %v2707_v24, %v2655_v2  ;;  %v2577_v63 = vadd.f32 %v2576_v59, %v6301_v9 }
 0x43a   :  { %v6309_v50 = vpop.f32.mrf.mxu1 }
 0x43b   :  { %v2657_v62 = vmul.f32 %v6309_v50, %v6309_v50  ;;  %v2557_v22 = vadd.f32 %v2556_v44, %v6309_v50  ;;  %v2729_v39 = vadd.f32 %v2728_v35, %v2656_v29 }
 0x43c   :  { %v6317_v15 = vpop.f32.mrf.mxu1 }
 0x43d   :  { %v2658_v16 = vmul.f32 %v6317_v15, %v6317_v15  ;;  %v2709_v31 = vadd.f32 %v2708_v60, %v2657_v62  ;;  %v2578_v30 = vadd.f32 %v2577_v63, %v6317_v15 }
 0x43e   :  { %v6325_v11 = vpop.f32.mrf.mxu1 }
 0x43f   :  { %v2659_v25 = vmul.f32 %v6325_v11, %v6325_v11  ;;  %v2558_v7 = vadd.f32 %v2557_v22, %v6325_v11  ;;  %v2730_v12 = vadd.f32 %v2729_v39, %v2658_v16 }
 0x440   :  { %v6333_v51 = vpop.f32.mrf.mxu1 }
 0x441   :  { %v2660_v43 = vmul.f32 %v6333_v51, %v6333_v51  ;;  %v2710_v58 = vadd.f32 %v2709_v31, %v2659_v25  ;;  %v2579_v45 = vadd.f32 %v2578_v30, %v6333_v51 }
 0x442   :  { %v6341_v33 = vpop.f32.mrf.mxu1 }
 0x443   :  { %v2661_v21 = vmul.f32 %v6341_v33, %v6341_v33  ;;  %v2559_v32 = vadd.f32 %v2558_v7, %v6341_v33  ;;  %v2731_v20 = vadd.f32 %v2730_v12, %v2660_v43 }
 0x444   :  { %v6349_v42 = vpop.f32.mrf.mxu1 }
 0x445   :  { %v2662_v13 = vmul.f32 %v6349_v42, %v6349_v42  ;;  %v2711_v37 = vadd.f32 %v2710_v58, %v2661_v21  ;;  %v2580_v17 = vadd.f32 %v2579_v45, %v6349_v42 }
 0x446   :  { %v6357_v46 = vpop.f32.mrf.mxu1 }
 0x447   :  { %v2663_v14 = vmul.f32 %v6357_v46, %v6357_v46  ;;  %v2560_v41 = vadd.f32 %v2559_v32, %v6357_v46  ;;  %v2732_v1 = vadd.f32 %v2731_v20, %v2662_v13 }
 0x448   :  { %v6363_v18 = vpop.f32.mrf.mxu1 }
 0x449   :  { %v2664_v6 = vmul.f32 %v6363_v18, %v6363_v18  ;;  %v2712_v57 = vadd.f32 %v2711_v37, %v2663_v14  ;;  %v2581_v19 = vadd.f32 %v2580_v17, %v6363_v18 }
 0x44a   :  { %v6369_v54 = vpop.f32.mrf.mxu1 }
 0x44b   :  { %v2561_v2 = vadd.f32 %v2560_v41, %v6369_v54  ;;  %v2665_v23 = vmul.f32 %v6369_v54, %v6369_v54  ;;  %v2733_v29 = vadd.f32 %v2732_v1, %v2664_v6 }
 0x44c   :  { %v6375_v24 = vpop.f32.mrf.mxu1 }
 0x44d   :  { %v2562_v59 = vrot.slane %v2561_v2, 4  ;;  %v2713_v44 = vadd.f32 %v2712_v57, %v2665_v23  ;;  %v2582_v62 = vadd.f32 %v2581_v19, %v6375_v24  ;;  %v2666_v35 = vmul.f32 %v6375_v24, %v6375_v24 }
 0x44f   :  { %v2563_v60 = vadd.f32 %v2562_v59, %v2561_v2  ;;  %v2714_v63 = vrot.slane %v2713_v44, 4  ;;  %v2583_v22 = vrot.slane %v2582_v62, 4  ;;  %v2734_v25 = vadd.f32 %v2733_v29, %v2666_v35 }
 0x450   :  { %v6380_v16 = vpop.f32.mrf.mxu1 }
 0x451   :  { %7410 = vst [vmem:[#allocation5_spill] sm:$0xff] %v6380_v16  ;;  %v2564_v43 = vrot.slane %v2563_v60, 2  ;;  %v2715_v31 = vadd.f32 %v2714_v63, %v2713_v44  ;;  %v2584_v30 = vadd.f32 %v2583_v22, %v2582_v62  ;;  %v2735_v7 = vrot.slane %v2734_v25, 4 }
 0x452   :  { %v6382_v39 = vpop.f32.mrf.mxu1 }
 0x453   :  { %7411 = vst [vmem:[#allocation6_spill] sm:$0xff] %v6382_v39  ;;  %v2565_v12 = vadd.f32 %v2564_v43, %v2563_v60  ;;  %v2716_v13 = vrot.slane %v2715_v31, 2  ;;  %v2585_v58 = vrot.slane %v2584_v30, 2  ;;  %v2736_v45 = vadd.f32 %v2735_v7, %v2734_v25 }
 0x454   :  { %v6384_v21 = vpop.f32.mrf.mxu1 }
 0x455   :  { %7412 = vst [vmem:[#allocation7_spill] sm:$0xff] %v6384_v21  ;;  %v2566_v14 = vrot.slane %v2565_v12, 1  ;;  %v2717_v20 = vadd.f32 %v2716_v13, %v2715_v31  ;;  %v2586_v37 = vadd.f32 %v2585_v58, %v2584_v30  ;;  %v2737_v17 = vrot.slane %v2736_v45, 2 }
 0x456   :  { %v6386_v32 = vpop.f32.mrf.mxu1  ;;  %v2669_v25 = vmul.f32 %v6384_v21, %v6384_v21  ;;  %v2667_v13 = vmul.f32 %v6380_v16, %v6380_v16 }
 0x457   :  { %7413 = vst [vmem:[#allocation11_spill] sm:$0xff] %v6386_v32  ;;  %v2567_v6 = vadd.f32 %v2566_v14, %v2565_v12  ;;  %v2718_v1 = vrot.slane %v2717_v20, 1  ;;  %v2587_v57 = vrot.slane %v2586_v37, 1  ;;  %v2738_v19 = vadd.f32 %v2737_v17, %v2736_v45 }
 0x458   :  { %v6388_v41 = vpop.f32.mrf.mxu1  ;;  %v2670_v7 = vmul.f32 %v6386_v32, %v6386_v32 }
 0x459   :  { %7414 = vst [vmem:[#allocation10_spill] sm:$0xff] %v6388_v41  ;;  %v6392_v23 = vmul.f32 0.0078125, %v2567_v6  ;;  %v2719_v29 = vadd.f32 %v2718_v1, %v2717_v20  ;;  %v2588_v59 = vadd.f32 %v2587_v57, %v2586_v37  ;;  %v2739_v44 = vrot.slane %v2738_v19, 1 }
 0x45a   :  { %v6390_v2 = vpop.f32.mrf.mxu1  ;;  %v2671_v58 = vmul.f32 %v6388_v41, %v6388_v41  ;;  %v2668_v20 = vmul.f32 %v6382_v39, %v6382_v39  ;;  %v2589_v37 = vadd.f32 %v6384_v21, %v6380_v16  ;;  %v2741_v6 = vadd.f32 %v2669_v25, %v2667_v13 }
 0x45b   :  { %7415 = vst [vmem:[#allocation9_spill] sm:$0xff] %v6390_v2  ;;  %v2783_v35 = vmul.f32 0.0078125, %v2719_v29  ;;  %v2787_v60 = vmul.f32 %v6392_v23, %v6392_v23  ;;  %v6398_v63 = vmul.f32 0.0078125, %v2588_v59  ;;  %v2740_v22 = vadd.f32 %v2739_v44, %v2738_v19 }
 0x45c   :  { %v6394_v62 = vpop.f32.mrf.mxu1  ;;  %v2610_v1 = vadd.f32 %v6386_v32, %v6382_v39  ;;  %v2672_v57 = vmul.f32 %v6390_v2, %v6390_v2  ;;  %v2762_v59 = vadd.f32 %v2670_v7, %v2668_v20  ;;  %v2803_v13 = vsub.f32 %v6228_v38, %v6392_v23 }
 0x45d   :  { %7416 = vst [vmem:[#allocation8_spill] sm:$0xff] %v6394_v62  ;;  %v2791_v31 = vsub.f32 %v2783_v35, %v2787_v60  ;;  %v2788_v30 = vmul.f32 %v6398_v63, %v6398_v63  ;;  %v2784_v12 = vmul.f32 0.0078125, %v2740_v22  ;;  %v2673_v44 = vmul.f32 %v6394_v62, %v6394_v62 }
 0x45e   :  { %v6402_v43 = vpop.f32.mrf.mxu1  ;;  %v2590_v60 = vadd.f32 %v2589_v37, %v6388_v41  ;;  %v2742_v22 = vadd.f32 %v2741_v6, %v2671_v58  ;;  %v2763_v20 = vadd.f32 %v2762_v59, %v2672_v57  ;;  %v2801_v59 = vsub.f32 %v6224_v28, %v6392_v23 }
 0x45f   :  { %7417 = vst [vmem:[#allocation15_spill] sm:$0xff] %v6402_v43  ;;  %v2795_v14 = vmax.f32 %v2791_v31, 0.0  ;;  %v2792_v17 = vsub.f32 %v2784_v12, %v2788_v30  ;;  %v2611_v31 = vadd.f32 %v2610_v1, %v6390_v2  ;;  %v2674_v12 = vmul.f32 %v6402_v43, %v6402_v43 }
 0x460   :  { %v6412_v45 = vpop.f32.mrf.mxu1  ;;  %v2591_v58 = vadd.f32 %v2590_v60, %v6394_v62  ;;  %v2805_v28 = vsub.f32 %v6232_v49, %v6392_v23  ;;  %v2807_v38 = vsub.f32 %v6236_v0, %v6392_v23  ;;  %v2809_v49 = vsub.f32 %v6240_v3, %v6392_v23 }
 0x461   :  { %7418 = vst [vmem:[#allocation14_spill] sm:$0xff] %v6412_v45  ;;  %v2863_v29 = vadd.f32 1e-05, %v2795_v14  ;;  %v2796_v35 = vmax.f32 %v2792_v17, 0.0  ;;  %v2675_v7 = vmul.f32 %v6412_v45, %v6412_v45  ;;  %v2743_v17 = vadd.f32 %v2742_v22, %v2673_v44 }
 0x462   :  { %v6422_v19 = vpop.f32.mrf.mxu1  ;;  %v2612_v6 = vadd.f32 %v2611_v31, %v6402_v43  ;;  %v2592_v30 = vadd.f32 %v2591_v58, %v6412_v45  ;;  %v2764_v44 = vadd.f32 %v2763_v20, %v2674_v12  ;;  %v2800_v22 = vsub.f32 %v6222_v4, %v6398_v63 }
 0x463   :  { %4427 = vrsqrt.f32 %v2863_v29  ;;  %v2864_v14 = vadd.f32 1e-05, %v2796_v35  ;;  %v2676_v1 = vmul.f32 %v6422_v19, %v6422_v19  ;;  %v2799_v29 = vsub.f32 %v6220_v40, %v6392_v23 }
 0x464   :  { %v6428_v25 = vpop.f32.mrf.mxu1  ;;  %v2744_v60 = vadd.f32 %v2743_v17, %v2675_v7  ;;  %v2802_v31 = vsub.f32 %v6226_v53, %v6398_v63  ;;  %v2613_v40 = vadd.f32 %v2612_v6, %v6422_v19  ;;  %v2804_v4 = vsub.f32 %v6230_v56, %v6398_v63 }
 0x465   :  { %7419 = vst [vmem:[#allocation13_spill] sm:$0xff] %v6428_v25  ;;  %4429 = vrsqrt.f32 %v2864_v14  ;;  %v2677_v35 = vmul.f32 %v6428_v25, %v6428_v25  ;;  %v2765_v12 = vadd.f32 %v2764_v44, %v2676_v1  ;;  %v2593_v7 = vadd.f32 %v2592_v30, %v6428_v25 }
 0x466   :  { %v6439_v37 = vpop.f32.mrf.mxu1  ;;  %v2806_v53 = vsub.f32 %v6234_v10, %v6398_v63  ;;  %v2811_v1 = vsub.f32 %v6244_v36, %v6392_v23  ;;  %v2813_v3 = vsub.f32 %v6248_v47, %v6392_v23 }
 0x467   :  { %v2678_v14 = vmul.f32 %v6439_v37, %v6439_v37  ;;  %v2745_v20 = vadd.f32 %v2744_v60, %v2677_v35  ;;  %v2614_v30 = vadd.f32 %v2613_v40, %v6439_v37  ;;  %v2812_v40 = vsub.f32 %v6246_v52, %v6398_v63 }
 0x468   :  { %v6449_v57 = vpop.f32.mrf.mxu1 }
 0x469   :  { %v2679_v17 = vmul.f32 %v6449_v57, %v6449_v57  ;;  %v2766_v35 = vadd.f32 %v2765_v12, %v2678_v14  ;;  %v2594_v44 = vadd.f32 %v2593_v7, %v6449_v57 }
 0x46a   :  { %v6460_v58 = vpop.f32.mrf.mxu1 }
 0x46b   :  { %v2680_v0 = vmul.f32 %v6460_v58, %v6460_v58  ;;  %v2746_v12 = vadd.f32 %v2745_v20, %v2679_v17  ;;  %v2615_v7 = vadd.f32 %v2614_v30, %v6460_v58 }
 0x46c   :  { %v6473_v6 = vpop.f32.mrf.mxu1 }
 0x46d   :  { %v2681_v10 = vmul.f32 %v6473_v6, %v6473_v6  ;;  %v2767_v30 = vadd.f32 %v2766_v35, %v2680_v0  ;;  %v2595_v47 = vadd.f32 %v2594_v44, %v6473_v6 }
 0x46e   :  { %v6489_v60 = vpop.f32.mrf.mxu1 }
 0x46f   :  { %v2682_v36 = vmul.f32 %v6489_v60, %v6489_v60  ;;  %v2747_v39 = vadd.f32 %v2746_v12, %v2681_v10  ;;  %v2616_v20 = vadd.f32 %v2615_v7, %v6489_v60  ;;  %v2828_v12 = vsub.f32 %v6363_v18, %v6398_v63 }
 0x470   :  { %v6502_v56 = vpop.f32.mrf.mxu1  ;;  %v6516_v17 = vpop.eup %4427 }
 0x471   :  { %v2871_v14 = vmul.f32 %v6516_v17, %v2799_v29  ;;  %v2683_v44 = vmul.f32 %v6502_v56, %v6502_v56  ;;  %v2873_v52 = vmul.f32 %v6516_v17, %v2801_v59  ;;  %v2875_v62 = vmul.f32 %v6516_v17, %v2803_v13 }
 0x472   :  { %v6519_v21 = vpop.f32.mrf.mxu1  ;;  %v6541_v29 = vpop.eup %4429  ;;  %v2877_v2 = vmul.f32 %v6516_v17, %v2805_v28  ;;  %v2768_v32 = vadd.f32 %v2767_v30, %v2682_v36  ;;  %v2596_v25 = vadd.f32 %v2595_v47, %v6502_v56  ;;  %v2879_v36 = vmul.f32 %v6516_v17, %v2807_v38 }
 0x473   :  { %v2684_v35 = vmul.f32 %v6519_v21, %v6519_v21  ;;  %v2935_v43 = vpack.c.bf16 %v2873_v52, %v2871_v14  ;;  %v2872_v59 = vmul.f32 %v6541_v29, %v2800_v22  ;;  %v2874_v16 = vmul.f32 %v6541_v29, %v2802_v31 }
 0x474   :  { %v6534_v0 = vpop.f32.mrf.mxu1  ;;  %v2876_v10 = vmul.f32 %v6541_v29, %v2804_v4  ;;  %v2748_v7 = vadd.f32 %v2747_v39, %v2683_v44  ;;  %v2617_v13 = vadd.f32 %v2616_v20, %v6519_v21  ;;  %v2878_v22 = vmul.f32 %v6541_v29, %v2806_v53 }
 0x475   :  { %2967 = vxpose.xlu0.c.b16.start [1/8] %v2935_v43, 128  ;;  %v2936_v14 = vpack.c.bf16 %v2874_v16, %v2872_v59  ;;  %v2769_v31 = vadd.f32 %v2768_v32, %v2684_v35  ;;  %v2685_v28 = vmul.f32 %v6534_v0, %v6534_v0  ;;  %v2881_v4 = vmul.f32 %v6516_v17, %v2809_v49 }
 0x476   :  { %v6547_v41 = vpop.f32.mrf.mxu1  ;;  %v2937_v39 = vpack.c.bf16 %v2877_v2, %v2875_v62  ;;  %v2883_v52 = vmul.f32 %v6516_v17, %v2811_v1  ;;  %v2885_v43 = vmul.f32 %v6516_v17, %v2813_v3  ;;  %v2884_v16 = vmul.f32 %v6541_v29, %v2812_v40 }
 0x477   :  { %2983 = vxpose.xlu1.c.b16.start [1/8] %v2936_v14, 128  ;;  %v2597_v53 = vadd.f32 %v2596_v25, %v6534_v0  ;;  %v2938_v32 = vpack.c.bf16 %v2878_v22, %v2876_v10  ;;  %v7420_v20 = vsub.f32 %v6238_v61, %v6398_v63  ;;  %v7421_v49 = vsub.f32 %v6242_v8, %v6398_v63 }
 0x478   :  { %v6557_v45 = vpop.f32.mrf.mxu1  ;;  %v2941_v62 = vpack.c.bf16 %v2885_v43, %v2883_v52  ;;  %v7422_v1 = vsub.f32 %v6250_v48, %v6398_v63  ;;  %v7423_v3 = vsub.f32 %v6256_v27, %v6392_v23  ;;  %v7424_v40 = vsub.f32 %v6277_v26, %v6392_v23 }
 0x479   :  { %v2880_v38 = vmul.f32 %v6541_v29, %v7420_v20  ;;  %v2882_v30 = vmul.f32 %v6541_v29, %v7421_v49  ;;  %2968 = vxpose.xlu0.c.b16.cont [2/8] %v2937_v39, 128  ;;  %v2749_v35 = vadd.f32 %v2748_v7, %v2685_v28  ;;  %v2686_v44 = vmul.f32 %v6547_v41, %v6547_v41 }
 0x47a   :  { %v6564_v47 = vpop.f32.mrf.mxu1  ;;  %v2886_v25 = vmul.f32 %v6541_v29, %v7422_v1  ;;  %v2887_v61 = vmul.f32 %v6516_v17, %v7423_v3  ;;  %v2889_v8 = vmul.f32 %v6516_v17, %v7424_v40  ;;  %v2939_v59 = vpack.c.bf16 %v2881_v4, %v2879_v36 }
 0x47b   :  { %v7425_v48 = vsub.f32 %v6268_v5, %v6398_v63  ;;  %2984 = vxpose.xlu1.c.b16.cont [2/8] %v2938_v32, 128  ;;  %v7426_v26 = vsub.f32 %v6285_v55, %v6398_v63  ;;  %v7427_v7 = vsub.f32 %v6293_v34, %v6392_v23  ;;  %v2618_v36 = vadd.f32 %v2617_v13, %v6547_v41 }
 0x47c   :  { %v6578_v2 = vpop.f32.mrf.mxu1  ;;  %v2942_v27 = vpack.c.bf16 %v2886_v25, %v2884_v16  ;;  %v2943_v22 = vpack.c.bf16 %v2889_v8, %v2887_v61  ;;  %v2687_v5 = vmul.f32 %v6557_v45, %v6557_v45  ;;  %v2940_v4 = vpack.c.bf16 %v2882_v30, %v2880_v38 }
 0x47d   :  { %v2888_v10 = vmul.f32 %v6541_v29, %v7425_v48  ;;  %v2890_v39 = vmul.f32 %v6541_v29, %v7426_v26  ;;  %v2891_v28 = vmul.f32 %v6516_v17, %v7427_v7  ;;  %v7428_v52 = vsub.f32 %v6309_v50, %v6392_v23  ;;  %2969 = vxpose.xlu0.c.b16.cont [3/8] %v2939_v59, 128 }
 0x47e   :  { %v6598_v14 = vpop.f32.mrf.mxu1  ;;  %v7429_v34 = vsub.f32 %v6301_v9, %v6398_v63  ;;  %v7430_v13 = vsub.f32 %v6317_v15, %v6398_v63  ;;  %v7431_v38 = vsub.f32 %v6325_v11, %v6392_v23  ;;  %v2770_v49 = vadd.f32 %v2769_v31, %v2686_v44 }
 0x47f   :  { %v2893_v43 = vmul.f32 %v6516_v17, %v7428_v52  ;;  %v2944_v16 = vpack.c.bf16 %v2890_v39, %v2888_v10  ;;  %v2688_v30 = vmul.f32 %v6564_v47, %v6564_v47  ;;  %v2689_v9 = vmul.f32 %v6578_v2, %v6578_v2  ;;  %2985 = vxpose.xlu1.c.b16.cont [3/8] %v2940_v4, 128 }
 0x480   :  { %v6615_v55 = vpop.f32.mrf.mxu1  ;;  %v2892_v32 = vmul.f32 %v6541_v29, %v7429_v34  ;;  %v2894_v20 = vmul.f32 %v6541_v29, %v7430_v13  ;;  %v6629_v50 = vmul.f32 %v6516_v17, %v7431_v38  ;;  %v7432_v3 = vsub.f32 %v6341_v33, %v6392_v23 }
 0x481   :  { %v2945_v1 = vpack.c.bf16 %v2893_v43, %v2891_v28  ;;  %v7433_v61 = vsub.f32 %v6333_v51, %v6398_v63  ;;  %v7434_v40 = vsub.f32 %v6349_v42, %v6398_v63  ;;  %v2598_v44 = vadd.f32 %v2597_v53, %v6557_v45  ;;  %2970 = vxpose.xlu0.c.b16.cont [4/8] %v2941_v62, 128 }
 0x482   :  { %v6635_v25 = vpop.f32.mrf.mxu1  ;;  %v2946_v15 = vpack.c.bf16 %v2894_v20, %v2892_v32  ;;  %v2897_v11 = vmul.f32 %v6516_v17, %v7432_v3  ;;  %v2750_v59 = vadd.f32 %v2749_v35, %v2687_v5  ;;  %v2690_v48 = vmul.f32 %v6598_v14, %v6598_v14 }
 0x483   :  { %v2896_v31 = vmul.f32 %v6541_v29, %v7433_v61  ;;  %v2898_v8 = vmul.f32 %v6541_v29, %v7434_v40  ;;  %v7435_v33 = vsub.f32 %v6357_v46, %v6392_v23  ;;  %v7436_v42 = vsub.f32 %v6369_v54, %v6392_v23  ;;  %2986 = vxpose.xlu1.c.b16.cont [4/8] %v2942_v27, 128 }
 0x484   :  { %v6656_v51 = vpop.f32.mrf.mxu1  ;;  %v2947_v26 = vpack.c.bf16 %v2897_v11, %v6629_v50  ;;  %v2900_v35 = vmul.f32 %v6541_v29, %v2828_v12  ;;  %v2619_v46 = vadd.f32 %v2618_v36, %v6564_v47  ;;  %v2599_v7 = vadd.f32 %v2598_v44, %v6578_v2 }
 0x485   :  { %v2899_v10 = vmul.f32 %v6516_v17, %v7435_v33  ;;  %v2948_v39 = vpack.c.bf16 %v2898_v8, %v2896_v31  ;;  %v2901_v53 = vmul.f32 %v6516_v17, %v7436_v42  ;;  %v2691_v62 = vmul.f32 %v6615_v55, %v6615_v55  ;;  %2971 = vxpose.xlu0.c.b16.cont [5/8] %v2943_v22, 128 }
 0x486   :  { %v7437_v28 = vsub.f32 %v6375_v24, %v6398_v63  ;;  %v2771_v54 = vadd.f32 %v2770_v49, %v2688_v30  ;;  %v2751_v23 = vadd.f32 %v2750_v59, %v2689_v9  ;;  %v2692_v17 = vmul.f32 %v6635_v25, %v6635_v25  ;;  %v6677_v18 = vpop.f32.mrf.mxu1 }
 0x487   :  { %v2949_v12 = vpack.c.bf16 %v2901_v53, %v2899_v10  ;;  %v2620_v36 = vadd.f32 %v2619_v46, %v6598_v14  ;;  %v2600_v4 = vadd.f32 %v2599_v7, %v6615_v55  ;;  %v2693_v52 = vmul.f32 %v6656_v51, %v6656_v51  ;;  %2987 = vxpose.xlu1.c.b16.cont [5/8] %v2944_v16, 128 }
 0x488   :  { %v2902_v5 = vmul.f32 %v6541_v29, %v7437_v28  ;;  %v2772_v24 = vadd.f32 %v2771_v54, %v2690_v48  ;;  %v2694_v63 = vmul.f32 %v6677_v18, %v6677_v18  ;;  %v6685_v29 = vpop.f32.mrf.mxu1  ;;  %v2752_v34 = vadd.f32 %v2751_v23, %v2691_v62 }
 0x489   :  { %v2621_v27 = vadd.f32 %v2620_v36, %v6635_v25  ;;  %v2601_v32 = vadd.f32 %v2600_v4, %v6656_v51  ;;  %v2695_v13 = vmul.f32 %v6685_v29, %v6685_v29  ;;  %2972 = vxpose.xlu0.c.b16.cont [6/8] %v2945_v1, 128 }
 0x48a   :  { %v2950_v43 = vpack.c.bf16 %v2902_v5, %v2900_v35  ;;  %v2773_v20 = vadd.f32 %v2772_v24, %v2692_v17  ;;  %v6691_v38 = vpop.f32.mrf.mxu1  ;;  %v2753_v50 = vadd.f32 %v2752_v34, %v2693_v52 }
 0x48b   :  { %v2622_v49 = vadd.f32 %v2621_v27, %v6677_v18  ;;  %v2602_v30 = vadd.f32 %v2601_v32, %v6685_v29  ;;  %v2696_v22 = vmul.f32 %v6691_v38, %v6691_v38  ;;  %2988 = vxpose.xlu1.c.b16.cont [6/8] %v2946_v15, 128 }
 0x48c   :  { %v2774_v9 = vadd.f32 %v2773_v20, %v2694_v63  ;;  %v6697_v3 = vpop.f32.mrf.mxu1  ;;  %v2754_v11 = vadd.f32 %v2753_v50, %v2695_v13 }
 0x48d   :  { %v2623_v61 = vadd.f32 %v2622_v49, %v6691_v38  ;;  %v2603_v31 = vadd.f32 %v2602_v30, %v6697_v3  ;;  %v2697_v16 = vmul.f32 %v6697_v3, %v6697_v3  ;;  %2973 = vxpose.xlu0.c.b16.cont [7/8] %v2947_v26, 128 }
 0x48e   :  { %v2775_v40 = vadd.f32 %v2774_v9, %v2696_v22  ;;  %v6703_v8 = vpop.f32.mrf.mxu1 }
 0x48f   :  { %v2604_v44 = vrot.slane %v2603_v31, 4  ;;  %v2755_v59 = vadd.f32 %v2754_v11, %v2697_v16  ;;  %v2624_v48 = vadd.f32 %v2623_v61, %v6703_v8  ;;  %v2698_v1 = vmul.f32 %v6703_v8, %v6703_v8  ;;  %2989 = vxpose.xlu1.c.b16.cont [7/8] %v2948_v39, 128 }
 0x491   :  { %v2605_v33 = vadd.f32 %v2604_v44, %v2603_v31  ;;  %v2756_v10 = vrot.slane %v2755_v59, 4  ;;  %v2625_v42 = vrot.slane %v2624_v48, 4  ;;  %v2776_v53 = vadd.f32 %v2775_v40, %v2698_v1  ;;  %2974 = vxpose.xlu0.c.b16.end [8/8] %v2949_v12, 128 }
 0x493   :  { %v2606_v35 = vrot.slane %v2605_v33, 2  ;;  %v2757_v46 = vadd.f32 %v2756_v10, %v2755_v59  ;;  %v2626_v7 = vadd.f32 %v2625_v42, %v2624_v48  ;;  %v2777_v62 = vrot.slane %v2776_v53, 4  ;;  %2990 = vxpose.xlu1.c.b16.end [8/8] %v2950_v43, 128 }
 0x495   :  { %v2607_v15 = vadd.f32 %v2606_v35, %v2605_v33  ;;  %v2758_v28 = vrot.slane %v2757_v46, 2  ;;  %v2627_v5 = vrot.slane %v2626_v7, 2  ;;  %v2778_v54 = vadd.f32 %v2777_v62, %v2776_v53 }
 0x497   :  { %v2608_v23 = vrot.slane %v2607_v15, 1  ;;  %v2759_v17 = vadd.f32 %v2758_v28, %v2757_v46  ;;  %v2628_v36 = vadd.f32 %v2627_v5, %v2626_v7  ;;  %v2779_v4 = vrot.slane %v2778_v54, 2 }
 0x499   :  { %v2609_v26 = vadd.f32 %v2608_v23, %v2607_v15  ;;  %v2760_v52 = vrot.slane %v2759_v17, 1  ;;  %v2629_v24 = vrot.slane %v2628_v36, 1  ;;  %v2780_v63 = vadd.f32 %v2779_v4, %v2778_v54 }
 0x49b   :  { %v6708_v34 = vmul.f32 0.0078125, %v2609_v26  ;;  %v2761_v39 = vadd.f32 %v2760_v52, %v2759_v17  ;;  %v2630_v27 = vadd.f32 %v2629_v24, %v2628_v36  ;;  %v2781_v32 = vrot.slane %v2780_v63, 1 }
 0x49d   :  { %v2785_v13 = vmul.f32 0.0078125, %v2761_v39  ;;  %v2789_v12 = vmul.f32 %v6708_v34, %v6708_v34  ;;  %v6712_v20 = vmul.f32 0.0078125, %v2630_v27  ;;  %v2782_v43 = vadd.f32 %v2781_v32, %v2780_v63 }
 0x49e   :  { %v2861_v16 = vsub.f32 %v6697_v3, %v6708_v34  ;;  %v2859_v40 = vsub.f32 %v6685_v29, %v6708_v34  ;;  %v2855_v48 = vsub.f32 %v6615_v55, %v6708_v34  ;;  %v2857_v1 = vsub.f32 %v6656_v51, %v6708_v34 }
 0x49f   :  { %v2793_v50 = vsub.f32 %v2785_v13, %v2789_v12  ;;  %v2790_v49 = vmul.f32 %v6712_v20, %v6712_v20  ;;  %v2786_v30 = vmul.f32 0.0078125, %v2782_v43  ;;  %v2862_v44 = vsub.f32 %v6703_v8, %v6712_v20 }
 0x4a0   :  { %v2860_v59 = vsub.f32 %v6691_v38, %v6712_v20  ;;  %v2856_v3 = vsub.f32 %v6635_v25, %v6712_v20  ;;  %v2858_v29 = vsub.f32 %v6677_v18, %v6712_v20  ;;  %v2847_v8 = vsub.f32 %v6502_v56, %v6708_v34 }
 0x4a1   :  { %v2797_v22 = vmax.f32 %v2793_v50, 0.0  ;;  %v2794_v9 = vsub.f32 %v2786_v30, %v2790_v49  ;;  %v2849_v38 = vsub.f32 %v6534_v0, %v6708_v34  ;;  %v2852_v55 = vsub.f32 %v6564_v47, %v6712_v20 }
 0x4a2   :  { %v2854_v51 = vsub.f32 %v6598_v14, %v6712_v20  ;;  %v2843_v10 = vsub.f32 %v6449_v57, %v6708_v34  ;;  %v2845_v25 = vsub.f32 %v6473_v6, %v6708_v34  ;;  %v2848_v18 = vsub.f32 %v6519_v21, %v6712_v20 }
 0x4a3   :  { %v2865_v11 = vadd.f32 1e-05, %v2797_v22  ;;  %v2798_v61 = vmax.f32 %v2794_v9, 0.0  ;;  %v2850_v56 = vsub.f32 %v6547_v41, %v6712_v20  ;;  %v2844_v15 = vsub.f32 %v6460_v58, %v6712_v20  ;;  %v7438_v9 = vld [vmem:[#allocation14_spill] sm:$0xff] }
 0x4a4   :  { %v2846_v28 = vsub.f32 %v6489_v60, %v6712_v20  ;;  %v2851_v60 = vsub.f32 %v6557_v45, %v6708_v34  ;;  %v2853_v27 = vsub.f32 %v6578_v2, %v6708_v34  ;;  %v2840_v30 = vsub.f32 %v6422_v19, %v6712_v20  ;;  %v7441_v19 = vld [vmem:[#allocation15_spill] sm:$0xff] }
 0x4a5   :  { %4431 = vrsqrt.f32 %v2865_v11  ;;  %v2866_v31 = vadd.f32 1e-05, %v2798_v61  ;;  %v2842_v45 = vsub.f32 %v6439_v37, %v6712_v20  ;;  %v2839_v11 = vsub.f32 %v7438_v9, %v6708_v34  ;;  %v7439_v61 = vld [vmem:[#allocation13_spill] sm:$0xff] }
 0x4a7   :  { %4433 = vrsqrt.f32 %v2866_v31  ;;  %v2841_v31 = vsub.f32 %v7439_v61, %v6708_v34 }
 0x4b2   :  { %v6728_v33 = vpop.eup %4431 }
 0x4b3   :  { %v2919_v0 = vmul.f32 %v6728_v33, %v2847_v8  ;;  %v2921_v42 = vmul.f32 %v6728_v33, %v2849_v38  ;;  %v2933_v14 = vmul.f32 %v6728_v33, %v2861_v16  ;;  %v2931_v53 = vmul.f32 %v6728_v33, %v2859_v40  ;;  %v7440_v16 = vld [vmem:[#allocation9_spill] sm:$0xff]  ;;  %v7443_v38 = vld [vmem:[#allocation8_spill] sm:$0xff] }
 0x4b4   :  { %v6752_v47 = vpop.eup %4433  ;;  %v2915_v57 = vmul.f32 %v6728_v33, %v2843_v10  ;;  %v2917_v6 = vmul.f32 %v6728_v33, %v2845_v25  ;;  %v2927_v7 = vmul.f32 %v6728_v33, %v2855_v48  ;;  %v2929_v54 = vmul.f32 %v6728_v33, %v2857_v1  ;;  %v7445_v25 = vld [vmem:[#allocation11_spill] sm:$0xff] }
 0x4b5   :  { %v2934_v35 = vmul.f32 %v6752_v47, %v2862_v44  ;;  %v2932_v21 = vmul.f32 %v6752_v47, %v2860_v59  ;;  %v2928_v41 = vmul.f32 %v6752_v47, %v2856_v3  ;;  %v2930_v46 = vmul.f32 %v6752_v47, %v2858_v29  ;;  %v7442_v29 = vld [vmem:[#allocation10_spill] sm:$0xff] }
 0x4b6   :  { %v2920_v62 = vmul.f32 %v6752_v47, %v2848_v18  ;;  %v2922_v23 = vmul.f32 %v6752_v47, %v2850_v56  ;;  %v2959_v17 = vpack.c.bf16 %v2921_v42, %v2919_v0  ;;  %v2965_v36 = vpack.c.bf16 %v2933_v14, %v2931_v53 }
 0x4b7   :  { %v2966_v5 = vpack.c.bf16 %v2934_v35, %v2932_v21  ;;  %v2916_v4 = vmul.f32 %v6752_v47, %v2844_v15  ;;  %v2918_v26 = vmul.f32 %v6752_v47, %v2846_v28  ;;  %v2957_v52 = vpack.c.bf16 %v2917_v6, %v2915_v57  ;;  %v7446_v6 = vld [vmem:[#allocation5_spill] sm:$0xff]  ;;  %v7447_v21 = vld [vmem:[#allocation7_spill] sm:$0xff] }
 0x4b8   :  { %v2964_v24 = vpack.c.bf16 %v2930_v46, %v2928_v41  ;;  %v2924_v63 = vmul.f32 %v6752_v47, %v2852_v55  ;;  %v2926_v58 = vmul.f32 %v6752_v47, %v2854_v51  ;;  %v2960_v39 = vpack.c.bf16 %v2922_v23, %v2920_v62  ;;  %v7444_v51 = vld [vmem:[#allocation6_spill] sm:$0xff] }
 0x4b9   :  { %2999 = vmatprep.subr.bf16.mxu0 %v2966_v5  ;;  %v2958_v32 = vpack.c.bf16 %v2918_v26, %v2916_v4  ;;  %v2963_v13 = vpack.c.bf16 %v2929_v54, %v2927_v7  ;;  %v2923_v12 = vmul.f32 %v6728_v33, %v2851_v60  ;;  %v2925_v43 = vmul.f32 %v6728_v33, %v2853_v27 }
 0x4ba   :  { %3000 = vmatpush1.bf16.msra.mxu0 %v2965_v36  ;;  %v2962_v50 = vpack.c.bf16 %v2926_v58, %v2924_v63  ;;  %v2912_v2 = vmul.f32 %v6752_v47, %v2840_v30  ;;  %v2914_v22 = vmul.f32 %v6752_v47, %v2842_v45  ;;  %v2836_v40 = vsub.f32 %v7440_v16, %v6712_v20 }
 0x4bb   :  { %3001 = vmatprep.subr.bf16.mxu0 %v2964_v24  ;;  %v2961_v49 = vpack.c.bf16 %v2925_v43, %v2923_v12  ;;  %v2838_v44 = vsub.f32 %v7441_v19, %v6712_v20  ;;  %v2911_v37 = vmul.f32 %v6728_v33, %v2839_v11  ;;  %v2913_v59 = vmul.f32 %v6728_v33, %v2841_v31 }
 0x4bc   :  { %v2956_v48 = vpack.c.bf16 %v2914_v22, %v2912_v2  ;;  %v2908_v1 = vmul.f32 %v6752_v47, %v2836_v40  ;;  %v2835_v8 = vsub.f32 %v7442_v29, %v6708_v34  ;;  %v2837_v55 = vsub.f32 %v7443_v38, %v6708_v34 }
 0x4bd   :  { %v2910_v3 = vmul.f32 %v6752_v47, %v2838_v44  ;;  %v2832_v10 = vsub.f32 %v7444_v51, %v6712_v20  ;;  %v2834_v18 = vsub.f32 %v7445_v25, %v6712_v20  ;;  %v2955_v56 = vpack.c.bf16 %v2913_v59, %v2911_v37 }
 0x4be   :  { %3002 = vmatpush1.bf16.msra.mxu0 %v2963_v13  ;;  %v2907_v0 = vmul.f32 %v6728_v33, %v2835_v8  ;;  %v2909_v42 = vmul.f32 %v6728_v33, %v2837_v55  ;;  %v2831_v35 = vsub.f32 %v7446_v6, %v6708_v34  ;;  %v2833_v41 = vsub.f32 %v7447_v21, %v6708_v34 }
 0x4bf   :  { %3003 = vmatprep.subr.bf16.mxu0 %v2962_v50  ;;  %v2954_v14 = vpack.c.bf16 %v2910_v3, %v2908_v1  ;;  %v2904_v53 = vmul.f32 %v6752_v47, %v2832_v10  ;;  %v2906_v57 = vmul.f32 %v6752_v47, %v2834_v18  ;;  %v7448_v47 = vmov 0  }
 0x4c0   :  { %v2953_v46 = vpack.c.bf16 %v2909_v42, %v2907_v0  ;;  %v2903_v20 = vmul.f32 %v6728_v33, %v2831_v35  ;;  %v2905_v7 = vmul.f32 %v6728_v33, %v2833_v41 }
 0x4c1   :  { %v2952_v62 = vpack.c.bf16 %v2906_v57, %v2904_v53 }
 0x4c2   :  { %3004 = vmatpush1.bf16.msra.mxu0 %v2961_v49  ;;  %v2951_v15 = vpack.c.bf16 %v2905_v7, %v2903_v20 }
 0x4c3   :  { %3005 = vmatprep.subr.bf16.mxu0 %v2960_v39 }
 0x4c6   :  { %3006 = vmatpush1.bf16.msra.mxu0 %v2959_v17 }
 0x4c7   :  { %3007 = vmatprep.subr.bf16.mxu0 %v2958_v32 }
 0x4ca   :  { %3008 = vmatpush1.bf16.msra.mxu0 %v2957_v52 }
 0x4cb   :  { %3009 = vmatprep.subr.bf16.mxu0 %v2956_v48 }
 0x4ce   :  { %3010 = vmatpush1.bf16.msra.mxu0 %v2955_v56 }
 0x4cf   :  { %3011 = vmatprep.subr.bf16.mxu0 %v2954_v14 }
 0x4d2   :  { %3012 = vmatpush1.bf16.msra.mxu0 %v2953_v46 }
 0x4d3   :  { %3013 = vmatprep.subr.bf16.mxu0 %v2952_v62 }
 0x4d6   :  { %3014 = vmatpush1.bf16.msra.mxu0 %v2951_v15 }
 0x4d7   :  { %v2975_v28 = vpop.trf.xlu0 }
 0x4d9   :  { %3032 = vmatmul.mubr.bf16.vlgmr.msra.gmra.mxu0 %v2975_v28  ;;  %v2991_v4 = vpop.trf.xlu1 }
 0x4da   :  { %3041 = vmatprep.mubr.bf16.mxu0 %v7448_v47 }
 0x4db   :  { %v2976_v5 = vpop.trf.xlu0 }
 0x4dd   :  { %v2992_v26 = vpop.trf.xlu1 }
 0x4df   :  { %v2977_v34 = vpop.trf.xlu0 }
 0x4e1   :  { %3042 = vmatmul.mubr.bf16.gmra.mxu0 %v2976_v5  ;;  %v2993_v52 = vpop.trf.xlu1 }
 0x4e2   :  { %3051 = vmatprep.mubr.bf16.mxu0 %v7448_v47 }
 0x4e3   :  { %v2978_v54 = vpop.trf.xlu0 }
 0x4e5   :  { %v2994_v24 = vpop.trf.xlu1 }
 0x4e7   :  { %v2979_v33 = vpop.trf.xlu0 }
 0x4e9   :  { %3052 = vmatmul.mubr.bf16.gmra.mxu0 %v2977_v34  ;;  %v2995_v63 = vpop.trf.xlu1 }
 0x4ea   :  { %3061 = vmatprep.mubr.bf16.mxu0 %v7448_v47 }
 0x4eb   :  { %v2980_v23 = vpop.trf.xlu0 }
 0x4ed   :  { %v2996_v58 = vpop.trf.xlu1 }
 0x4ef   :  { %v2981_v17 = vpop.trf.xlu0 }
 0x4f1   :  { %3062 = vmatmul.mubr.bf16.gmra.mxu0 %v2978_v54  ;;  %v2997_v39 = vpop.trf.xlu1 }
 0x4f2   :  { %3071 = vmatprep.mubr.bf16.mxu0 %v7448_v47 }
 0x4f3   :  { %v2982_v36 = vpop.trf.xlu0 }
 0x4f5   :  { %v2998_v60 = vpop.trf.xlu1 }
 0x4f9   :  { %3072 = vmatmul.mubr.bf16.gmra.mxu0 %v2979_v33 }
 0x4fa   :  { %3081 = vmatprep.mubr.bf16.mxu0 %v7448_v47 }
 0x501   :  { %3082 = vmatmul.mubr.bf16.gmra.mxu0 %v2980_v23 }
 0x502   :  { %3091 = vmatprep.mubr.bf16.mxu0 %v7448_v47 }
 0x509   :  { %3092 = vmatmul.mubr.bf16.gmra.mxu0 %v2981_v17 }
 0x50a   :  { %3101 = vmatprep.mubr.bf16.mxu0 %v7448_v47 }
 0x511   :  { %3102 = vmatmul.mubr.bf16.gmra.mxu0 %v2982_v36 }
 0x512   :  { %3111 = vmatprep.mubr.bf16.mxu0 %v7448_v47 }
 0x519   :  { %3112 = vmatmul.mubr.bf16.gmra.mxu0 %v2991_v4 }
 0x51a   :  { %3121 = vmatprep.mubr.bf16.mxu0 %v7448_v47 }
 0x521   :  { %3122 = vmatmul.mubr.bf16.gmra.mxu0 %v2992_v26 }
 0x522   :  { %3131 = vmatprep.mubr.bf16.mxu0 %v7448_v47 }
 0x529   :  { %3132 = vmatmul.mubr.bf16.gmra.mxu0 %v2993_v52 }
 0x52a   :  { %3141 = vmatprep.mubr.bf16.mxu0 %v7448_v47 }
 0x531   :  { %3142 = vmatmul.mubr.bf16.gmra.mxu0 %v2994_v24 }
 0x532   :  { %3151 = vmatprep.mubr.bf16.mxu0 %v7448_v47 }
 0x539   :  { %3152 = vmatmul.mubr.bf16.gmra.mxu0 %v2995_v63 }
 0x53a   :  { %3161 = vmatprep.mubr.bf16.mxu0 %v7448_v47 }
 0x541   :  { %3162 = vmatmul.mubr.bf16.gmra.mxu0 %v2996_v58 }
 0x542   :  { %3171 = vmatprep.mubr.bf16.mxu0 %v7448_v47 }
 0x549   :  { %3172 = vmatmul.mubr.bf16.gmra.mxu0 %v2997_v39 }
 0x54a   :  { %3181 = vmatprep.mubr.bf16.mxu0 %v7448_v47 }
 0x551   :  { %3182 = vmatmul.mubr.bf16.gmra.mxu0 %v2998_v60 }
 0x599   :  { %v3033_v27 = vpop.f32.mrf.mxu0 }
 0x59a   :  { %v3192_v32 = vmul.f32 0.0078125, %v3033_v27 }
 0x59b   :  { %v3035_v13 = vpop.f32.mrf.mxu0 }
 0x59c   :  { %v3356_v12 = vmul.f32 %v3192_v32, %v3192_v32  ;;  %v4029_v43 = vadd.f32 -1.0, %v3192_v32  ;;  %v3193_v50 = vmul.f32 0.0078125, %v3035_v13 }
 0x59d   :  { %v3037_v49 = vpop.f32.mrf.mxu0 }
 0x59e   :  { %v6831_v30 = vmul.f32 %v4029_v43, %v4029_v43  ;;  %v6833_v45 = vmul.f32 0.0051, %v3356_v12  ;;  %v3357_v2 = vmul.f32 %v3193_v50, %v3193_v50  ;;  %v6835_v22 = vmul.f32 0.0078125, %v3037_v49 }
 0x59f   :  { %v3039_v9 = vpop.f32.mrf.mxu0  ;;  %v3256_v49 = vlaneseq }
 0x5a0   :  { %v3685_v11 = vsub.f32 %v6831_v30, %v6833_v45  ;;  %v3420_v61 = vadd.f32 %v3357_v2, %v3356_v12  ;;  %v6841_v31 = vmul.f32 %v6835_v22, %v6835_v22  ;;  %v3195_v16 = vmul.f32 0.0078125, %v3039_v9 }
 0x5a1   :  { %v3043_v40 = vpop.f32.mrf.mxu0 }
 0x5a2   :  { %v3421_v19 = vadd.f32 %v3420_v61, %v6841_v31  ;;  %v3359_v44 = vmul.f32 %v3195_v16, %v3195_v16  ;;  %v6844_v37 = vmul.f32 0.0078125, %v3043_v40 }
 0x5a3   :  { %v3045_v59 = vpop.f32.mrf.mxu0 }
 0x5a4   :  { %v3197_v48 = vmul.f32 0.0078125, %v3045_v59  ;;  %v3422_v1 = vadd.f32 %v3421_v19, %v3359_v44  ;;  %v6848_v3 = vmul.f32 %v6844_v37, %v6844_v37 }
 0x5a5   :  { %v3047_v29 = vpop.f32.mrf.mxu0 }
 0x5a6   :  { %v3361_v8 = vmul.f32 %v3197_v48, %v3197_v48  ;;  %v6850_v38 = vmul.f32 0.0078125, %v3047_v29  ;;  %v3423_v55 = vadd.f32 %v3422_v1, %v6848_v3  ;;  %v6899_v1 = vshrl.u32 %v3256_v49, 7 }
 0x5a7   :  { %v3049_v51 = vpop.f32.mrf.mxu0 }
 0x5a8   :  { %v6855_v10 = vmul.f32 %v6850_v38, %v6850_v38  ;;  %v3199_v25 = vmul.f32 0.0078125, %v3049_v51  ;;  %v3424_v18 = vadd.f32 %v3423_v55, %v3361_v8  ;;  %v6901_v51 = vand.u32 127, %v3256_v49 }
 0x5a9   :  { %v3053_v56 = vpop.f32.mrf.mxu0  ;;  %v6952_v49 = vadd.s32 72, %v6899_v1 }
 0x5aa   :  { %v3363_v0 = vmul.f32 %v3199_v25, %v3199_v25  ;;  %v6857_v42 = vmul.f32 0.0078125, %v3053_v56  ;;  %v3425_v14 = vadd.f32 %v3424_v18, %v6855_v10  ;;  %v3258_v25 = vadd.s32 8, %v6899_v1 }
 0x5ab   :  { %v3055_v53 = vpop.f32.mrf.mxu0  ;;  %vm3292_vm0 = vcmp.eq.s32.totalorder %v6899_v1, %v6901_v51  ;;  %vm3310_vm9 = vcmp.eq.s32.totalorder %v6952_v49, %v6901_v51  ;;  %v7102_v49 = vadd.s32 144, %v6899_v1 }
 0x5ac   :  { %v6862_v57 = vmul.f32 %v6857_v42, %v6857_v42  ;;  %v3426_v6 = vadd.f32 %v3425_v14, %v3363_v0  ;;  %v3201_v35 = vmul.f32 0.0078125, %v3055_v53  ;;  %v4031_v14 = vadd.f32 -1.0, %v6835_v22 }
 0x5ad   :  { %v3057_v21 = vpop.f32.mrf.mxu0  ;;  %vm3294_vm1 = vcmp.eq.s32.totalorder %v3258_v25, %v6901_v51  ;;  %v6920_v22 = vadd.s32 24, %v6899_v1 }
 0x5ae   :  { %v6864_v41 = vmul.f32 0.0078125, %v3057_v21  ;;  %v3427_v46 = vadd.f32 %v3426_v6, %v6862_v57  ;;  %v3365_v20 = vmul.f32 %v3201_v35, %v3201_v35  ;;  %v3259_v6 = vadd.s32 16, %v6899_v1 }
 0x5af   :  { %v3059_v7 = vpop.f32.mrf.mxu0  ;;  %v4033_v35 = vadd.f32 -1.0, %v6844_v37  ;;  %vm3298_vm3 = vcmp.eq.s32.totalorder %v6920_v22, %v6901_v51 }
 0x5b0   :  { %v6869_v62 = vmul.f32 %v6864_v41, %v6864_v41  ;;  %v3203_v15 = vmul.f32 0.0078125, %v3059_v7  ;;  %v3428_v28 = vadd.f32 %v3427_v46, %v3365_v20  ;;  %vm3296_vm2 = vcmp.eq.s32.totalorder %v3259_v6, %v6901_v51 }
 0x5b1   :  { %v3063_v47 = vpop.f32.mrf.mxu0 }
 0x5b2   :  { %v3367_v5 = vmul.f32 %v3203_v15, %v3203_v15  ;;  %v3429_v34 = vadd.f32 %v3428_v28, %v6869_v62  ;;  %v6872_v54 = vmul.f32 0.0078125, %v3063_v47  ;;  %v3559_v47 = vmul.f32 %v4031_v14, %v4031_v14 }
 0x5b3   :  { %v3065_v33 = vpop.f32.mrf.mxu0 }
 0x5b4   :  { %v3205_v23 = vmul.f32 0.0078125, %v3065_v33  ;;  %v3430_v17 = vadd.f32 %v3429_v34, %v3367_v5  ;;  %v6876_v36 = vmul.f32 %v6872_v54, %v6872_v54  ;;  %v3623_v5 = vmul.f32 0.0051, %v6841_v31 }
 0x5b5   :  { %v3067_v4 = vpop.f32.mrf.mxu0  ;;  %v6939_v31 = vadd.s32 40, %v6899_v1 }
 0x5b6   :  { %v3369_v26 = vmul.f32 %v3205_v23, %v3205_v23  ;;  %v6878_v52 = vmul.f32 0.0078125, %v3067_v4  ;;  %v3431_v24 = vadd.f32 %v3430_v17, %v6876_v36  ;;  %v3561_v23 = vmul.f32 %v4033_v35, %v4033_v35 }
 0x5b7   :  { %v3069_v63 = vpop.f32.mrf.mxu0  ;;  %v3625_v17 = vmul.f32 0.0051, %v6848_v3  ;;  %v6945_v3 = vadd.s32 56, %v6899_v1  ;;  %vm3302_vm5 = vcmp.eq.s32.totalorder %v6939_v31, %v6901_v51 }
 0x5b8   :  { %v6883_v58 = vmul.f32 %v6878_v52, %v6878_v52  ;;  %v3207_v39 = vmul.f32 0.0078125, %v3069_v63  ;;  %v3432_v60 = vadd.f32 %v3431_v24, %v3369_v26  ;;  %v4035_v24 = vadd.f32 -1.0, %v6850_v38 }
 0x5b9   :  { %v3073_v27 = vpop.f32.mrf.mxu0  ;;  %v6932_v63 = vadd.s32 32, %v6899_v1  ;;  %vm3306_vm7 = vcmp.eq.s32.totalorder %v6945_v3, %v6901_v51  ;;  %v7073_v3 = vadd.s32 128, %v6899_v1 }
 0x5ba   :  { %v3371_v32 = vmul.f32 %v3207_v39, %v3207_v39  ;;  %v6885_v13 = vmul.f32 0.0078125, %v3073_v27  ;;  %v3433_v12 = vadd.f32 %v3432_v60, %v6883_v58  ;;  %v6942_v27 = vadd.s32 48, %v6899_v1 }
 0x5bb   :  { %v3075_v43 = vpop.f32.mrf.mxu0  ;;  %vm3300_vm4 = vcmp.eq.s32.totalorder %v6932_v63, %v6901_v51 }
 0x5bc   :  { %v6890_v50 = vmul.f32 %v6885_v13, %v6885_v13  ;;  %v3434_v2 = vadd.f32 %v3433_v12, %v3371_v32  ;;  %v3209_v9 = vmul.f32 0.0078125, %v3075_v43  ;;  %v3687_v12 = vsub.f32 %v3559_v47, %v3623_v5 }
 0x5bd   :  { %v3077_v61 = vpop.f32.mrf.mxu0  ;;  %v6949_v43 = vadd.s32 64, %v6899_v1  ;;  %vm3304_vm6 = vcmp.eq.s32.totalorder %v6942_v27, %v6901_v51 }
 0x5be   :  { %v6892_v16 = vmul.f32 0.0078125, %v3077_v61  ;;  %v3435_v40 = vadd.f32 %v3434_v2, %v6890_v50  ;;  %v3373_v19 = vmul.f32 %v3209_v9, %v3209_v9  ;;  %v3689_v9 = vsub.f32 %v3561_v23, %v3625_v17 }
 0x5bf   :  { %v3079_v44 = vpop.f32.mrf.mxu0  ;;  %v6959_v61 = vadd.s32 80, %v6899_v1  ;;  %v4041_v23 = vadd.f32 -1.0, %v6872_v54  ;;  %vm3308_vm8 = vcmp.eq.s32.totalorder %v6949_v43, %v6901_v51 }
 0x5c0   :  { %v6897_v59 = vmul.f32 %v6892_v16, %v6892_v16  ;;  %v3211_v48 = vmul.f32 0.0078125, %v3079_v44  ;;  %v3436_v29 = vadd.f32 %v3435_v40, %v3373_v19 }
 0x5c1   :  { %v3083_v8 = vpop.f32.mrf.mxu0  ;;  %vm3312_vm10 = vcmp.eq.s32.totalorder %v6959_v61, %v6901_v51 }
 0x5c2   :  { %v3375_v55 = vmul.f32 %v3211_v48, %v3211_v48  ;;  %v3437_v18 = vadd.f32 %v3436_v29, %v6897_v59  ;;  %v6905_v56 = vmul.f32 0.0078125, %v3083_v8  ;;  %v3563_v48 = vmul.f32 %v4035_v24, %v4035_v24 }
 0x5c3   :  { %v3085_v0 = vpop.f32.mrf.mxu0  ;;  %v3627_v29 = vmul.f32 0.0051, %v6855_v10  ;;  %v4037_v8 = vadd.f32 -1.0, %v6857_v42  ;;  %v3751_v10 = vsel %vm3294_vm1, %v3687_v12, 0.0  ;;  %v4039_v42 = vadd.f32 -1.0, %v6864_v41 }
 0x5c4   :  { %v3213_v53 = vmul.f32 0.0078125, %v3085_v0  ;;  %v3438_v21 = vadd.f32 %v3437_v18, %v3375_v55  ;;  %v6912_v46 = vmul.f32 %v6905_v56, %v6905_v56  ;;  %v6968_v18 = vadd.s32 88, %v6899_v1 }
 0x5c5   :  { %v3087_v20 = vpop.f32.mrf.mxu0  ;;  %v6971_v0 = vadd.s32 96, %v6899_v1  ;;  %v6992_v41 = vadd.s32 104, %v6899_v1  ;;  %v3691_v47 = vsub.f32 %v3563_v48, %v3627_v29  ;;  %v3565_v5 = vmul.f32 %v4037_v8, %v4037_v8 }
 0x5c6   :  { %v3377_v7 = vmul.f32 %v3213_v53, %v3213_v53  ;;  %v6914_v15 = vmul.f32 0.0078125, %v3087_v20  ;;  %v3439_v28 = vadd.f32 %v3438_v21, %v6912_v46  ;;  %v7003_v24 = vadd.s32 112, %v6899_v1 }
 0x5c7   :  { %v3089_v37 = vpop.f32.mrf.mxu0  ;;  %v4045_v48 = vadd.f32 -1.0, %v6885_v13  ;;  %v4049_v63 = vadd.f32 -1.0, %v6905_v56  ;;  %vm3314_vm11 = vcmp.eq.s32.totalorder %v6968_v18, %v6901_v51  ;;  %vm3316_vm12 = vcmp.eq.s32.totalorder %v6971_v0, %v6901_v51 }
 0x5c8   :  { %v6926_v34 = vmul.f32 %v6914_v15, %v6914_v15  ;;  %v3215_v33 = vmul.f32 0.0078125, %v3089_v37  ;;  %v3440_v4 = vadd.f32 %v3439_v28, %v3377_v7  ;;  %v3749_v7 = vsel %vm3292_vm0, %v3685_v11, 0.0 }
 0x5c9   :  { %v3093_v26 = vpop.f32.mrf.mxu0  ;;  %v3753_v28 = vsel %vm3296_vm2, %v3689_v9, 0.0  ;;  %v3814_v45 = vadd.f32 %v3751_v10, %v3749_v7  ;;  %vm3318_vm13 = vcmp.eq.s32.totalorder %v6992_v41, %v6901_v51  ;;  %vm3320_vm14 = vcmp.eq.s32.totalorder %v7003_v24, %v6901_v51 }
 0x5ca   :  { %v3379_v39 = vmul.f32 %v3215_v33, %v3215_v33  ;;  %v6934_v60 = vmul.f32 0.0078125, %v3093_v26  ;;  %v3441_v38 = vadd.f32 %v3440_v4, %v6926_v34  ;;  %v3629_v33 = vmul.f32 0.0051, %v6862_v57 }
 0x5cb   :  { %v3095_v32 = vpop.f32.mrf.mxu0  ;;  %v3567_v4 = vmul.f32 %v4039_v42, %v4039_v42  ;;  %v3631_v26 = vmul.f32 0.0051, %v6869_v62  ;;  %v3816_v57 = vadd.f32 %v3814_v45, %v3753_v28  ;;  %v3755_v62 = vsel %vm3298_vm3, %v3691_v47, 0.0 }
 0x5cc   :  { %v6956_v2 = vmul.f32 %v6934_v60, %v6934_v60  ;;  %v3442_v40 = vadd.f32 %v3441_v38, %v3379_v39  ;;  %v3217_v19 = vmul.f32 0.0078125, %v3095_v32  ;;  %v4043_v38 = vadd.f32 -1.0, %v6878_v52 }
 0x5cd   :  { %v3097_v44 = vpop.f32.mrf.mxu0  ;;  %v3693_v9 = vsub.f32 %v3565_v5, %v3629_v33  ;;  %v3633_v52 = vmul.f32 0.0051, %v6876_v36  ;;  %v3818_v10 = vadd.f32 %v3816_v57, %v3755_v62  ;;  %v4047_v28 = vadd.f32 -1.0, %v6892_v16 }
 0x5ce   :  { %v6963_v55 = vmul.f32 0.0078125, %v3097_v44  ;;  %v3443_v14 = vadd.f32 %v3442_v40, %v6956_v2  ;;  %v3381_v53 = vmul.f32 %v3217_v19, %v3217_v19  ;;  %v3569_v44 = vmul.f32 %v4041_v23, %v4041_v23 }
 0x5cf   :  { %v3099_v35 = vpop.f32.mrf.mxu0  ;;  %v3571_v42 = vmul.f32 %v4043_v38, %v4043_v38  ;;  %v3757_v7 = vsel %vm3300_vm4, %v3693_v9, 0.0  ;;  %v3573_v5 = vmul.f32 %v4045_v48, %v4045_v48  ;;  %v3637_v33 = vmul.f32 0.0051, %v6890_v50 }
 0x5d0   :  { %v6979_v21 = vmul.f32 %v6963_v55, %v6963_v55  ;;  %v3219_v20 = vmul.f32 0.0078125, %v3099_v35  ;;  %v3444_v25 = vadd.f32 %v3443_v14, %v3381_v53  ;;  %v3695_v14 = vsub.f32 %v3567_v4, %v3631_v26 }
 0x5d1   :  { %v3103_v37 = vpop.f32.mrf.mxu0  ;;  %v7021_v53 = vadd.s32 120, %v6899_v1  ;;  %v3697_v47 = vsub.f32 %v3569_v44, %v3633_v52  ;;  %v4051_v50 = vadd.f32 -1.0, %v6914_v15  ;;  %v3639_v57 = vmul.f32 0.0051, %v6897_v59 }
 0x5d2   :  { %v3383_v30 = vmul.f32 %v3219_v20, %v3219_v20  ;;  %v3445_v11 = vadd.f32 %v3444_v25, %v6979_v21  ;;  %v6997_v6 = vmul.f32 0.0078125, %v3103_v37  ;;  %v3635_v20 = vmul.f32 0.0051, %v6883_v58 }
 0x5d3   :  { %v3105_v17 = vpop.f32.mrf.mxu0  ;;  %v3759_v45 = vsel %vm3302_vm5, %v3695_v14, 0.0  ;;  %v3577_v9 = vmul.f32 %v4049_v63, %v4049_v63  ;;  %v3579_v48 = vmul.f32 %v4051_v50, %v4051_v50  ;;  %v3645_v43 = vmul.f32 0.0051, %v6956_v2 }
 0x5d4   :  { %v3221_v39 = vmul.f32 0.0078125, %v3105_v17  ;;  %v3446_v32 = vadd.f32 %v3445_v11, %v3383_v30  ;;  %v7008_v54 = vmul.f32 %v6997_v6, %v6997_v6  ;;  %v3820_v11 = vadd.f32 %v3818_v10, %v3757_v7 }
 0x5d5   :  { %v3107_v12 = vpop.f32.mrf.mxu0  ;;  %v3699_v17 = vsub.f32 %v3571_v42, %v3635_v20  ;;  %v7082_v7 = vadd.s32 136, %v6899_v1  ;;  %vm3322_vm15 = vcmp.eq.s32.totalorder %v7021_v53, %v6901_v51 }
 0x5d6   :  { %v3385_v40 = vmul.f32 %v3221_v39, %v3221_v39  ;;  %v7015_v19 = vmul.f32 0.0078125, %v3107_v12  ;;  %v3447_v29 = vadd.f32 %v3446_v32, %v7008_v54  ;;  %v3575_v39 = vmul.f32 %v4047_v28, %v4047_v28 }
 0x5d7   :  { %v3109_v8 = vpop.f32.mrf.mxu0  ;;  %v3822_v38 = vadd.f32 %v3820_v11, %v3759_v45  ;;  %v3761_v32 = vsel %vm3304_vm6, %v3697_v47, 0.0  ;;  %v3701_v12 = vsub.f32 %v3573_v5, %v3637_v33  ;;  %v3763_v52 = vsel %vm3306_vm7, %v3699_v17, 0.0 }
 0x5d8   :  { %v7025_v22 = vmul.f32 %v7015_v19, %v7015_v19  ;;  %v3223_v35 = vmul.f32 0.0078125, %v3109_v8  ;;  %v3448_v36 = vadd.f32 %v3447_v29, %v3385_v40  ;;  %v3641_v40 = vmul.f32 0.0051, %v6912_v46 }
 0x5d9   :  { %v3113_v13 = vpop.f32.mrf.mxu0  ;;  %v3643_v29 = vmul.f32 0.0051, %v6926_v34  ;;  %v3703_v14 = vsub.f32 %v3575_v39, %v3639_v57  ;;  %v3824_v42 = vadd.f32 %v3822_v38, %v3761_v32  ;;  %v7076_v34 = vadd.s32 128, %v6901_v51 }
 0x5da   :  { %v3387_v25 = vmul.f32 %v3223_v35, %v3223_v35  ;;  %v3224_v37 = vmul.f32 0.0078125, %v3113_v13  ;;  %v3449_v58 = vadd.f32 %v3448_v36, %v7025_v22  ;;  %v4053_v35 = vadd.f32 -1.0, %v6934_v60 }
 0x5db   :  { %v3115_v30 = vpop.f32.mrf.mxu0  ;;  %v3765_v60 = vsel %vm3308_vm8, %v3701_v12, 0.0  ;;  %v3705_v13 = vsub.f32 %v3577_v9, %v3641_v40  ;;  %v4057_v32 = vadd.f32 -1.0, %v6997_v6  ;;  %v3647_v40 = vmul.f32 0.0051, %v6979_v21 }
 0x5dc   :  { %v3388_v23 = vmul.f32 %v3224_v37, %v3224_v37  ;;  %v7042_v16 = vmul.f32 0.0078125, %v3115_v30  ;;  %v3450_v4 = vadd.f32 %v3449_v58, %v3387_v25  ;;  %v3826_v25 = vadd.f32 %v3824_v42, %v3763_v52 }
 0x5dd   :  { %v3117_v26 = vpop.f32.mrf.mxu0  ;;  %v3707_v37 = vsub.f32 %v3579_v48, %v3643_v29  ;;  %v3767_v58 = vsel %vm3310_vm9, %v3703_v14, 0.0  ;;  %v3581_v30 = vmul.f32 %v4053_v35, %v4053_v35  ;;  %v4059_v52 = vadd.f32 -1.0, %v7015_v19 }
 0x5de   :  { %v7052_v56 = vmul.f32 %v7042_v16, %v7042_v16  ;;  %v3226_v31 = vmul.f32 0.0078125, %v3117_v26  ;;  %v3451_v15 = vadd.f32 %v3450_v4, %v3388_v23  ;;  %v3828_v63 = vadd.f32 %v3826_v25, %v3765_v60 }
 0x5df   :  { %v3119_v62 = vpop.f32.mrf.mxu0  ;;  %v4055_v23 = vadd.f32 -1.0, %v6963_v55  ;;  %v3769_v4 = vsel %vm3312_vm10, %v3705_v13, 0.0  ;;  %v3771_v39 = vsel %vm3314_vm11, %v3707_v37, 0.0  ;;  %v3709_v38 = vsub.f32 %v3581_v30, %v3645_v43 }
 0x5e0   :  { %v3390_v59 = vmul.f32 %v3226_v31, %v3226_v31  ;;  %v7058_v44 = vmul.f32 0.0078125, %v3119_v62  ;;  %v3452_v8 = vadd.f32 %v3451_v15, %v7052_v56  ;;  %v3830_v55 = vadd.f32 %v3828_v63, %v3767_v58 }
 0x5e1   :  { %v3123_v27 = vpop.f32.mrf.mxu0  ;;  %v7111_v31 = vadd.s32 152, %v6899_v1  ;;  %v3583_v9 = vmul.f32 %v4055_v23, %v4055_v23  ;;  %v7123_v6 = vadd.s32 160, %v6899_v1  ;;  %v7129_v21 = vadd.s32 168, %v6899_v1 }
 0x5e2   :  { %v7068_v10 = vmul.f32 %v7058_v44, %v7058_v44  ;;  %v3228_v46 = vmul.f32 0.0078125, %v3123_v27  ;;  %v3453_v20 = vadd.f32 %v3452_v8, %v3390_v59  ;;  %v3832_v62 = vadd.f32 %v3830_v55, %v3769_v4 }
 0x5e3   :  { %v3125_v36 = vpop.f32.mrf.mxu0  ;;  %v7132_v35 = vadd.s32 176, %v6899_v1  ;;  %v3773_v19 = vsel %vm3316_vm12, %v3709_v38, 0.0  ;;  %v3649_v42 = vmul.f32 0.0051, %v7008_v54  ;;  %v4062_v60 = vadd.f32 -1.0, %v7042_v16 }
 0x5e4   :  { %v3392_v28 = vmul.f32 %v3228_v46, %v3228_v46  ;;  %v3454_v47 = vadd.f32 %v3453_v20, %v7068_v10  ;;  %v7085_v5 = vmul.f32 0.0078125, %v3125_v36  ;;  %v3834_v8 = vadd.f32 %v3832_v62, %v3771_v39 }
 0x5e5   :  { %v3127_v33 = vpop.f32.mrf.mxu0  ;;  %v3585_v46 = vmul.f32 %v4057_v32, %v4057_v32  ;;  %v3711_v36 = vsub.f32 %v3583_v9, %v3647_v40  ;;  %v3587_v37 = vmul.f32 %v4059_v52, %v4059_v52  ;;  %vm3325_vm0 = vcmp.eq.s32.totalorder %v7073_v3, %v7076_v34 }
 0x5e6   :  { %v3230_v45 = vmul.f32 0.0078125, %v3127_v33  ;;  %v3455_v11 = vadd.f32 %v3454_v47, %v3392_v28  ;;  %v7094_v17 = vmul.f32 %v7085_v5, %v7085_v5  ;;  %v3651_v47 = vmul.f32 0.0051, %v7025_v22 }
 0x5e7   :  { %v3129_v50 = vpop.f32.mrf.mxu0  ;;  %v4064_v0 = vadd.f32 -1.0, %v7058_v44  ;;  %vm3327_vm1 = vcmp.eq.s32.totalorder %v7082_v7, %v7076_v34  ;;  %v7151_v30 = vadd.s32 184, %v6899_v1  ;;  %v7154_v43 = vadd.s32 192, %v6899_v1 }
 0x5e8   :  { %v3394_v2 = vmul.f32 %v3230_v45, %v3230_v45  ;;  %v7104_v26 = vmul.f32 0.0078125, %v3129_v50  ;;  %v3456_v57 = vadd.f32 %v3455_v11, %v7094_v17  ;;  %v3836_v22 = vadd.f32 %v3834_v8, %v3773_v19 }
 0x5e9   :  { %v3133_v61 = vpop.f32.mrf.mxu0  ;;  %v3713_v45 = vsub.f32 %v3585_v46, %v3649_v42  ;;  %v3775_v23 = vsel %vm3318_vm13, %v3711_v36, 0.0  ;;  %v3590_v11 = vmul.f32 %v4062_v60, %v4062_v60  ;;  %v3654_v50 = vmul.f32 0.0051, %v7052_v56 }
 0x5ea   :  { %v7116_v12 = vmul.f32 %v7104_v26, %v7104_v26  ;;  %v3232_v15 = vmul.f32 0.0078125, %v3133_v61  ;;  %v3457_v18 = vadd.f32 %v3456_v57, %v3394_v2  ;;  %v3715_v55 = vsub.f32 %v3587_v37, %v3651_v47 }
 0x5eb   :  { %v3135_v59 = vpop.f32.mrf.mxu0  ;;  %v3592_v39 = vmul.f32 %v4064_v0, %v4064_v0  ;;  %v3656_v57 = vmul.f32 0.0051, %v7068_v10  ;;  %v4066_v38 = vadd.f32 -1.0, %v7085_v5  ;;  %v7168_v9 = vadd.s32 200, %v6899_v1 }
 0x5ec   :  { %v3396_v48 = vmul.f32 %v3232_v15, %v3232_v15  ;;  %v3233_v29 = vmul.f32 0.0078125, %v3135_v59  ;;  %v3458_v27 = vadd.f32 %v3457_v18, %v7116_v12  ;;  %v3838_v41 = vadd.f32 %v3836_v22, %v3775_v23 }
 0x5ed   :  { %v3137_v14 = vpop.f32.mrf.mxu0  ;;  %v3777_v56 = vsel %vm3320_vm14, %v3713_v45, 0.0  ;;  %vm3329_vm2 = vcmp.eq.s32.totalorder %v7102_v49, %v7076_v34  ;;  %v7176_v10 = vadd.s32 208, %v6899_v1  ;;  %v3718_v5 = vsub.f32 %v3590_v11, %v3654_v50 }
 0x5ee   :  { %v7138_v20 = vmul.f32 %v3233_v29, %v3233_v29  ;;  %v3459_v13 = vadd.f32 %v3458_v27, %v3396_v48  ;;  %v3234_v28 = vmul.f32 0.0078125, %v3137_v14  ;;  %v4068_v18 = vadd.f32 -1.0, %v7104_v26 }
 0x5ef   :  { %v3139_v25 = vpop.f32.mrf.mxu0  ;;  %v3779_v8 = vsel %vm3322_vm15, %v3715_v55, 0.0  ;;  %v3720_v27 = vsub.f32 %v3592_v39, %v3656_v57  ;;  %vm3331_vm3 = vcmp.eq.s32.totalorder %v7111_v31, %v7076_v34  ;;  %v3594_v19 = vmul.f32 %v4066_v38, %v4066_v38 }
 0x5f0   :  { %v7145_v33 = vmul.f32 0.0078125, %v3139_v25  ;;  %v3460_v54 = vadd.f32 %v3459_v13, %v7138_v20  ;;  %v3398_v58 = vmul.f32 %v3234_v28, %v3234_v28  ;;  %v3658_v46 = vmul.f32 0.0051, %v7094_v17 }
 0x5f1   :  { %v3143_v16 = vpop.f32.mrf.mxu0  ;;  %v4070_v42 = vadd.f32 -1.0, %v3233_v29  ;;  %v3840_v26 = vadd.f32 %v3838_v41, %v3777_v56  ;;  %v7186_v25 = vadd.s32 216, %v6899_v1  ;;  %v3782_v51 = vsel %vm3325_vm0, %v3718_v5, 0.0 }
 0x5f2   :  { %v7158_v44 = vmul.f32 %v7145_v33, %v7145_v33  ;;  %v3236_v63 = vmul.f32 0.0078125, %v3143_v16  ;;  %v3461_v4 = vadd.f32 %v3460_v54, %v3398_v58  ;;  %v3596_v53 = vmul.f32 %v4068_v18, %v4068_v18 }
 0x5f3   :  { %v3145_v2 = vpop.f32.mrf.mxu0  ;;  %v3660_v37 = vmul.f32 0.0051, %v7116_v12  ;;  %vm3333_vm4 = vcmp.eq.s32.totalorder %v7123_v6, %v7076_v34  ;;  %v3842_v47 = vadd.f32 %v3840_v26, %v3779_v8  ;;  %v3784_v0 = vsel %vm3327_vm1, %v3720_v27, 0.0 }
 0x5f4   :  { %v3400_v61 = vmul.f32 %v3236_v63, %v3236_v63  ;;  %v3462_v32 = vadd.f32 %v3461_v4, %v7158_v44  ;;  %v3237_v15 = vmul.f32 0.0078125, %v3145_v2  ;;  %v3722_v16 = vsub.f32 %v3594_v19, %v3658_v46 }
 0x5f5   :  { %v3147_v62 = vpop.f32.mrf.mxu0  ;;  %v3598_v22 = vmul.f32 %v4070_v42, %v4070_v42  ;;  %v3662_v3 = vmul.f32 0.0051, %v7138_v20  ;;  %v3845_v23 = vadd.f32 %v3842_v47, %v3782_v51  ;;  %v4072_v12 = vadd.f32 -1.0, %v7145_v33 }
 0x5f6   :  { %v3238_v40 = vmul.f32 0.0078125, %v3147_v62  ;;  %v3463_v59 = vadd.f32 %v3462_v32, %v3400_v61  ;;  %v3401_v52 = vmul.f32 %v3237_v15, %v3237_v15  ;;  %v7200_v50 = vadd.s32 224, %v6899_v1 }
 0x5f7   :  { %v3149_v48 = vpop.f32.mrf.mxu0  ;;  %v3724_v4 = vsub.f32 %v3596_v53, %v3660_v37  ;;  %vm3335_vm5 = vcmp.eq.s32.totalorder %v7129_v21, %v7076_v34  ;;  %v4074_v7 = vadd.f32 -1.0, %v3237_v15  ;;  %v3847_v57 = vadd.f32 %v3845_v23, %v3784_v0 }
 0x5f8   :  { %v3402_v24 = vmul.f32 %v3238_v40, %v3238_v40  ;;  %v3239_v14 = vmul.f32 0.0078125, %v3149_v48  ;;  %v3464_v36 = vadd.f32 %v3463_v59, %v3401_v52  ;;  %v7205_v38 = vadd.s32 232, %v6899_v1 }
 0x5f9   :  { %v3153_v60 = vpop.f32.mrf.mxu0  ;;  %v3786_v33 = vsel %vm3329_vm2, %v3722_v16, 0.0  ;;  %v3726_v32 = vsub.f32 %v3598_v22, %v3662_v3  ;;  %vm3337_vm6 = vcmp.eq.s32.totalorder %v7132_v35, %v7076_v34  ;;  %v3600_v56 = vmul.f32 %v4072_v12, %v4072_v12 }
 0x5fa   :  { %v3403_v13 = vmul.f32 %v3239_v14, %v3239_v14  ;;  %v3240_v28 = vmul.f32 0.0078125, %v3153_v60  ;;  %v3465_v17 = vadd.f32 %v3464_v36, %v3402_v24  ;;  %v4076_v61 = vadd.f32 -1.0, %v3239_v14 }
 0x5fb   :  { %v3155_v29 = vpop.f32.mrf.mxu0  ;;  %v3664_v40 = vmul.f32 0.0051, %v7158_v44  ;;  %vm3339_vm7 = vcmp.eq.s32.totalorder %v7151_v30, %v7076_v34  ;;  %v3788_v49 = vsel %vm3331_vm3, %v3724_v4, 0.0  ;;  %v3602_v59 = vmul.f32 %v4074_v7, %v4074_v7 }
 0x5fc   :  { %v3404_v54 = vmul.f32 %v3240_v28, %v3240_v28  ;;  %v3241_v58 = vmul.f32 0.0078125, %v3155_v29  ;;  %v3466_v45 = vadd.f32 %v3465_v17, %v3403_v13  ;;  %v3666_v48 = vmul.f32 0.0051, %v3401_v52 }
 0x5fd   :  { %v3157_v63 = vpop.f32.mrf.mxu0  ;;  %v3849_v24 = vadd.f32 %v3847_v57, %v3786_v33  ;;  %v3604_v14 = vmul.f32 %v4076_v61, %v4076_v61  ;;  %v3668_v42 = vmul.f32 0.0051, %v3403_v13  ;;  %vm3341_vm8 = vcmp.eq.s32.totalorder %v7154_v43, %v7076_v34 }
 0x5fe   :  { %v3405_v11 = vmul.f32 %v3241_v58, %v3241_v58  ;;  %v3467_v2 = vadd.f32 %v3466_v45, %v3404_v54  ;;  %v3242_v55 = vmul.f32 0.0078125, %v3157_v63  ;;  %v4078_v19 = vadd.f32 -1.0, %v3241_v58 }
 0x5ff   :  { %v3159_v39 = vpop.f32.mrf.mxu0  ;;  %v3851_v28 = vadd.f32 %v3849_v24, %v3788_v49  ;;  %v3790_v31 = vsel %vm3333_vm4, %v3726_v32, 0.0  ;;  %v3728_v52 = vsub.f32 %v3600_v56, %v3664_v40  ;;  %vm3343_vm9 = vcmp.eq.s32.totalorder %v7168_v9, %v7076_v34 }
 0x600   :  { %v3243_v20 = vmul.f32 0.0078125, %v3159_v39  ;;  %v3468_v62 = vadd.f32 %v3467_v2, %v3405_v11  ;;  %v3406_v41 = vmul.f32 %v3242_v55, %v3242_v55  ;;  %v3730_v53 = vsub.f32 %v3602_v59, %v3666_v48 }
 0x601   :  { %v3163_v15 = vpop.f32.mrf.mxu0  ;;  %v3606_v47 = vmul.f32 %v4078_v19, %v4078_v19  ;;  %v3670_v0 = vmul.f32 0.0051, %v3405_v11  ;;  %vm3345_vm10 = vcmp.eq.s32.totalorder %v7176_v10, %v7076_v34  ;;  %v3732_v16 = vsub.f32 %v3604_v14, %v3668_v42 }
 0x602   :  { %v3407_v5 = vmul.f32 %v3243_v20, %v3243_v20  ;;  %v3244_v18 = vmul.f32 0.0078125, %v3163_v15  ;;  %v3469_v8 = vadd.f32 %v3468_v62, %v3406_v41  ;;  %v4080_v36 = vadd.f32 -1.0, %v3243_v20 }
 0x603   :  { %v3165_v27 = vpop.f32.mrf.mxu0  ;;  %v3792_v63 = vsel %vm3335_vm5, %v3728_v52, 0.0  ;;  %v3853_v7 = vadd.f32 %v3851_v28, %v3790_v31  ;;  %vm3347_vm11 = vcmp.eq.s32.totalorder %v7186_v25, %v7076_v34  ;;  %v3794_v57 = vsel %vm3337_vm6, %v3730_v53, 0.0 }
 0x604   :  { %v3408_v46 = vmul.f32 %v3244_v18, %v3244_v18  ;;  %v3470_v44 = vadd.f32 %v3469_v8, %v3407_v5  ;;  %v3245_v60 = vmul.f32 0.0078125, %v3165_v27  ;;  %v3608_v6 = vmul.f32 %v4080_v36, %v4080_v36 }
 0x605   :  { %v3167_v26 = vpop.f32.mrf.mxu0  ;;  %v3672_v22 = vmul.f32 0.0051, %v3407_v5  ;;  %v3734_v61 = vsub.f32 %v3606_v47, %v3670_v0  ;;  %v3855_v21 = vadd.f32 %v3853_v7, %v3792_v63  ;;  %v3796_v32 = vsel %vm3339_vm7, %v3732_v16, 0.0 }
 0x606   :  { %v3246_v51 = vmul.f32 0.0078125, %v3167_v26  ;;  %v3471_v37 = vadd.f32 %v3470_v44, %v3408_v46  ;;  %v3409_v13 = vmul.f32 %v3245_v60, %v3245_v60  ;;  %v4082_v17 = vadd.f32 -1.0, %v3245_v60 }
 0x607   :  { %v3169_v29 = vpop.f32.mrf.mxu0  ;;  %v3736_v62 = vsub.f32 %v3608_v6, %v3672_v22  ;;  %v3857_v49 = vadd.f32 %v3855_v21, %v3794_v57  ;;  %v3798_v27 = vsel %vm3341_vm8, %v3734_v61, 0.0  ;;  %vm3349_vm12 = vcmp.eq.s32.totalorder %v7200_v50, %v7076_v34 }
 0x608   :  { %v3410_v54 = vmul.f32 %v3246_v51, %v3246_v51  ;;  %v3247_v58 = vmul.f32 0.0078125, %v3169_v29  ;;  %v3472_v3 = vadd.f32 %v3471_v37, %v3409_v13  ;;  %v3610_v2 = vmul.f32 %v4082_v17, %v4082_v17 }
 0x609   :  { %v3173_v45 = vpop.f32.mrf.mxu0  ;;  %v3674_v11 = vmul.f32 0.0051, %v3409_v13  ;;  %v3859_v19 = vadd.f32 %v3857_v49, %v3796_v32  ;;  %v3800_v46 = vsel %vm3343_vm9, %v3736_v62, 0.0  ;;  %vm3351_vm13 = vcmp.eq.s32.totalorder %v7205_v38, %v7076_v34 }
 0x60a   :  { %v3411_v23 = vmul.f32 %v3247_v58, %v3247_v58  ;;  %v4084_v12 = vadd.f32 -1.0, %v3247_v58  ;;  %v3248_v4 = vmul.f32 0.0078125, %v3173_v45  ;;  %v3473_v55 = vadd.f32 %v3472_v3, %v3410_v54 }
 0x60b   :  { %v3175_v39 = vpop.f32.mrf.mxu0  ;;  %v3738_v59 = vsub.f32 %v3610_v2, %v3674_v11  ;;  %v3861_v52 = vadd.f32 %v3859_v19, %v3798_v27  ;;  %v3287_v58 = vadd.s32 240, %v6899_v1  ;;  %v3288_v2 = vadd.s32 248, %v6899_v1 }
 0x60c   :  { %v3412_v20 = vmul.f32 %v3248_v4, %v3248_v4  ;;  %v3249_v33 = vmul.f32 0.0078125, %v3175_v39  ;;  %v3474_v41 = vadd.f32 %v3473_v55, %v3411_v23  ;;  %v3612_v56 = vmul.f32 %v4084_v12, %v4084_v12 }
 0x60d   :  { %v3177_v15 = vpop.f32.mrf.mxu0  ;;  %v3676_v40 = vmul.f32 0.0051, %v3411_v23  ;;  %v3802_v43 = vsel %vm3345_vm10, %v3738_v59, 0.0  ;;  %v3863_v29 = vadd.f32 %v3861_v52, %v3800_v46  ;;  %vm3353_vm14 = vcmp.eq.s32.totalorder %v3287_v58, %v7076_v34 }
 0x60e   :  { %v3413_v5 = vmul.f32 %v3249_v33, %v3249_v33  ;;  %v4086_v18 = vadd.f32 -1.0, %v3249_v33  ;;  %v3475_v48 = vadd.f32 %v3474_v41, %v3412_v20  ;;  %v3250_v35 = vmul.f32 0.0078125, %v3177_v15 }
 0x60f   :  { %v3179_v8 = vpop.f32.mrf.mxu0  ;;  %v3740_v60 = vsub.f32 %v3612_v56, %v3676_v40  ;;  %v3865_v22 = vadd.f32 %v3863_v29, %v3802_v43  ;;  %vm3355_vm15 = vcmp.eq.s32.totalorder %v3288_v2, %v7076_v34 }
 0x610   :  { %v3614_v24 = vmul.f32 %v4086_v18, %v4086_v18  ;;  %v3678_v14 = vmul.f32 0.0051, %v3413_v5  ;;  %v3251_v30 = vmul.f32 0.0078125, %v3179_v8  ;;  %v3476_v42 = vadd.f32 %v3475_v48, %v3413_v5 }
 0x611   :  { %v3414_v44 = vmul.f32 %v3250_v35, %v3250_v35  ;;  %v3183_v36 = vpop.f32.mrf.mxu0  ;;  %v3804_v10 = vsel %vm3347_vm11, %v3740_v60, 0.0 }
 0x612   :  { %v3415_v26 = vmul.f32 %v3251_v30, %v3251_v30  ;;  %v4088_v28 = vadd.f32 -1.0, %v3251_v30  ;;  %v3252_v31 = vmul.f32 0.0078125, %v3183_v36  ;;  %v3742_v37 = vsub.f32 %v3614_v24, %v3678_v14 }
 0x613   :  { %v3477_v51 = vadd.f32 %v3476_v42, %v3414_v44  ;;  %v3185_v53 = vpop.f32.mrf.mxu0  ;;  %v3867_v25 = vadd.f32 %v3865_v22, %v3804_v10 }
 0x614   :  { %v3616_v9 = vmul.f32 %v4088_v28, %v4088_v28  ;;  %v3680_v13 = vmul.f32 0.0051, %v3415_v26  ;;  %v3416_v17 = vmul.f32 %v3252_v31, %v3252_v31  ;;  %v3253_v0 = vmul.f32 0.0078125, %v3185_v53 }
 0x615   :  { %v3478_v47 = vadd.f32 %v3477_v51, %v3415_v26  ;;  %v3187_v54 = vpop.f32.mrf.mxu0  ;;  %v3806_v12 = vsel %vm3349_vm12, %v3742_v37, 0.0 }
 0x616   :  { %v3744_v16 = vsub.f32 %v3616_v9, %v3680_v13  ;;  %v3254_v6 = vmul.f32 0.0078125, %v3187_v54  ;;  %v3417_v45 = vmul.f32 %v3253_v0, %v3253_v0  ;;  %v4090_v63 = vadd.f32 -1.0, %v3253_v0 }
 0x617   :  { %v3479_v3 = vadd.f32 %v3478_v47, %v3416_v17  ;;  %v3189_v23 = vpop.f32.mrf.mxu0  ;;  %v3869_v50 = vadd.f32 %v3867_v25, %v3806_v12 }
 0x618   :  { %v3418_v4 = vmul.f32 %v3254_v6, %v3254_v6  ;;  %v3255_v7 = vmul.f32 0.0078125, %v3189_v23  ;;  %v3618_v55 = vmul.f32 %v4090_v63, %v4090_v63  ;;  %v3682_v39 = vmul.f32 0.0051, %v3417_v45 }
 0x619   :  { %v3480_v11 = vadd.f32 %v3479_v3, %v3417_v45  ;;  %v3808_v20 = vsel %vm3351_vm13, %v3744_v16, 0.0 }
 0x61a   :  { %v3419_v57 = vmul.f32 %v3255_v7, %v3255_v7  ;;  %v4092_v61 = vadd.f32 -1.0, %v3255_v7  ;;  %v3746_v33 = vsub.f32 %v3618_v55, %v3682_v39  ;;  %v3871_v15 = vadd.f32 %v3869_v50, %v3808_v20 }
 0x61b   :  { %v3481_v21 = vadd.f32 %v3480_v11, %v3418_v4 }
 0x61c   :  { %v3620_v32 = vmul.f32 %v4092_v61, %v4092_v61  ;;  %v3684_v62 = vmul.f32 0.0051, %v3419_v57  ;;  %v3810_v1 = vsel %vm3353_vm14, %v3746_v33, 0.0 }
 0x61d   :  { %v3482_v41 = vadd.f32 %v3481_v21, %v3419_v57  ;;  %v3873_v40 = vadd.f32 %v3871_v15, %v3810_v1 }
 0x61e   :  { %v3748_v56 = vsub.f32 %v3620_v32, %v3684_v62 }
 0x61f   :  { %3483 = vadd.xlane.f32.xlu0 %v3482_v41 }
 0x620   :  { %v3812_v5 = vsel %vm3355_vm15, %v3748_v56, 0.0 }
 0x621   :  { %v3875_v18 = vadd.f32 %v3873_v40, %v3812_v5 }
 0x623   :  { %3876 = vadd.xlane.f32.xlu1 %v3875_v18 }
 0x6a8   :  { %v3484_v49 = vpop.xlane.xlu0 %3483 }
 0x6a9   :  { %v3485_v59 = vrot.slane %v3484_v49, 4 }
 0x6ab   :  { %v3486_v38 = vadd.f32 %v3485_v59, %v3484_v49 }
 0x6ac   :  { %v3877_v48 = vpop.xlane.xlu1 %3876 }
 0x6ad   :  { %v3487_v35 = vrot.slane %v3486_v38, 2  ;;  %v3878_v8 = vrot.slane %v3877_v48, 4 }
 0x6af   :  { %v3879_v27 = vadd.f32 %v3878_v8, %v3877_v48  ;;  %v3488_v24 = vadd.f32 %v3487_v35, %v3486_v38 }
 0x6b1   :  { %v3880_v14 = vrot.slane %v3879_v27, 2  ;;  %v3489_v30 = vrot.slane %v3488_v24, 1 }
 0x6b3   :  { %v3881_v19 = vadd.f32 %v3880_v14, %v3879_v27  ;;  %v3490_v34 = vadd.f32 %v3489_v30, %v3488_v24 }
 0x6b5   :  { %4221 = vpush %v3490_v34  ;;  %v3882_v46 = vrot.slane %v3881_v19, 1 }
 0x6b7   :  { %v3883_v42 = vadd.f32 %v3882_v46, %v3881_v19 }
 0x6b9   :  { %4223 = vpush %v3883_v42 }
 0x6e6   :  { %s4222_s4 = spop %4221 }
 0x6e7   :  { %s3492_s28 = smul.f32 0.0051, %s4222_s4 }
 0x6ea   :  { %s4224_s29 = spop %4223 }
 0x6eb   :  { %s3885_s30 = sadd.f32 %s4224_s29, %s3492_s28 }
 0x6ed   :  { %3887 = sst [smem:[#allocation2]] %s3885_s30 }
 0x6ee   :  { %3895 = dma.smem_to_hbm %s4446_s6, 16, %s7272_s5, [#allocation3]  }
 0x6ef   :  { %4443 = dma.done.wait [#allocation3], 16  }
 0x6f0   :  { %4444 = vsyncadd [#allocation3], 4294967280 }
 0x6f1   :  { %3899 = sfence }
 0x6f2   :  { %3900 = vsyncpa [#allocation3], 1 }

</bundles_post_ra>
